<compile_context>
chip_gen: v7x
topology: tpu7x:2x2x1
jax: 0.10.0
libtpu: 0.0.40
codegen_flags: <defaults>
</compile_context>

<pallas_src>
import functools

import jax
import jax.numpy as jnp
from jax.experimental import pallas as pl
from jax.experimental.pallas import tpu as pltpu


def _round_up(x: int, m: int) -> int:
    return (x + m - 1) // m * m


# ----------------------------------------------------------------------------
# Kernel 1: gridded matmul + bias (+ ReLU)  — used for the conv layers
# ----------------------------------------------------------------------------
def _matmul_bias_kernel(x_ref, w_ref, b_ref, o_ref, acc_ref, *, relu: bool):
    k = pl.program_id(2)

    @pl.when(k == 0)
    def _init():
        acc_ref[...] = jnp.zeros_like(acc_ref)

    acc_ref[...] += jnp.dot(x_ref[...], w_ref[...],
                            preferred_element_type=jnp.float32)

    @pl.when(k == pl.num_programs(2) - 1)
    def _finalize():
        out = acc_ref[...] + b_ref[...]          # (tm,tn) + (1,tn) broadcast
        if relu:
            out = jnp.maximum(out, 0.0)
        o_ref[...] = out.astype(o_ref.dtype)


def pallas_matmul_bias(x, w, b, *, relu: bool, out_dtype=jnp.float32,
                       tm=256, tn=256, tk=256):
    """x: (M, K), w: (K, N), b: (N,)  ->  relu(x @ w + b) : (M, N)."""
    M, K = x.shape
    K2, N = w.shape
    assert K == K2

    # Clamp tiles to (bf16-friendly) padded dims; pad operands with zeros.
    tm = min(tm, _round_up(M, 16))
    tn = min(tn, _round_up(N, 128))
    tk = min(tk, _round_up(K, 128))
    Mp, Kp, Np = _round_up(M, tm), _round_up(K, tk), _round_up(N, tn)

    xp = jnp.pad(x.astype(jnp.bfloat16), ((0, Mp - M), (0, Kp - K)))
    wp = jnp.pad(w.astype(jnp.bfloat16), ((0, Kp - K), (0, Np - N)))
    bp = jnp.pad(b.astype(jnp.float32), (0, Np - N)).reshape(1, Np)

    grid = (Mp // tm, Np // tn, Kp // tk)
    out = pl.pallas_call(
        functools.partial(_matmul_bias_kernel, relu=relu),
        out_shape=jax.ShapeDtypeStruct((Mp, Np), out_dtype),
        grid_spec=pltpu.PrefetchScalarGridSpec(
            num_scalar_prefetch=0,
            grid=grid,
            in_specs=[
                pl.BlockSpec((tm, tk), lambda i, j, k: (i, k)),
                pl.BlockSpec((tk, tn), lambda i, j, k: (k, j)),
                pl.BlockSpec((1, tn), lambda i, j, k: (0, j)),
            ],
            out_specs=pl.BlockSpec((tm, tn), lambda i, j, k: (i, j)),
            scratch_shapes=[pltpu.VMEM((tm, tn), jnp.float32)],
        ),
        compiler_params=pltpu.CompilerParams(
            dimension_semantics=("parallel", "parallel", "arbitrary"),
            vmem_limit_bytes=32 * 1024 * 1024,
        ),
    )(xp, wp, bp)
    return out[:M, :N]


# ----------------------------------------------------------------------------
# Kernel 2: fused FC1 + ReLU + FC2 (+ per-action softmax + clamp) head
# ----------------------------------------------------------------------------
def _head_kernel(x_ref, w1_ref, b1_ref, w2_ref, b2_ref, o_ref, *,
                 n_action: int, n_atoms: int, use_softmax: bool):
    h = jnp.dot(x_ref[...], w1_ref[...], preferred_element_type=jnp.float32)
    h = jnp.maximum(h + b1_ref[...], 0.0)
    q = jnp.dot(h.astype(w2_ref.dtype), w2_ref[...],
                preferred_element_type=jnp.float32) + b2_ref[...]

    # Lane-dense full-block store (padded tail columns are sliced off by the
    # wrapper); softmax results overwrite the valid columns below.
    o_ref[...] = q.astype(o_ref.dtype)

    if use_softmax:
        # Per-action softmax over the atom axis (f32), clamped like reference.
        for a in range(n_action):           # small, static
            lo, hi = a * n_atoms, (a + 1) * n_atoms
            logits = q[:, lo:hi]
            m = jnp.max(logits, axis=-1, keepdims=True)
            e = jnp.exp(logits - m)
            s = jnp.sum(e, axis=-1, keepdims=True)
            p = e * pl.reciprocal(s, approx=True)
            p = jnp.clip(p, 1e-8, 1.0 - 1e-8)
            o_ref[:, lo:hi] = p.astype(o_ref.dtype)


def pallas_head(x, w1, b1, w2, b2, *, n_action: int, n_atoms: int,
                use_softmax: bool):
    """x: (B, 3136) -> (B, n_action*n_atoms) distribution logits/probs."""
    B, K1 = x.shape
    H = w1.shape[1]
    N = w2.shape[1]
    assert N == n_action * n_atoms

    Np = _round_up(N, 128)                      # lane-dense output (204 -> 256)
    tb = min(128, _round_up(B, 16))             # grid over batch if B grows
    Bp = _round_up(B, tb)

    xp = jnp.pad(x.astype(jnp.bfloat16), ((0, Bp - B), (0, 0)))
    w1p = w1.astype(jnp.bfloat16)
    w2p = jnp.pad(w2.astype(jnp.bfloat16), ((0, 0), (0, Np - N)))
    b1p = b1.astype(jnp.float32).reshape(1, H)
    b2p = jnp.pad(b2.astype(jnp.float32), (0, Np - N)).reshape(1, Np)

    out = pl.pallas_call(
        functools.partial(_head_kernel, n_action=n_action, n_atoms=n_atoms,
                          use_softmax=use_softmax),
        out_shape=jax.ShapeDtypeStruct((Bp, Np), jnp.float32),
        grid_spec=pltpu.PrefetchScalarGridSpec(
            num_scalar_prefetch=0,
            grid=(Bp // tb,),
            in_specs=[
                pl.BlockSpec((tb, K1), lambda i: (i, 0)),
                pl.BlockSpec((K1, H), lambda i: (0, 0)),   # weights VMEM-resident
                pl.BlockSpec((1, H), lambda i: (0, 0)),
                pl.BlockSpec((H, Np), lambda i: (0, 0)),
                pl.BlockSpec((1, Np), lambda i: (0, 0)),
            ],
            out_specs=pl.BlockSpec((tb, Np), lambda i: (i, 0)),
        ),
        compiler_params=pltpu.CompilerParams(
            dimension_semantics=("parallel",),
            vmem_limit_bytes=32 * 1024 * 1024,
        ),
    )(xp, w1p, b1p, w2p, b2p)
    return out[:B, :N]


# ----------------------------------------------------------------------------
# Glue: im2col lowering of a strided "valid" conv (layout only, no compute)
# ----------------------------------------------------------------------------
def im2col(x_nhwc, kh, kw, stride):
    """x_nhwc: (B, H, W, C) -> patches (B*OH*OW, kh*kw*C), plus (OH, OW)."""
    B, H, W, C = x_nhwc.shape
    OH = (H - kh) // stride + 1
    OW = (W - kw) // stride + 1
    cols = []
    for i in range(kh):
        for j in range(kw):
            patch = x_nhwc[:, i:i + stride * OH:stride, j:j + stride * OW:stride, :]
            cols.append(patch)                       # (B, OH, OW, C)
    patches = jnp.stack(cols, axis=3)                # (B, OH, OW, kh*kw, C)
    patches = patches.reshape(B, OH, OW, kh * kw * C)
    return patches.reshape(B * OH * OW, kh * kw * C), OH, OW


def conv2d_relu(x_nhwc, w_khkwcico, b, stride):
    """Valid conv + ReLU via im2col + gridded Pallas matmul (NHWC, bf16 out)."""
    KH, KW, Cin, Cout = w_khkwcico.shape
    B = x_nhwc.shape[0]
    patches, OH, OW = im2col(x_nhwc, KH, KW, stride)        # (B*OH*OW, KH*KW*Cin)
    w2d = w_khkwcico.reshape(KH * KW * Cin, Cout)           # matches patch order
    y = pallas_matmul_bias(patches, w2d, b, relu=True, out_dtype=jnp.bfloat16)
    return y.reshape(B, OH, OW, Cout)


# ----------------------------------------------------------------------------
# Parameter init (deterministic synthetic weights; bf16 weights, f32 biases)
# ----------------------------------------------------------------------------
def init_params(key, hist_len, n_action, n_atoms):
    ks = jax.random.split(key, 10)

    def conv_w(k, kh, kw, cin, cout):
        scale = 1.0 / jnp.sqrt(kh * kw * cin)
        return (jax.random.normal(k, (kh, kw, cin, cout), jnp.float32)
                * scale).astype(jnp.bfloat16)

    def lin_w(k, fin, fout):
        scale = 1.0 / jnp.sqrt(fin)
        return (jax.random.normal(k, (fin, fout), jnp.float32)
                * scale).astype(jnp.bfloat16)

    # NOTE: f1_w rows are laid out in NHWC (H, W, C) flatten order so that no
    # transpose is needed before the flatten.  When importing real PyTorch
    # weights (in-features ordered (C, H, W)) they must be permuted:
    #   w = w_torch.T.reshape(64, 7, 7, 512).transpose(1, 2, 0, 3).reshape(3136, 512)
    params = {
        "c1_w": conv_w(ks[0], 8, 8, hist_len, 32),
        "c1_b": jax.random.normal(ks[1], (32,), jnp.float32) * 0.01,
        "c2_w": conv_w(ks[2], 4, 4, 32, 64),
        "c2_b": jax.random.normal(ks[3], (64,), jnp.float32) * 0.01,
        "c3_w": conv_w(ks[4], 3, 3, 64, 64),
        "c3_b": jax.random.normal(ks[5], (64,), jnp.float32) * 0.01,
        "f1_w": lin_w(ks[6], 3136, 512),
        "f1_b": jax.random.normal(ks[7], (512,), jnp.float32) * 0.01,
        "f2_w": lin_w(ks[8], 512, n_action * n_atoms),
        "f2_b": jax.random.normal(ks[9], (n_action * n_atoms,), jnp.float32) * 0.01,
    }
    return params


# ----------------------------------------------------------------------------
# Forward pass
# ----------------------------------------------------------------------------
@functools.partial(jax.jit, static_argnums=(2, 3, 4))
def distributional_dqn_forward(x_nchw, params, n_action, n_atoms, use_softmax):
    """x_nchw: (B, hist_len, 84, 84) float32 -> (B, n_action, n_atoms)."""
    B = x_nchw.shape[0]
    x = jnp.transpose(x_nchw, (0, 2, 3, 1)).astype(jnp.bfloat16)   # NCHW -> NHWC

    x = conv2d_relu(x, params["c1_w"], params["c1_b"], stride=4)   # (B, 20, 20, 32)
    x = conv2d_relu(x, params["c2_w"], params["c2_b"], stride=2)   # (B, 9, 9, 64)
    x = conv2d_relu(x, params["c3_w"], params["c3_b"], stride=1)   # (B, 7, 7, 64)

    # NHWC flatten (no transpose): f1_w rows were generated in matching order.
    x = x.reshape(B, 7 * 7 * 64)                                    # (B, 3136)

    out = pallas_head(x, params["f1_w"], params["f1_b"],
                      params["f2_w"], params["f2_b"],
                      n_action=n_action, n_atoms=n_atoms,
                      use_softmax=use_softmax)                      # (B, A*Z)

    # chunk(n_action, dim=1) + stack(dim=1)  ==  reshape (B, A, Z)
    return out.reshape(B, n_action, n_atoms)


# ----------------------------------------------------------------------------
if __name__ == "__main__":
    key = jax.random.PRNGKey(0)
    k_x, k_p = jax.random.split(key)

    B, hist_len = 2, 4
    n_action, n_atoms = 4, 51
    use_softmax = True

    # The 3136-wide Linear implies 84x84 spatial input (standard Atari DQN).
    x = jax.random.normal(k_x, (B, hist_len, 84, 84), dtype=jnp.float32)
    params = init_params(k_p, hist_len, n_action, n_atoms)

    out = distributional_dqn_forward(x, params, n_action, n_atoms, use_softmax)
    out = jax.block_until_ready(out)

    assert out.shape == (B, n_action, n_atoms), out.shape
    assert bool(jnp.all(jnp.isfinite(out)))
    if use_softmax:
        # distributions should sum to ~1 per action (approx reciprocal + clamp)
        sums = jnp.sum(out, axis=-1)
        assert bool(jnp.all(jnp.abs(sums - 1.0) < 1e-2)), sums

    print("KERNEL_OK")
</pallas_src>

<mosaic_0001>
module attributes {stable_mosaic.version = 11 : i64} {
  func.func @_matmul_bias_kernel(%arg0: i32, %arg1: i32, %arg2: i32, %arg3: memref<256x256xbf16, #tpu.memory_space<vmem>>, %arg4: memref<256x128xbf16, #tpu.memory_space<vmem>>, %arg5: memref<1x128xf32, #tpu.memory_space<vmem>>, %arg6: memref<256x128xbf16, #tpu.memory_space<vmem>>, %arg7: memref<256x128xf32, #tpu.memory_space<vmem>>) attributes {dimension_semantics = [#tpu.dimension_semantics<parallel>, #tpu.dimension_semantics<parallel>, #tpu.dimension_semantics<arbitrary>], iteration_bounds = array<i64: 4, 1, 1>, scalar_prefetch = 0 : i64, scratch_operands = 1 : i64, tpu.core_type = #tpu.core_type<tc>, window_params = [{transform_indices = @transform_0, window_bounds = array<i64: 256, 256>}, {transform_indices = @transform_1, window_bounds = array<i64: 256, 128>}, {transform_indices = @transform_2, window_bounds = array<i64: 1, 128>}, {transform_indices = @transform_3, window_bounds = array<i64: 256, 128>}]} {
    %c0_i32 = arith.constant 0 : i32
    %0 = arith.cmpi eq, %arg2, %c0_i32 : i32
    %1 = arith.extui %0 : i1 to i32
    %c0_i32_0 = arith.constant 0 : i32
    %2 = arith.cmpi ne, %1, %c0_i32_0 : i32
    scf.if %2 {
      %cst_10 = arith.constant 0.000000e+00 : f32
      %12 = vector.broadcast %cst_10 : f32 to vector<256x128xf32>
      %c0_11 = arith.constant 0 : index
      %c0_12 = arith.constant 0 : index
      %13 = vector.load %arg7[%c0_11, %c0_12] : memref<256x128xf32, #tpu.memory_space<vmem>>, vector<256x128xf32>
      tpu.vector_store %arg7[%c0_11, %c0_12], %12 {strides = array<i32>} : memref<256x128xf32, #tpu.memory_space<vmem>>, vector<256x128xf32>,
    } else {
    }
    %c0 = arith.constant 0 : index
    %c0_1 = arith.constant 0 : index
    %3 = vector.load %arg7[%c0, %c0_1] : memref<256x128xf32, #tpu.memory_space<vmem>>, vector<256x128xf32>
    %c0_2 = arith.constant 0 : index
    %c0_3 = arith.constant 0 : index
    %4 = vector.load %arg3[%c0_2, %c0_3] : memref<256x256xbf16, #tpu.memory_space<vmem>>, vector<256x256xbf16>
    %c0_4 = arith.constant 0 : index
    %c0_5 = arith.constant 0 : index
    %5 = vector.load %arg4[%c0_4, %c0_5] : memref<256x128xbf16, #tpu.memory_space<vmem>>, vector<256x128xbf16>
    %cst = arith.constant dense<0.000000e+00> : vector<256x128xf32>
    %6 = tpu.matmul %4, %5, %cst {dimension_numbers = #tpu.dot_dimension_numbers<[1], [0], [0], [1], [0, 0, 1, 1], [], []>} : vector<256x256xbf16>, vector<256x128xbf16>, vector<256x128xf32> -> vector<256x128xf32>
    %7 = arith.addf %3, %6 : vector<256x128xf32>
    %c0_6 = arith.constant 0 : index
    %c0_7 = arith.constant 0 : index
    %8 = vector.load %arg7[%c0_6, %c0_7] : memref<256x128xf32, #tpu.memory_space<vmem>>, vector<256x128xf32>
    tpu.vector_store %arg7[%c0_6, %c0_7], %7 {strides = array<i32>} : memref<256x128xf32, #tpu.memory_space<vmem>>, vector<256x128xf32>,
    %c0_i32_8 = arith.constant 0 : i32
    %9 = arith.cmpi eq, %arg2, %c0_i32_8 : i32
    %10 = arith.extui %9 : i1 to i32
    %c0_i32_9 = arith.constant 0 : i32
    %11 = arith.cmpi ne, %10, %c0_i32_9 : i32
    scf.if %11 {
      %c0_10 = arith.constant 0 : index
      %c0_11 = arith.constant 0 : index
      %12 = vector.load %arg7[%c0_10, %c0_11] : memref<256x128xf32, #tpu.memory_space<vmem>>, vector<256x128xf32>
      %c0_12 = arith.constant 0 : index
      %c0_13 = arith.constant 0 : index
      %13 = vector.load %arg5[%c0_12, %c0_13] : memref<1x128xf32, #tpu.memory_space<vmem>>, vector<1x128xf32>
      %14 = vector.broadcast %13 : vector<1x128xf32> to vector<256x128xf32>
      %15 = arith.addf %12, %14 : vector<256x128xf32>
      %cst_14 = arith.constant 0.000000e+00 : f32
      %16 = vector.broadcast %cst_14 : f32 to vector<256x128xf32>
      %17 = arith.maximumf %15, %16 : vector<256x128xf32>
      %18 = arith.truncf %17 : vector<256x128xf32> to vector<256x128xbf16>
      %c0_15 = arith.constant 0 : index
      %c0_16 = arith.constant 0 : index
      %19 = vector.load %arg6[%c0_15, %c0_16] : memref<256x128xbf16, #tpu.memory_space<vmem>>, vector<256x128xbf16>
      tpu.vector_store %arg6[%c0_15, %c0_16], %18 {strides = array<i32>} : memref<256x128xbf16, #tpu.memory_space<vmem>>, vector<256x128xbf16>,
    } else {
    }
    return
  }
  func.func @transform_0(%arg0: i32, %arg1: i32, %arg2: i32) -> (i32, i32) {
    %c0_i32 = arith.constant 0 : i32
    return %arg0, %arg2 : i32, i32
  }
  func.func @transform_1(%arg0: i32, %arg1: i32, %arg2: i32) -> (i32, i32) {
    %c0_i32 = arith.constant 0 : i32
    return %arg2, %arg1 : i32, i32
  }
  func.func @transform_2(%arg0: i32, %arg1: i32, %arg2: i32) -> (i32, i32) {
    %c0_i32 = arith.constant 0 : i32
    %c0_i32_0 = arith.constant 0 : i32
    return %c0_i32, %arg1 : i32, i32
  }
  func.func @transform_3(%arg0: i32, %arg1: i32, %arg2: i32) -> (i32, i32) {
    %c0_i32 = arith.constant 0 : i32
    return %arg0, %arg1 : i32, i32
  }
}

module attributes {stable_mosaic.version = 11 : i64} {
  func.func @_matmul_bias_kernel(%arg0: i32, %arg1: i32, %arg2: i32, %arg3: memref<176x256xbf16, #tpu.memory_space<vmem>>, %arg4: memref<256x128xbf16, #tpu.memory_space<vmem>>, %arg5: memref<1x128xf32, #tpu.memory_space<vmem>>, %arg6: memref<176x128xbf16, #tpu.memory_space<vmem>>, %arg7: memref<176x128xf32, #tpu.memory_space<vmem>>) attributes {dimension_semantics = [#tpu.dimension_semantics<parallel>, #tpu.dimension_semantics<parallel>, #tpu.dimension_semantics<arbitrary>], iteration_bounds = array<i64: 1, 1, 2>, scalar_prefetch = 0 : i64, scratch_operands = 1 : i64, tpu.core_type = #tpu.core_type<tc>, window_params = [{transform_indices = @transform_0, window_bounds = array<i64: 176, 256>}, {transform_indices = @transform_1, window_bounds = array<i64: 256, 128>}, {transform_indices = @transform_2, window_bounds = array<i64: 1, 128>}, {transform_indices = @transform_3, window_bounds = array<i64: 176, 128>}]} {
    %c0_i32 = arith.constant 0 : i32
    %0 = arith.cmpi eq, %arg2, %c0_i32 : i32
    %1 = arith.extui %0 : i1 to i32
    %c0_i32_0 = arith.constant 0 : i32
    %2 = arith.cmpi ne, %1, %c0_i32_0 : i32
    scf.if %2 {
      %cst_9 = arith.constant 0.000000e+00 : f32
      %12 = vector.broadcast %cst_9 : f32 to vector<176x128xf32>
      %c0_10 = arith.constant 0 : index
      %c0_11 = arith.constant 0 : index
      %13 = vector.load %arg7[%c0_10, %c0_11] : memref<176x128xf32, #tpu.memory_space<vmem>>, vector<176x128xf32>
      tpu.vector_store %arg7[%c0_10, %c0_11], %12 {strides = array<i32>} : memref<176x128xf32, #tpu.memory_space<vmem>>, vector<176x128xf32>,
    } else {
    }
    %c0 = arith.constant 0 : index
    %c0_1 = arith.constant 0 : index
    %3 = vector.load %arg7[%c0, %c0_1] : memref<176x128xf32, #tpu.memory_space<vmem>>, vector<176x128xf32>
    %c0_2 = arith.constant 0 : index
    %c0_3 = arith.constant 0 : index
    %4 = vector.load %arg3[%c0_2, %c0_3] : memref<176x256xbf16, #tpu.memory_space<vmem>>, vector<176x256xbf16>
    %c0_4 = arith.constant 0 : index
    %c0_5 = arith.constant 0 : index
    %5 = vector.load %arg4[%c0_4, %c0_5] : memref<256x128xbf16, #tpu.memory_space<vmem>>, vector<256x128xbf16>
    %cst = arith.constant dense<0.000000e+00> : vector<176x128xf32>
    %6 = tpu.matmul %4, %5, %cst {dimension_numbers = #tpu.dot_dimension_numbers<[1], [0], [0], [1], [0, 0, 1, 1], [], []>} : vector<176x256xbf16>, vector<256x128xbf16>, vector<176x128xf32> -> vector<176x128xf32>
    %7 = arith.addf %3, %6 : vector<176x128xf32>
    %c0_6 = arith.constant 0 : index
    %c0_7 = arith.constant 0 : index
    %8 = vector.load %arg7[%c0_6, %c0_7] : memref<176x128xf32, #tpu.memory_space<vmem>>, vector<176x128xf32>
    tpu.vector_store %arg7[%c0_6, %c0_7], %7 {strides = array<i32>} : memref<176x128xf32, #tpu.memory_space<vmem>>, vector<176x128xf32>,
    %c1_i32 = arith.constant 1 : i32
    %9 = arith.cmpi eq, %arg2, %c1_i32 : i32
    %10 = arith.extui %9 : i1 to i32
    %c0_i32_8 = arith.constant 0 : i32
    %11 = arith.cmpi ne, %10, %c0_i32_8 : i32
    scf.if %11 {
      %c0_9 = arith.constant 0 : index
      %c0_10 = arith.constant 0 : index
      %12 = vector.load %arg7[%c0_9, %c0_10] : memref<176x128xf32, #tpu.memory_space<vmem>>, vector<176x128xf32>
      %c0_11 = arith.constant 0 : index
      %c0_12 = arith.constant 0 : index
      %13 = vector.load %arg5[%c0_11, %c0_12] : memref<1x128xf32, #tpu.memory_space<vmem>>, vector<1x128xf32>
      %14 = vector.broadcast %13 : vector<1x128xf32> to vector<176x128xf32>
      %15 = arith.addf %12, %14 : vector<176x128xf32>
      %cst_13 = arith.constant 0.000000e+00 : f32
      %16 = vector.broadcast %cst_13 : f32 to vector<176x128xf32>
      %17 = arith.maximumf %15, %16 : vector<176x128xf32>
      %18 = arith.truncf %17 : vector<176x128xf32> to vector<176x128xbf16>
      %c0_14 = arith.constant 0 : index
      %c0_15 = arith.constant 0 : index
      %19 = vector.load %arg6[%c0_14, %c0_15] : memref<176x128xbf16, #tpu.memory_space<vmem>>, vector<176x128xbf16>
      tpu.vector_store %arg6[%c0_14, %c0_15], %18 {strides = array<i32>} : memref<176x128xbf16, #tpu.memory_space<vmem>>, vector<176x128xbf16>,
    } else {
    }
    return
  }
  func.func @transform_0(%arg0: i32, %arg1: i32, %arg2: i32) -> (i32, i32) {
    %c0_i32 = arith.constant 0 : i32
    return %arg0, %arg2 : i32, i32
  }
  func.func @transform_1(%arg0: i32, %arg1: i32, %arg2: i32) -> (i32, i32) {
    %c0_i32 = arith.constant 0 : i32
    return %arg2, %arg1 : i32, i32
  }
  func.func @transform_2(%arg0: i32, %arg1: i32, %arg2: i32) -> (i32, i32) {
    %c0_i32 = arith.constant 0 : i32
    %c0_i32_0 = arith.constant 0 : i32
    return %c0_i32, %arg1 : i32, i32
  }
  func.func @transform_3(%arg0: i32, %arg1: i32, %arg2: i32) -> (i32, i32) {
    %c0_i32 = arith.constant 0 : i32
    return %arg0, %arg1 : i32, i32
  }
}

module attributes {stable_mosaic.version = 11 : i64} {
  func.func @_matmul_bias_kernel(%arg0: i32, %arg1: i32, %arg2: i32, %arg3: memref<112x256xbf16, #tpu.memory_space<vmem>>, %arg4: memref<256x128xbf16, #tpu.memory_space<vmem>>, %arg5: memref<1x128xf32, #tpu.memory_space<vmem>>, %arg6: memref<112x128xbf16, #tpu.memory_space<vmem>>, %arg7: memref<112x128xf32, #tpu.memory_space<vmem>>) attributes {dimension_semantics = [#tpu.dimension_semantics<parallel>, #tpu.dimension_semantics<parallel>, #tpu.dimension_semantics<arbitrary>], iteration_bounds = array<i64: 1, 1, 3>, scalar_prefetch = 0 : i64, scratch_operands = 1 : i64, tpu.core_type = #tpu.core_type<tc>, window_params = [{transform_indices = @transform_0, window_bounds = array<i64: 112, 256>}, {transform_indices = @transform_1, window_bounds = array<i64: 256, 128>}, {transform_indices = @transform_2, window_bounds = array<i64: 1, 128>}, {transform_indices = @transform_3, window_bounds = array<i64: 112, 128>}]} {
    %c0_i32 = arith.constant 0 : i32
    %0 = arith.cmpi eq, %arg2, %c0_i32 : i32
    %1 = arith.extui %0 : i1 to i32
    %c0_i32_0 = arith.constant 0 : i32
    %2 = arith.cmpi ne, %1, %c0_i32_0 : i32
    scf.if %2 {
      %cst_9 = arith.constant 0.000000e+00 : f32
      %12 = vector.broadcast %cst_9 : f32 to vector<112x128xf32>
      %c0_10 = arith.constant 0 : index
      %c0_11 = arith.constant 0 : index
      %13 = vector.load %arg7[%c0_10, %c0_11] : memref<112x128xf32, #tpu.memory_space<vmem>>, vector<112x128xf32>
      tpu.vector_store %arg7[%c0_10, %c0_11], %12 {strides = array<i32>} : memref<112x128xf32, #tpu.memory_space<vmem>>, vector<112x128xf32>,
    } else {
    }
    %c0 = arith.constant 0 : index
    %c0_1 = arith.constant 0 : index
    %3 = vector.load %arg7[%c0, %c0_1] : memref<112x128xf32, #tpu.memory_space<vmem>>, vector<112x128xf32>
    %c0_2 = arith.constant 0 : index
    %c0_3 = arith.constant 0 : index
    %4 = vector.load %arg3[%c0_2, %c0_3] : memref<112x256xbf16, #tpu.memory_space<vmem>>, vector<112x256xbf16>
    %c0_4 = arith.constant 0 : index
    %c0_5 = arith.constant 0 : index
    %5 = vector.load %arg4[%c0_4, %c0_5] : memref<256x128xbf16, #tpu.memory_space<vmem>>, vector<256x128xbf16>
    %cst = arith.constant dense<0.000000e+00> : vector<112x128xf32>
    %6 = tpu.matmul %4, %5, %cst {dimension_numbers = #tpu.dot_dimension_numbers<[1], [0], [0], [1], [0, 0, 1, 1], [], []>} : vector<112x256xbf16>, vector<256x128xbf16>, vector<112x128xf32> -> vector<112x128xf32>
    %7 = arith.addf %3, %6 : vector<112x128xf32>
    %c0_6 = arith.constant 0 : index
    %c0_7 = arith.constant 0 : index
    %8 = vector.load %arg7[%c0_6, %c0_7] : memref<112x128xf32, #tpu.memory_space<vmem>>, vector<112x128xf32>
    tpu.vector_store %arg7[%c0_6, %c0_7], %7 {strides = array<i32>} : memref<112x128xf32, #tpu.memory_space<vmem>>, vector<112x128xf32>,
    %c2_i32 = arith.constant 2 : i32
    %9 = arith.cmpi eq, %arg2, %c2_i32 : i32
    %10 = arith.extui %9 : i1 to i32
    %c0_i32_8 = arith.constant 0 : i32
    %11 = arith.cmpi ne, %10, %c0_i32_8 : i32
    scf.if %11 {
      %c0_9 = arith.constant 0 : index
      %c0_10 = arith.constant 0 : index
      %12 = vector.load %arg7[%c0_9, %c0_10] : memref<112x128xf32, #tpu.memory_space<vmem>>, vector<112x128xf32>
      %c0_11 = arith.constant 0 : index
      %c0_12 = arith.constant 0 : index
      %13 = vector.load %arg5[%c0_11, %c0_12] : memref<1x128xf32, #tpu.memory_space<vmem>>, vector<1x128xf32>
      %14 = vector.broadcast %13 : vector<1x128xf32> to vector<112x128xf32>
      %15 = arith.addf %12, %14 : vector<112x128xf32>
      %cst_13 = arith.constant 0.000000e+00 : f32
      %16 = vector.broadcast %cst_13 : f32 to vector<112x128xf32>
      %17 = arith.maximumf %15, %16 : vector<112x128xf32>
      %18 = arith.truncf %17 : vector<112x128xf32> to vector<112x128xbf16>
      %c0_14 = arith.constant 0 : index
      %c0_15 = arith.constant 0 : index
      %19 = vector.load %arg6[%c0_14, %c0_15] : memref<112x128xbf16, #tpu.memory_space<vmem>>, vector<112x128xbf16>
      tpu.vector_store %arg6[%c0_14, %c0_15], %18 {strides = array<i32>} : memref<112x128xbf16, #tpu.memory_space<vmem>>, vector<112x128xbf16>,
    } else {
    }
    return
  }
  func.func @transform_0(%arg0: i32, %arg1: i32, %arg2: i32) -> (i32, i32) {
    %c0_i32 = arith.constant 0 : i32
    return %arg0, %arg2 : i32, i32
  }
  func.func @transform_1(%arg0: i32, %arg1: i32, %arg2: i32) -> (i32, i32) {
    %c0_i32 = arith.constant 0 : i32
    return %arg2, %arg1 : i32, i32
  }
  func.func @transform_2(%arg0: i32, %arg1: i32, %arg2: i32) -> (i32, i32) {
    %c0_i32 = arith.constant 0 : i32
    %c0_i32_0 = arith.constant 0 : i32
    return %c0_i32, %arg1 : i32, i32
  }
  func.func @transform_3(%arg0: i32, %arg1: i32, %arg2: i32) -> (i32, i32) {
    %c0_i32 = arith.constant 0 : i32
    return %arg0, %arg1 : i32, i32
  }
}

module attributes {stable_mosaic.version = 11 : i64} {
  func.func @_head_kernel(%arg0: i32, %arg1: memref<16x3136xbf16, #tpu.memory_space<vmem>>, %arg2: memref<3136x512xbf16, #tpu.memory_space<vmem>>, %arg3: memref<1x512xf32, #tpu.memory_space<vmem>>, %arg4: memref<512x256xbf16, #tpu.memory_space<vmem>>, %arg5: memref<1x256xf32, #tpu.memory_space<vmem>>, %arg6: memref<16x256xf32, #tpu.memory_space<vmem>>) attributes {dimension_semantics = [#tpu.dimension_semantics<parallel>], iteration_bounds = array<i64: 1>, scalar_prefetch = 0 : i64, scratch_operands = 0 : i64, tpu.core_type = #tpu.core_type<tc>, window_params = [{transform_indices = @transform_0, window_bounds = array<i64: 16, 3136>}, {pipeline_mode = #tpu.pipeline_mode<synchronous>, transform_indices = @transform_1, window_bounds = array<i64: 3136, 512>}, {pipeline_mode = #tpu.pipeline_mode<synchronous>, transform_indices = @transform_2, window_bounds = array<i64: 1, 512>}, {pipeline_mode = #tpu.pipeline_mode<synchronous>, transform_indices = @transform_3, window_bounds = array<i64: 512, 256>}, {pipeline_mode = #tpu.pipeline_mode<synchronous>, transform_indices = @transform_4, window_bounds = array<i64: 1, 256>}, {transform_indices = @transform_5, window_bounds = array<i64: 16, 256>}]} {
    %c0 = arith.constant 0 : index
    %c0_0 = arith.constant 0 : index
    %0 = vector.load %arg1[%c0, %c0_0] : memref<16x3136xbf16, #tpu.memory_space<vmem>>, vector<16x3136xbf16>
    %c0_1 = arith.constant 0 : index
    %c0_2 = arith.constant 0 : index
    %1 = vector.load %arg2[%c0_1, %c0_2] : memref<3136x512xbf16, #tpu.memory_space<vmem>>, vector<3136x512xbf16>
    %cst = arith.constant dense<0.000000e+00> : vector<16x512xf32>
    %2 = tpu.matmul %0, %1, %cst {dimension_numbers = #tpu.dot_dimension_numbers<[1], [0], [0], [1], [0, 0, 1, 1], [], []>} : vector<16x3136xbf16>, vector<3136x512xbf16>, vector<16x512xf32> -> vector<16x512xf32>
    %c0_3 = arith.constant 0 : index
    %c0_4 = arith.constant 0 : index
    %3 = vector.load %arg3[%c0_3, %c0_4] : memref<1x512xf32, #tpu.memory_space<vmem>>, vector<1x512xf32>
    %4 = vector.broadcast %3 : vector<1x512xf32> to vector<16x512xf32>
    %5 = arith.addf %2, %4 : vector<16x512xf32>
    %cst_5 = arith.constant 0.000000e+00 : f32
    %6 = vector.broadcast %cst_5 : f32 to vector<16x512xf32>
    %7 = arith.maximumf %5, %6 : vector<16x512xf32>
    %8 = arith.truncf %7 : vector<16x512xf32> to vector<16x512xbf16>
    %c0_6 = arith.constant 0 : index
    %c0_7 = arith.constant 0 : index
    %9 = vector.load %arg4[%c0_6, %c0_7] : memref<512x256xbf16, #tpu.memory_space<vmem>>, vector<512x256xbf16>
    %cst_8 = arith.constant dense<0.000000e+00> : vector<16x256xf32>
    %10 = tpu.matmul %8, %9, %cst_8 {dimension_numbers = #tpu.dot_dimension_numbers<[1], [0], [0], [1], [0, 0, 1, 1], [], []>} : vector<16x512xbf16>, vector<512x256xbf16>, vector<16x256xf32> -> vector<16x256xf32>
    %c0_9 = arith.constant 0 : index
    %c0_10 = arith.constant 0 : index
    %11 = vector.load %arg5[%c0_9, %c0_10] : memref<1x256xf32, #tpu.memory_space<vmem>>, vector<1x256xf32>
    %12 = vector.broadcast %11 : vector<1x256xf32> to vector<16x256xf32>
    %13 = arith.addf %10, %12 : vector<16x256xf32>
    %c0_11 = arith.constant 0 : index
    %c0_12 = arith.constant 0 : index
    %14 = vector.load %arg6[%c0_11, %c0_12] : memref<16x256xf32, #tpu.memory_space<vmem>>, vector<16x256xf32>
    tpu.vector_store %arg6[%c0_11, %c0_12], %13 {strides = array<i32>} : memref<16x256xf32, #tpu.memory_space<vmem>>, vector<16x256xf32>,
    %15 = vector.extract_strided_slice %13 {offsets = [0, 0], sizes = [16, 51], strides = [1, 1]} : vector<16x256xf32> to vector<16x51xf32>
    %cst_13 = arith.constant dense<0xFF800000> : vector<16xf32>
    %16 = vector.multi_reduction <maximumf>, %15, %cst_13 [1] : vector<16x51xf32> to vector<16xf32>
    %17 = vector.shape_cast %16 : vector<16xf32> to vector<16x1xf32>
    %18 = vector.broadcast %17 : vector<16x1xf32> to vector<16x51xf32>
    %19 = arith.subf %15, %18 : vector<16x51xf32>
    %20 = math.exp %19 : vector<16x51xf32>
    %cst_14 = arith.constant dense<0.000000e+00> : vector<16xf32>
    %21 = vector.multi_reduction <add>, %20, %cst_14 [1] : vector<16x51xf32> to vector<16xf32>
    %22 = vector.shape_cast %21 : vector<16xf32> to vector<16x1xf32>
    %23 = tpu.reciprocal %22 {approx = true} : vector<16x1xf32> -> vector<16x1xf32>
    %24 = vector.broadcast %23 : vector<16x1xf32> to vector<16x51xf32>
    %25 = arith.mulf %20, %24 : vector<16x51xf32>
    %cst_15 = arith.constant 9.99999993E-9 : f32
    %cst_16 = arith.constant 1.000000e+00 : f32
    %26 = vector.broadcast %cst_15 : f32 to vector<16x51xf32>
    %27 = arith.maximumf %26, %25 : vector<16x51xf32>
    %28 = vector.broadcast %cst_16 : f32 to vector<16x51xf32>
    %29 = arith.minimumf %28, %27 : vector<16x51xf32>
    %c0_17 = arith.constant 0 : index
    %c0_18 = arith.constant 0 : index
    %30 = vector.load %arg6[%c0_17, %c0_18] : memref<16x256xf32, #tpu.memory_space<vmem>>, vector<16x51xf32>
    tpu.vector_store %arg6[%c0_17, %c0_18], %29 {strides = array<i32>} : memref<16x256xf32, #tpu.memory_space<vmem>>, vector<16x51xf32>,
    %31 = vector.extract_strided_slice %13 {offsets = [0, 51], sizes = [16, 51], strides = [1, 1]} : vector<16x256xf32> to vector<16x51xf32>
    %cst_19 = arith.constant dense<0xFF800000> : vector<16xf32>
    %32 = vector.multi_reduction <maximumf>, %31, %cst_19 [1] : vector<16x51xf32> to vector<16xf32>
    %33 = vector.shape_cast %32 : vector<16xf32> to vector<16x1xf32>
    %34 = vector.broadcast %33 : vector<16x1xf32> to vector<16x51xf32>
    %35 = arith.subf %31, %34 : vector<16x51xf32>
    %36 = math.exp %35 : vector<16x51xf32>
    %cst_20 = arith.constant dense<0.000000e+00> : vector<16xf32>
    %37 = vector.multi_reduction <add>, %36, %cst_20 [1] : vector<16x51xf32> to vector<16xf32>
    %38 = vector.shape_cast %37 : vector<16xf32> to vector<16x1xf32>
    %39 = tpu.reciprocal %38 {approx = true} : vector<16x1xf32> -> vector<16x1xf32>
    %40 = vector.broadcast %39 : vector<16x1xf32> to vector<16x51xf32>
    %41 = arith.mulf %36, %40 : vector<16x51xf32>
    %cst_21 = arith.constant 9.99999993E-9 : f32
    %cst_22 = arith.constant 1.000000e+00 : f32
    %42 = vector.broadcast %cst_21 : f32 to vector<16x51xf32>
    %43 = arith.maximumf %42, %41 : vector<16x51xf32>
    %44 = vector.broadcast %cst_22 : f32 to vector<16x51xf32>
    %45 = arith.minimumf %44, %43 : vector<16x51xf32>
    %c0_23 = arith.constant 0 : index
    %c51 = arith.constant 51 : index
    %46 = vector.load %arg6[%c0_23, %c51] : memref<16x256xf32, #tpu.memory_space<vmem>>, vector<16x51xf32>
    tpu.vector_store %arg6[%c0_23, %c51], %45 {strides = array<i32>} : memref<16x256xf32, #tpu.memory_space<vmem>>, vector<16x51xf32>,
    %47 = vector.extract_strided_slice %13 {offsets = [0, 102], sizes = [16, 51], strides = [1, 1]} : vector<16x256xf32> to vector<16x51xf32>
    %cst_24 = arith.constant dense<0xFF800000> : vector<16xf32>
    %48 = vector.multi_reduction <maximumf>, %47, %cst_24 [1] : vector<16x51xf32> to vector<16xf32>
    %49 = vector.shape_cast %48 : vector<16xf32> to vector<16x1xf32>
    %50 = vector.broadcast %49 : vector<16x1xf32> to vector<16x51xf32>
    %51 = arith.subf %47, %50 : vector<16x51xf32>
    %52 = math.exp %51 : vector<16x51xf32>
    %cst_25 = arith.constant dense<0.000000e+00> : vector<16xf32>
    %53 = vector.multi_reduction <add>, %52, %cst_25 [1] : vector<16x51xf32> to vector<16xf32>
    %54 = vector.shape_cast %53 : vector<16xf32> to vector<16x1xf32>
    %55 = tpu.reciprocal %54 {approx = true} : vector<16x1xf32> -> vector<16x1xf32>
    %56 = vector.broadcast %55 : vector<16x1xf32> to vector<16x51xf32>
    %57 = arith.mulf %52, %56 : vector<16x51xf32>
    %cst_26 = arith.constant 9.99999993E-9 : f32
    %cst_27 = arith.constant 1.000000e+00 : f32
    %58 = vector.broadcast %cst_26 : f32 to vector<16x51xf32>
    %59 = arith.maximumf %58, %57 : vector<16x51xf32>
    %60 = vector.broadcast %cst_27 : f32 to vector<16x51xf32>
    %61 = arith.minimumf %60, %59 : vector<16x51xf32>
    %c0_28 = arith.constant 0 : index
    %c102 = arith.constant 102 : index
    %62 = vector.load %arg6[%c0_28, %c102] : memref<16x256xf32, #tpu.memory_space<vmem>>, vector<16x51xf32>
    tpu.vector_store %arg6[%c0_28, %c102], %61 {strides = array<i32>} : memref<16x256xf32, #tpu.memory_space<vmem>>, vector<16x51xf32>,
    %63 = vector.extract_strided_slice %13 {offsets = [0, 153], sizes = [16, 51], strides = [1, 1]} : vector<16x256xf32> to vector<16x51xf32>
    %cst_29 = arith.constant dense<0xFF800000> : vector<16xf32>
    %64 = vector.multi_reduction <maximumf>, %63, %cst_29 [1] : vector<16x51xf32> to vector<16xf32>
    %65 = vector.shape_cast %64 : vector<16xf32> to vector<16x1xf32>
    %66 = vector.broadcast %65 : vector<16x1xf32> to vector<16x51xf32>
    %67 = arith.subf %63, %66 : vector<16x51xf32>
    %68 = math.exp %67 : vector<16x51xf32>
    %cst_30 = arith.constant dense<0.000000e+00> : vector<16xf32>
    %69 = vector.multi_reduction <add>, %68, %cst_30 [1] : vector<16x51xf32> to vector<16xf32>
    %70 = vector.shape_cast %69 : vector<16xf32> to vector<16x1xf32>
    %71 = tpu.reciprocal %70 {approx = true} : vector<16x1xf32> -> vector<16x1xf32>
    %72 = vector.broadcast %71 : vector<16x1xf32> to vector<16x51xf32>
    %73 = arith.mulf %68, %72 : vector<16x51xf32>
    %cst_31 = arith.constant 9.99999993E-9 : f32
    %cst_32 = arith.constant 1.000000e+00 : f32
    %74 = vector.broadcast %cst_31 : f32 to vector<16x51xf32>
    %75 = arith.maximumf %74, %73 : vector<16x51xf32>
    %76 = vector.broadcast %cst_32 : f32 to vector<16x51xf32>
    %77 = arith.minimumf %76, %75 : vector<16x51xf32>
    %c0_33 = arith.constant 0 : index
    %c153 = arith.constant 153 : index
    %78 = vector.load %arg6[%c0_33, %c153] : memref<16x256xf32, #tpu.memory_space<vmem>>, vector<16x51xf32>
    tpu.vector_store %arg6[%c0_33, %c153], %77 {strides = array<i32>} : memref<16x256xf32, #tpu.memory_space<vmem>>, vector<16x51xf32>,
    return
  }
  func.func @transform_0(%arg0: i32) -> (i32, i32) {
    %c0_i32 = arith.constant 0 : i32
    %c0_i32_0 = arith.constant 0 : i32
    return %arg0, %c0_i32 : i32, i32
  }
  func.func @transform_1(%arg0: i32) -> (i32, i32) {
    %c0_i32 = arith.constant 0 : i32
    %c0_i32_0 = arith.constant 0 : i32
    %c0_i32_1 = arith.constant 0 : i32
    return %c0_i32, %c0_i32_0 : i32, i32
  }
  func.func @transform_2(%arg0: i32) -> (i32, i32) {
    %c0_i32 = arith.constant 0 : i32
    %c0_i32_0 = arith.constant 0 : i32
    %c0_i32_1 = arith.constant 0 : i32
    return %c0_i32, %c0_i32_0 : i32, i32
  }
  func.func @transform_3(%arg0: i32) -> (i32, i32) {
    %c0_i32 = arith.constant 0 : i32
    %c0_i32_0 = arith.constant 0 : i32
    %c0_i32_1 = arith.constant 0 : i32
    return %c0_i32, %c0_i32_0 : i32, i32
  }
  func.func @transform_4(%arg0: i32) -> (i32, i32) {
    %c0_i32 = arith.constant 0 : i32
    %c0_i32_0 = arith.constant 0 : i32
    %c0_i32_1 = arith.constant 0 : i32
    return %c0_i32, %c0_i32_0 : i32, i32
  }
  func.func @transform_5(%arg0: i32) -> (i32, i32) {
    %c0_i32 = arith.constant 0 : i32
    %c0_i32_0 = arith.constant 0 : i32
    return %arg0, %c0_i32 : i32, i32
  }
}

</mosaic_0001>

<bundles_post_ra>
// kernel: distributional_dqn_forward.4
= control target key start
LH: loop header
LB: loop body
LE: loop exit
PB: predicated region body
PF: predicated region fallthrough
CT: control target
= control target key end

     0   :  { %s1744_s12 = smov 0   ;;  %s1746_s13 = smov 0   ;;  %s1918_s0 = inlined_call_operand.vmem [shape: bf16[1024,256], index: 0, kind: input, shape index: {}]   ;;  %s1919_s1 = inlined_call_operand.vmem [shape: bf16[256,128], index: 1, kind: input, shape index: {}]   ;;  %s1920_s2 = inlined_call_operand.vmem [shape: f32[1,128], index: 2, kind: input, shape index: {}]   ;;  %s1921_s3 = inlined_call_operand.vmem [shape: bf16[1024,128], index: 3, kind: output, shape index: {}]  }
   0x1   :  { %s1748_s14 = smov 0  }
   0x2 LB: > { %s32_s15 = sadd.s32 1, %s1718_s13  ;;  %p1267_p0 = scmp.ge.s32.totalorder %s1722_s14, 1  ;;  %s1722_s14 = sphi %s1748_s14, %s13_s14   ;;  %s1718_s13 = sphi %s1746_s13, %s1923_s13   ;;  %s1714_s12 = sphi %s1744_s12, %s1922_s12  }
   0x3   : > { %p34_p1 = scmp.ge.s32.totalorder %s32_s15, 4  ;;  %p191_p2 = scmp.lt.s32.totalorder %s1722_s14, 5 }
   0x5   : > { %s1925_s15 = smov (%p34_p1, %s32_s15), 0  ;;  %p192_p3 = pnand %p1267_p0, %p191_p2 }
   0x6   : > { %v1636_v0 = vld [vmem:[%s1919_s1 + $0x40] sm:$0xff] (!%p192_p3)   ;;  %s1268_s18 = sshll.u32 (!%p192_p3), %s1714_s12, 5  ;;  %v1638_v2 = vld [vmem:[%s1919_s1 + $0x48] sm:$0xff] (!%p192_p3)   ;;  %v1640_v4 = vld [vmem:[%s1919_s1 + $0x50] sm:$0xff] (!%p192_p3)  }
   0x7   : > { %195 = sbr.rel (%p192_p3) target bundleno = 320 (0x140), region = 32  ;;  %v1637_v1 = vld [vmem:[%s1919_s1] sm:$0xff] (!%p192_p3)   ;;  %1484 = vmatprep.subr.bf16.mxu0 (!%p192_p3), %v1636_v0  ;;  %1596 = vmatprep.subr.bf16.mxu1 (!%p192_p3), %v1636_v0  ;;  %v1639_v3 = vld [vmem:[%s1919_s1 + $0x8] sm:$0xff] (!%p192_p3)   ;;  %p236_p4 = scmp.lt.s32.totalorder (!%p192_p3), %s1268_s18, 127  ;;  %v1641_v5 = vld [vmem:[%s1919_s1 + $0x10] sm:$0xff] (!%p192_p3)  }
   0x8   : > { %1485 = vmatpush3.bf16.msra.mxu0 (!%p192_p3), %v1637_v1  ;;  %1604 = vmatpush3.bf16.msra.mxu1 (!%p192_p3), %v1637_v1  ;;  %v1642_v6 = vld [vmem:[%s1919_s1 + $0x58] sm:$0xff] (!%p192_p3)   ;;  %v1644_v8 = vld [vmem:[%s1919_s1 + $0x60] sm:$0xff] (!%p192_p3)   ;;  %v1646_v10 = vld [vmem:[%s1919_s1 + $0x68] sm:$0xff] (!%p192_p3)  }
   0x9   : > { %1486 = vmatprep.subr.bf16.mxu0 (!%p192_p3), %v1638_v2  ;;  %1597 = vmatprep.subr.bf16.mxu1 (!%p192_p3), %v1638_v2  ;;  %v1643_v7 = vld [vmem:[%s1919_s1 + $0x18] sm:$0xff] (!%p192_p3)   ;;  %v1645_v9 = vld [vmem:[%s1919_s1 + $0x20] sm:$0xff] (!%p192_p3)   ;;  %v1647_v13 = vld [vmem:[%s1919_s1 + $0x28] sm:$0xff] (!%p192_p3)  }
   0xa   : > { %v1648_v14 = vld [vmem:[%s1919_s1 + $0x70] sm:$0xff] (!%p192_p3)   ;;  %v1650_v16 = vld [vmem:[%s1919_s1 + $0x78] sm:$0xff] (!%p192_p3)   ;;  %v1853_v51 = vld [vmem:[%s1920_s2] ss:$0 sm:$0xff] (!%p192_p3) }
   0xb   : > { %v1649_v15 = vld [vmem:[%s1919_s1 + $0x30] sm:$0xff] (!%p192_p3)   ;;  %v1651_v17 = vld [vmem:[%s1919_s1 + $0x38] sm:$0xff] (!%p192_p3)  }
   0xc   : > { %1487 = vmatpush3.bf16.msra.mxu0 (!%p192_p3), %v1639_v3  ;;  %1605 = vmatpush3.bf16.msra.mxu1 (!%p192_p3), %v1639_v3 }
   0xd   : > { %1488 = vmatprep.subr.bf16.mxu0 (!%p192_p3), %v1640_v4  ;;  %1598 = vmatprep.subr.bf16.mxu1 (!%p192_p3), %v1640_v4 }
   0xe   : > { %s1927_s18 = smov (!%p236_p4, %s1268_s18), 127 }
   0xf   : > { %s1356_s6 = sshll.u32 %s1927_s18, 3  ;;  %s1272_s5 = sshll.u32 %s1927_s18, 2 }
  0x10   : > { %1489 = vmatpush3.bf16.msra.mxu0 %v1641_v5  ;;  %1606 = vmatpush3.bf16.msra.mxu1 %v1641_v5  ;;  %s1795_s11 = scalar_lea.vmem %s1918_s0, %s1356_s6  ;;  %s1863_s8 = scalar_lea.vmem %s1921_s3, %s1272_s5 }
  0x11   : > { %1490 = vmatprep.subr.bf16.mxu0 %v1642_v6  ;;  %1599 = vmatprep.subr.bf16.mxu1 %v1642_v6  ;;  %v1654_v11 = vld [vmem:[%s1795_s11 + $0x4] ss:$8 sps:$4 sm:$0xff]   ;;  %v1652_v18 = vld [vmem:[%s1795_s11] ss:$8 sps:$4 sm:$0xff]   ;;  %v1658_v20 = vld [vmem:[%s1795_s11 + $0x14] ss:$8 sps:$4 sm:$0xff]  }
  0x12   : > { %v1657_v12 = vld [vmem:[%s1795_s11 + $0x84] ss:$8 sps:$4 sm:$0xff]   ;;  %688 = vmatprep.mubr.bf16.mxu0 %v1654_v11  ;;  %v1655_v19 = vld [vmem:[%s1795_s11 + $0x80] ss:$8 sps:$4 sm:$0xff]   ;;  %v1660_v21 = vld [vmem:[%s1795_s11 + $0x94] ss:$8 sps:$4 sm:$0xff]  }
  0x13   : > { %752 = vmatprep.mubr.bf16.mxu1 %v1657_v12  ;;  %v1662_v22 = vld [vmem:[%s1795_s11 + $0x10] ss:$8 sps:$4 sm:$0xff]   ;;  %v1664_v24 = vld [vmem:[%s1795_s11 + $0x24] ss:$8 sps:$4 sm:$0xff]   ;;  %v1668_v26 = vld [vmem:[%s1795_s11 + $0x20] ss:$8 sps:$4 sm:$0xff]  }
  0x14   : > { %1491 = vmatpush3.bf16.msra.mxu0 %v1643_v7  ;;  %1607 = vmatpush3.bf16.msra.mxu1 %v1643_v7  ;;  %v1663_v23 = vld [vmem:[%s1795_s11 + $0x90] ss:$8 sps:$4 sm:$0xff]   ;;  %v1666_v25 = vld [vmem:[%s1795_s11 + $0xa4] ss:$8 sps:$4 sm:$0xff]   ;;  %v1669_v27 = vld [vmem:[%s1795_s11 + $0xa0] ss:$8 sps:$4 sm:$0xff]  }
  0x15   : > { %1492 = vmatprep.subr.bf16.mxu0 %v1644_v8  ;;  %1600 = vmatprep.subr.bf16.mxu1 %v1644_v8  ;;  %v1670_v28 = vld [vmem:[%s1795_s11 + $0x34] ss:$8 sps:$4 sm:$0xff]   ;;  %v1674_v30 = vld [vmem:[%s1795_s11 + $0x30] ss:$8 sps:$4 sm:$0xff]   ;;  %v1676_v32 = vld [vmem:[%s1795_s11 + $0x44] ss:$8 sps:$4 sm:$0xff]  }
  0x16   : > { %v1672_v29 = vld [vmem:[%s1795_s11 + $0xb4] ss:$8 sps:$4 sm:$0xff]   ;;  %v1675_v31 = vld [vmem:[%s1795_s11 + $0xb0] ss:$8 sps:$4 sm:$0xff]   ;;  %v1678_v33 = vld [vmem:[%s1795_s11 + $0xc4] ss:$8 sps:$4 sm:$0xff]  }
  0x17   : > { %v1680_v34 = vld [vmem:[%s1795_s11 + $0x40] ss:$8 sps:$4 sm:$0xff]   ;;  %v1682_v36 = vld [vmem:[%s1795_s11 + $0x54] ss:$8 sps:$4 sm:$0xff]   ;;  %v1686_v38 = vld [vmem:[%s1795_s11 + $0x50] ss:$8 sps:$4 sm:$0xff]  }
  0x18   : > { %1493 = vmatpush3.bf16.msra.mxu0 %v1645_v9  ;;  %1608 = vmatpush3.bf16.msra.mxu1 %v1645_v9  ;;  %v1681_v35 = vld [vmem:[%s1795_s11 + $0xc0] ss:$8 sps:$4 sm:$0xff]   ;;  %v1684_v37 = vld [vmem:[%s1795_s11 + $0xd4] ss:$8 sps:$4 sm:$0xff]   ;;  %v1687_v39 = vld [vmem:[%s1795_s11 + $0xd0] ss:$8 sps:$4 sm:$0xff]  }
  0x19   : > { %1494 = vmatprep.subr.bf16.mxu0 %v1646_v10  ;;  %1601 = vmatprep.subr.bf16.mxu1 %v1646_v10  ;;  %v1688_v40 = vld [vmem:[%s1795_s11 + $0x64] ss:$8 sps:$4 sm:$0xff]   ;;  %v1692_v42 = vld [vmem:[%s1795_s11 + $0x60] ss:$8 sps:$4 sm:$0xff]   ;;  %v1694_v44 = vld [vmem:[%s1795_s11 + $0x74] ss:$8 sps:$4 sm:$0xff]  }
  0x1a   : > { %v1690_v41 = vld [vmem:[%s1795_s11 + $0xe4] ss:$8 sps:$4 sm:$0xff]   ;;  %v1693_v43 = vld [vmem:[%s1795_s11 + $0xe0] ss:$8 sps:$4 sm:$0xff]   ;;  %v1696_v45 = vld [vmem:[%s1795_s11 + $0xf4] ss:$8 sps:$4 sm:$0xff]  }
  0x1b   : > { %v1698_v46 = vld [vmem:[%s1795_s11 + $0x70] ss:$8 sps:$4 sm:$0xff]  }
  0x1c   : > { %1495 = vmatpush3.bf16.msra.mxu0 %v1647_v13  ;;  %1609 = vmatpush3.bf16.msra.mxu1 %v1647_v13  ;;  %v1699_v47 = vld [vmem:[%s1795_s11 + $0xf0] ss:$8 sps:$4 sm:$0xff]  }
  0x1d   : > { %1496 = vmatprep.subr.bf16.mxu0 %v1648_v14  ;;  %1602 = vmatprep.subr.bf16.mxu1 %v1648_v14 }
  0x20   : > { %1497 = vmatpush3.bf16.msra.mxu0 %v1649_v15  ;;  %1610 = vmatpush3.bf16.msra.mxu1 %v1649_v15 }
  0x21   : > { %1498 = vmatprep.subr.bf16.mxu0 %v1650_v16  ;;  %1603 = vmatprep.subr.bf16.mxu1 %v1650_v16 }
  0x24   : > { %1499 = vmatpush3.bf16.msra.mxu0 %v1651_v17  ;;  %1611 = vmatpush3.bf16.msra.mxu1 %v1651_v17 }
  0x27   : > { %689 = vmatmul.mubr.bf16.vlgmr.msra.gmra.mrb[0].mxu0 %v1652_v18  ;;  %753 = vmatmul.mubr.bf16.vlgmr.msra.gmra.mrb[0].mxu1 %v1655_v19 }
  0x28   : > { %696 = vmatprep.mubr.bf16.mxu0 %v1658_v20  ;;  %760 = vmatprep.mubr.bf16.mxu1 %v1660_v21 }
  0x2f   : > { %697 = vmatmul.mubr.bf16.gmra.mrb[4].mxu0 %v1662_v22  ;;  %761 = vmatmul.mubr.bf16.gmra.mrb[4].mxu1 %v1663_v23 }
  0x30   : > { %704 = vmatprep.mubr.bf16.mxu0 %v1664_v24  ;;  %768 = vmatprep.mubr.bf16.mxu1 %v1666_v25 }
  0x37   : > { %705 = vmatmul.mubr.bf16.gmra.mrb[8].mxu0 %v1668_v26  ;;  %769 = vmatmul.mubr.bf16.gmra.mrb[8].mxu1 %v1669_v27 }
  0x38   : > { %712 = vmatprep.mubr.bf16.mxu0 %v1670_v28  ;;  %776 = vmatprep.mubr.bf16.mxu1 %v1672_v29 }
  0x3f   : > { %713 = vmatmul.mubr.bf16.gmra.mrb[12].mxu0 %v1674_v30  ;;  %777 = vmatmul.mubr.bf16.gmra.mrb[12].mxu1 %v1675_v31 }
  0x40   : > { %720 = vmatprep.mubr.bf16.mxu0 %v1676_v32  ;;  %784 = vmatprep.mubr.bf16.mxu1 %v1678_v33 }
  0x47   : > { %721 = vmatmul.mubr.bf16.gmra.mrb[16].mxu0 %v1680_v34  ;;  %785 = vmatmul.mubr.bf16.gmra.mrb[16].mxu1 %v1681_v35 }
  0x48   : > { %728 = vmatprep.mubr.bf16.mxu0 %v1682_v36  ;;  %792 = vmatprep.mubr.bf16.mxu1 %v1684_v37 }
  0x4f   : > { %729 = vmatmul.mubr.bf16.gmra.mrb[20].mxu0 %v1686_v38  ;;  %793 = vmatmul.mubr.bf16.gmra.mrb[20].mxu1 %v1687_v39 }
  0x50   : > { %736 = vmatprep.mubr.bf16.mxu0 %v1688_v40  ;;  %800 = vmatprep.mubr.bf16.mxu1 %v1690_v41 }
  0x57   : > { %737 = vmatmul.mubr.bf16.gmra.mrb[24].mxu0 %v1692_v42  ;;  %801 = vmatmul.mubr.bf16.gmra.mrb[24].mxu1 %v1693_v43 }
  0x58   : > { %744 = vmatprep.mubr.bf16.mxu0 %v1694_v44  ;;  %808 = vmatprep.mubr.bf16.mxu1 %v1696_v45 }
  0x5f   : > { %745 = vmatmul.mubr.bf16.gmra.mrb[28].mxu0 %v1698_v46  ;;  %809 = vmatmul.mubr.bf16.gmra.mrb[28].mxu1 %v1699_v47 }
  0xfa   : > { %v1500_v48 = vpop.f32.mrb[0].mxu0  ;;  %v1548_v49 = vpop.f32.mrb[0].mxu1 }
  0xfb   : > { %v1501_v50 = vpop.f32.mrb[1].mxu0  ;;  %v1549_v52 = vpop.f32.mrb[1].mxu1 }
  0xfc   : > { %v1502_v53 = vadd.f32 %v1501_v50, %v1500_v48  ;;  %v1550_v54 = vadd.f32 %v1549_v52, %v1548_v49  ;;  %v1503_v55 = vpop.f32.mrb[2].mxu0  ;;  %v1551_v56 = vpop.f32.mrb[2].mxu1 }
  0xfd   : > { %v1504_v57 = vpop.f32.mrb[3].mxu0  ;;  %v1552_v58 = vpop.f32.mrb[3].mxu1 }
  0xfe   : > { %v923_v59 = vadd.f32 %v1502_v53, %v1853_v51  ;;  %v939_v60 = vadd.f32 %v1550_v54, %v1853_v51  ;;  %v1505_v61 = vadd.f32 %v1504_v57, %v1503_v55  ;;  %v1553_v62 = vadd.f32 %v1552_v58, %v1551_v56 }
 0x100   : > { %v924_v63 = vadd.f32 %v1505_v61, %v1853_v51  ;;  %v940_v0 = vadd.f32 %v1553_v62, %v1853_v51  ;;  %v955_v1 = vmax.f32 %v923_v59, 0.0  ;;  %v971_v2 = vmax.f32 %v939_v60, 0.0 }
 0x102   : > { %v956_v3 = vmax.f32 %v924_v63, 0.0  ;;  %v972_v4 = vmax.f32 %v940_v0, 0.0  ;;  %v1506_v5 = vpop.f32.mrb[4].mxu0  ;;  %v1554_v6 = vpop.f32.mrb[4].mxu1 }
 0x103   : > { %v1507_v7 = vpop.f32.mrb[5].mxu0  ;;  %v1555_v8 = vpop.f32.mrb[5].mxu1 }
 0x104   : > { %v1392_v9 = vpack.c.bf16 %v956_v3, %v955_v1  ;;  %v1432_v10 = vpack.c.bf16 %v972_v4, %v971_v2  ;;  %v1508_v11 = vadd.f32 %v1507_v7, %v1506_v5  ;;  %v1556_v12 = vadd.f32 %v1555_v8, %v1554_v6  ;;  %v1509_v13 = vpop.f32.mrb[6].mxu0  ;;  %v1557_v14 = vpop.f32.mrb[6].mxu1 }
 0x105   : > { %v1510_v15 = vpop.f32.mrb[7].mxu0  ;;  %v1558_v16 = vpop.f32.mrb[7].mxu1 }
 0x106   : > { %1393 = vst [vmem:[%s1863_s8] sm:$0xff] %v1392_v9   ;;  %1476 = vst [vmem:[%s1863_s8 + $0x40] sm:$0xff] %v1432_v10   ;;  %v925_v17 = vadd.f32 %v1508_v11, %v1853_v51  ;;  %v941_v18 = vadd.f32 %v1556_v12, %v1853_v51  ;;  %v1511_v19 = vadd.f32 %v1510_v15, %v1509_v13 }
 0x107   : > { %v1559_v20 = vadd.f32 %v1558_v16, %v1557_v14 }
 0x108   : > { %v926_v21 = vadd.f32 %v1511_v19, %v1853_v51  ;;  %v957_v23 = vmax.f32 %v925_v17, 0.0  ;;  %v973_v24 = vmax.f32 %v941_v18, 0.0 }
 0x109   : > { %v942_v22 = vadd.f32 %v1559_v20, %v1853_v51 }
 0x10a   : > { %v958_v25 = vmax.f32 %v926_v21, 0.0  ;;  %v1512_v27 = vpop.f32.mrb[8].mxu0  ;;  %v1560_v28 = vpop.f32.mrb[8].mxu1 }
 0x10b   : > { %v974_v26 = vmax.f32 %v942_v22, 0.0  ;;  %v1513_v29 = vpop.f32.mrb[9].mxu0  ;;  %v1561_v30 = vpop.f32.mrb[9].mxu1 }
 0x10c   : > { %v1397_v31 = vpack.c.bf16 %v958_v25, %v957_v23  ;;  %v1514_v33 = vadd.f32 %v1513_v29, %v1512_v27  ;;  %v1562_v34 = vadd.f32 %v1561_v30, %v1560_v28  ;;  %v1515_v35 = vpop.f32.mrb[10].mxu0  ;;  %v1563_v36 = vpop.f32.mrb[10].mxu1 }
 0x10d   : > { %v1437_v32 = vpack.c.bf16 %v974_v26, %v973_v24  ;;  %v1516_v37 = vpop.f32.mrb[11].mxu0  ;;  %v1564_v38 = vpop.f32.mrb[11].mxu1 }
 0x10e   : > { %1469 = vst [vmem:[%s1863_s8 + $0x8] sm:$0xff] %v1397_v31   ;;  %v927_v39 = vadd.f32 %v1514_v33, %v1853_v51  ;;  %v943_v40 = vadd.f32 %v1562_v34, %v1853_v51  ;;  %v1517_v41 = vadd.f32 %v1516_v37, %v1515_v35  ;;  %v1565_v42 = vadd.f32 %v1564_v38, %v1563_v36 }
 0x10f   : > { %1477 = vst [vmem:[%s1863_s8 + $0x48] sm:$0xff] %v1437_v32  }
 0x110   : > { %v928_v43 = vadd.f32 %v1517_v41, %v1853_v51  ;;  %v944_v44 = vadd.f32 %v1565_v42, %v1853_v51  ;;  %v959_v45 = vmax.f32 %v927_v39, 0.0  ;;  %v975_v46 = vmax.f32 %v943_v40, 0.0 }
 0x112   : > { %v960_v47 = vmax.f32 %v928_v43, 0.0  ;;  %v976_v48 = vmax.f32 %v944_v44, 0.0  ;;  %v1518_v49 = vpop.f32.mrb[12].mxu0  ;;  %v1566_v50 = vpop.f32.mrb[12].mxu1 }
 0x113   : > { %v1519_v52 = vpop.f32.mrb[13].mxu0  ;;  %v1567_v53 = vpop.f32.mrb[13].mxu1 }
 0x114   : > { %v1402_v54 = vpack.c.bf16 %v960_v47, %v959_v45  ;;  %v1442_v55 = vpack.c.bf16 %v976_v48, %v975_v46  ;;  %v1520_v56 = vadd.f32 %v1519_v52, %v1518_v49  ;;  %v1568_v57 = vadd.f32 %v1567_v53, %v1566_v50  ;;  %v1521_v58 = vpop.f32.mrb[14].mxu0  ;;  %v1569_v59 = vpop.f32.mrb[14].mxu1 }
 0x115   : > { %v1522_v60 = vpop.f32.mrb[15].mxu0  ;;  %v1570_v61 = vpop.f32.mrb[15].mxu1 }
 0x116   : > { %1470 = vst [vmem:[%s1863_s8 + $0x10] sm:$0xff] %v1402_v54   ;;  %1478 = vst [vmem:[%s1863_s8 + $0x50] sm:$0xff] %v1442_v55   ;;  %v929_v62 = vadd.f32 %v1520_v56, %v1853_v51  ;;  %v945_v63 = vadd.f32 %v1568_v57, %v1853_v51  ;;  %v1523_v0 = vadd.f32 %v1522_v60, %v1521_v58 }
 0x117   : > { %v1571_v1 = vadd.f32 %v1570_v61, %v1569_v59 }
 0x118   : > { %v930_v2 = vadd.f32 %v1523_v0, %v1853_v51  ;;  %v961_v4 = vmax.f32 %v929_v62, 0.0  ;;  %v977_v5 = vmax.f32 %v945_v63, 0.0 }
 0x119   : > { %v946_v3 = vadd.f32 %v1571_v1, %v1853_v51 }
 0x11a   : > { %v962_v6 = vmax.f32 %v930_v2, 0.0  ;;  %v1524_v8 = vpop.f32.mrb[16].mxu0  ;;  %v1572_v9 = vpop.f32.mrb[16].mxu1 }
 0x11b   : > { %v978_v7 = vmax.f32 %v946_v3, 0.0  ;;  %v1525_v10 = vpop.f32.mrb[17].mxu0  ;;  %v1573_v11 = vpop.f32.mrb[17].mxu1 }
 0x11c   : > { %v1407_v12 = vpack.c.bf16 %v962_v6, %v961_v4  ;;  %v1526_v14 = vadd.f32 %v1525_v10, %v1524_v8  ;;  %v1574_v15 = vadd.f32 %v1573_v11, %v1572_v9  ;;  %v1527_v16 = vpop.f32.mrb[18].mxu0  ;;  %v1575_v17 = vpop.f32.mrb[18].mxu1 }
 0x11d   : > { %v1447_v13 = vpack.c.bf16 %v978_v7, %v977_v5  ;;  %v1528_v18 = vpop.f32.mrb[19].mxu0  ;;  %v1576_v19 = vpop.f32.mrb[19].mxu1 }
 0x11e   : > { %1471 = vst [vmem:[%s1863_s8 + $0x18] sm:$0xff] %v1407_v12   ;;  %v931_v20 = vadd.f32 %v1526_v14, %v1853_v51  ;;  %v947_v21 = vadd.f32 %v1574_v15, %v1853_v51  ;;  %v1529_v22 = vadd.f32 %v1528_v18, %v1527_v16  ;;  %v1577_v23 = vadd.f32 %v1576_v19, %v1575_v17 }
 0x11f   : > { %1479 = vst [vmem:[%s1863_s8 + $0x58] sm:$0xff] %v1447_v13  }
 0x120   : > { %v932_v24 = vadd.f32 %v1529_v22, %v1853_v51  ;;  %v948_v25 = vadd.f32 %v1577_v23, %v1853_v51  ;;  %v963_v26 = vmax.f32 %v931_v20, 0.0  ;;  %v979_v27 = vmax.f32 %v947_v21, 0.0 }
 0x122   : > { %v964_v28 = vmax.f32 %v932_v24, 0.0  ;;  %v980_v29 = vmax.f32 %v948_v25, 0.0  ;;  %v1530_v30 = vpop.f32.mrb[20].mxu0  ;;  %v1578_v31 = vpop.f32.mrb[20].mxu1 }
 0x123   : > { %v1531_v32 = vpop.f32.mrb[21].mxu0  ;;  %v1579_v33 = vpop.f32.mrb[21].mxu1 }
 0x124   : > { %v1412_v34 = vpack.c.bf16 %v964_v28, %v963_v26  ;;  %v1452_v35 = vpack.c.bf16 %v980_v29, %v979_v27  ;;  %v1532_v36 = vadd.f32 %v1531_v32, %v1530_v30  ;;  %v1580_v37 = vadd.f32 %v1579_v33, %v1578_v31  ;;  %v1533_v38 = vpop.f32.mrb[22].mxu0  ;;  %v1581_v39 = vpop.f32.mrb[22].mxu1 }
 0x125   : > { %v1534_v40 = vpop.f32.mrb[23].mxu0  ;;  %v1582_v41 = vpop.f32.mrb[23].mxu1 }
 0x126   : > { %1472 = vst [vmem:[%s1863_s8 + $0x20] sm:$0xff] %v1412_v34   ;;  %1480 = vst [vmem:[%s1863_s8 + $0x60] sm:$0xff] %v1452_v35   ;;  %v933_v42 = vadd.f32 %v1532_v36, %v1853_v51  ;;  %v949_v43 = vadd.f32 %v1580_v37, %v1853_v51  ;;  %v1535_v44 = vadd.f32 %v1534_v40, %v1533_v38 }
 0x127   : > { %v1583_v45 = vadd.f32 %v1582_v41, %v1581_v39 }
 0x128   : > { %v934_v46 = vadd.f32 %v1535_v44, %v1853_v51  ;;  %v965_v48 = vmax.f32 %v933_v42, 0.0  ;;  %v981_v49 = vmax.f32 %v949_v43, 0.0 }
 0x129   : > { %v950_v47 = vadd.f32 %v1583_v45, %v1853_v51 }
 0x12a   : > { %v966_v50 = vmax.f32 %v934_v46, 0.0  ;;  %v1536_v53 = vpop.f32.mrb[24].mxu0  ;;  %v1584_v54 = vpop.f32.mrb[24].mxu1 }
 0x12b   : > { %v982_v52 = vmax.f32 %v950_v47, 0.0  ;;  %v1537_v55 = vpop.f32.mrb[25].mxu0  ;;  %v1585_v56 = vpop.f32.mrb[25].mxu1 }
 0x12c   : > { %v1417_v57 = vpack.c.bf16 %v966_v50, %v965_v48  ;;  %v1538_v59 = vadd.f32 %v1537_v55, %v1536_v53  ;;  %v1586_v60 = vadd.f32 %v1585_v56, %v1584_v54  ;;  %v1539_v61 = vpop.f32.mrb[26].mxu0  ;;  %v1587_v62 = vpop.f32.mrb[26].mxu1 }
 0x12d   : > { %v1457_v58 = vpack.c.bf16 %v982_v52, %v981_v49  ;;  %v1540_v63 = vpop.f32.mrb[27].mxu0  ;;  %v1588_v0 = vpop.f32.mrb[27].mxu1 }
 0x12e   : > { %1473 = vst [vmem:[%s1863_s8 + $0x28] sm:$0xff] %v1417_v57   ;;  %v935_v1 = vadd.f32 %v1538_v59, %v1853_v51  ;;  %v951_v2 = vadd.f32 %v1586_v60, %v1853_v51  ;;  %v1541_v3 = vadd.f32 %v1540_v63, %v1539_v61  ;;  %v1589_v4 = vadd.f32 %v1588_v0, %v1587_v62 }
 0x12f   : > { %1481 = vst [vmem:[%s1863_s8 + $0x68] sm:$0xff] %v1457_v58  }
 0x130   : > { %v936_v5 = vadd.f32 %v1541_v3, %v1853_v51  ;;  %v952_v6 = vadd.f32 %v1589_v4, %v1853_v51  ;;  %v967_v7 = vmax.f32 %v935_v1, 0.0  ;;  %v983_v8 = vmax.f32 %v951_v2, 0.0 }
 0x132   : > { %v968_v9 = vmax.f32 %v936_v5, 0.0  ;;  %v984_v10 = vmax.f32 %v952_v6, 0.0  ;;  %v1542_v11 = vpop.f32.mrb[28].mxu0  ;;  %v1590_v12 = vpop.f32.mrb[28].mxu1 }
 0x133   : > { %v1543_v13 = vpop.f32.mrb[29].mxu0  ;;  %v1591_v14 = vpop.f32.mrb[29].mxu1 }
 0x134   : > { %v1422_v15 = vpack.c.bf16 %v968_v9, %v967_v7  ;;  %v1462_v16 = vpack.c.bf16 %v984_v10, %v983_v8  ;;  %v1544_v17 = vadd.f32 %v1543_v13, %v1542_v11  ;;  %v1592_v18 = vadd.f32 %v1591_v14, %v1590_v12  ;;  %v1545_v19 = vpop.f32.mrb[30].mxu0  ;;  %v1593_v20 = vpop.f32.mrb[30].mxu1 }
 0x135   : > { %v1546_v21 = vpop.f32.mrb[31].mxu0  ;;  %v1594_v22 = vpop.f32.mrb[31].mxu1 }
 0x136   : > { %1474 = vst [vmem:[%s1863_s8 + $0x30] sm:$0xff] %v1422_v15   ;;  %1482 = vst [vmem:[%s1863_s8 + $0x70] sm:$0xff] %v1462_v16   ;;  %v937_v23 = vadd.f32 %v1544_v17, %v1853_v51  ;;  %v953_v24 = vadd.f32 %v1592_v18, %v1853_v51  ;;  %v1547_v25 = vadd.f32 %v1546_v21, %v1545_v19 }
 0x137   : > { %v1595_v26 = vadd.f32 %v1594_v22, %v1593_v20 }
 0x138   : > { %v938_v27 = vadd.f32 %v1547_v25, %v1853_v51  ;;  %v969_v29 = vmax.f32 %v937_v23, 0.0  ;;  %v985_v30 = vmax.f32 %v953_v24, 0.0 }
 0x139   : > { %v954_v28 = vadd.f32 %v1595_v26, %v1853_v51 }
 0x13a   : > { %v970_v31 = vmax.f32 %v938_v27, 0.0 }
 0x13b   : > { %v986_v32 = vmax.f32 %v954_v28, 0.0 }
 0x13c   : > { %v1427_v33 = vpack.c.bf16 %v970_v31, %v969_v29 }
 0x13d   : > { %v1467_v34 = vpack.c.bf16 %v986_v32, %v985_v30 }
 0x13e   : > { %1475 = vst [vmem:[%s1863_s8 + $0x38] sm:$0xff] %v1427_v33  }
 0x13f   : > { %1483 = vst [vmem:[%s1863_s8 + $0x78] sm:$0xff] %v1467_v34  }
 0x140 PF: > { %s13_s14 = sadd.s32 1, %s1722_s14   ;;  %s1922_s12 = smov %s1718_s13 }
 0x141   : > { %p10_p5 = scmp.ge.s32.totalorder %s13_s14, 6   ;;  %s1923_s13 = smov %s1925_s15 }
 0x143   :  { %12 = sbr.rel (!%p10_p5) target bundleno = 2 (0x2), region = 76 }

// kernel: distributional_dqn_forward.5
= control target key start
LH: loop header
LB: loop body
LE: loop exit
PB: predicated region body
PF: predicated region fallthrough
CT: control target
= control target key end

     0   :  { %s1559_s12 = smov 0   ;;  %s1561_s13 = smov 0   ;;  %s1776_s0 = inlined_call_operand.vmem [shape: bf16[176,512], index: 0, kind: input, shape index: {}]   ;;  %s1777_s1 = inlined_call_operand.vmem [shape: bf16[512,128], index: 1, kind: input, shape index: {}]   ;;  %s1778_s2 = inlined_call_operand.vmem [shape: f32[1,128], index: 2, kind: input, shape index: {}]   ;;  %s1779_s3 = inlined_call_operand.vmem [shape: bf16[176,128], index: 3, kind: output, shape index: {}]  }
   0x1   :  { %s1563_s14 = smov 0   ;;  %s1565_s15 = smov 0  }
   0x2   :  { %s1567_s16 = smov 0  }
   0x3 LB: > { %s25_s17 = sadd.s32 1, %s1532_s15  ;;  %p48_p1 = scmp.ne.s32.totalorder %s1524_s13, %s1520_s12  ;;  %s1536_s16 = sphi %s1567_s16, %s13_s16   ;;  %s1532_s15 = sphi %s1565_s15, %s1783_s15   ;;  %s1528_s14 = sphi %s1563_s14, %s1782_s14   ;;  %s1524_s13 = sphi %s1561_s13, %s1781_s13   ;;  %s1520_s12 = sphi %s1559_s12, %s1780_s12  }
   0x4   : > { %p26_p0 = scmp.ge.s32.totalorder %s25_s17, 2  ;;  %p49_p2 = scmp.eq.s32.totalorder %s1536_s16, 0 }
   0x5   : > { %s41_s19 = sadd.s32 1, %s1524_s13  ;;  %p1147_p5 = scmp.ge.s32.totalorder %s1536_s16, 2 }
   0x6   : > { %s1785_s17 = smov (%p26_p0, %s25_s17), 0  ;;  %p50_p3 = por %p49_p2, %p48_p1 }
   0x7   : > { %s37_s18 = ssub.s32 %s1532_s15, %s1785_s17  ;;  %162 = sbr.rel (%p1147_p5) target bundleno = 29 (0x1d), region = 20 }
   0x8   : > { %p39_p4 = scmp.eq.s32.totalorder %s37_s18, 0 }
   0xa   : > { %s1594_s20 = scalar_select %p39_p4, %s1524_s13, %s41_s19  }
   0xe   : > { %165 = sbr.rel (!%p50_p3) target bundleno = 29 (0x1d), region = 24  ;;  %s167_s21 = sand.u32 (%p50_p3), 1, %s1524_s13  }
   0xf   : > { %s1220_s22 = sshll.u32 (%p50_p3), %s1532_s15, 3  ;;  %s1406_s23 = smul.u32 (%p50_p3), 176, %s167_s21 }
  0x10   : > { %s1602_s26 = scalar_lea.vmem (%p50_p3), %s1776_s0, %s1220_s22 }
  0x11   : > { %v245_v0 = vld [vmem:[%s1602_s26] sm:$0xff] (%p50_p3)  ;;  %v247_v1 = vld [vmem:[%s1602_s26 + $0x10] sm:$0xff] (%p50_p3)  ;;  %s1610_s27 = scalar_lea.vmem (%p50_p3), [#allocation3], %s1406_s23 }
  0x12   : > { %v249_v2 = vld [vmem:[%s1602_s26 + $0x20] sm:$0xff] (%p50_p3)  ;;  %v251_v3 = vld [vmem:[%s1602_s26 + $0x30] sm:$0xff] (%p50_p3)  ;;  %246 = vst [vmem:[%s1610_s27] sm:$0xff] (%p50_p3), %v245_v0  ;;  %248 = vst [vmem:[%s1610_s27 + $0x8] sm:$0xff] (%p50_p3), %v247_v1 }
  0x13   : > { %v253_v4 = vld [vmem:[%s1602_s26 + $0x40] sm:$0xff] (%p50_p3)  ;;  %v255_v5 = vld [vmem:[%s1602_s26 + $0x50] sm:$0xff] (%p50_p3)  ;;  %250 = vst [vmem:[%s1610_s27 + $0x10] sm:$0xff] (%p50_p3), %v249_v2  ;;  %252 = vst [vmem:[%s1610_s27 + $0x18] sm:$0xff] (%p50_p3), %v251_v3 }
  0x14   : > { %254 = vst [vmem:[%s1610_s27 + $0x20] sm:$0xff] (%p50_p3), %v253_v4  ;;  %256 = vst [vmem:[%s1610_s27 + $0x28] sm:$0xff] (%p50_p3), %v255_v5  ;;  %v257_v6 = vld [vmem:[%s1602_s26 + $0x60] sm:$0xff] (%p50_p3)  ;;  %v259_v7 = vld [vmem:[%s1602_s26 + $0x70] sm:$0xff] (%p50_p3) }
  0x15   : > { %v261_v8 = vld [vmem:[%s1602_s26 + $0x80] sm:$0xff]  ;;  %258 = vst [vmem:[%s1610_s27 + $0x30] sm:$0xff] %v257_v6  ;;  %260 = vst [vmem:[%s1610_s27 + $0x38] sm:$0xff] %v259_v7  ;;  %v263_v9 = vld [vmem:[%s1602_s26 + $0x90] sm:$0xff] }
  0x16   : > { %262 = vst [vmem:[%s1610_s27 + $0x40] sm:$0xff] %v261_v8  ;;  %v265_v10 = vld [vmem:[%s1602_s26 + $0xa0] sm:$0xff]  ;;  %v267_v11 = vld [vmem:[%s1602_s26 + $0xb0] sm:$0xff]  ;;  %264 = vst [vmem:[%s1610_s27 + $0x48] sm:$0xff] %v263_v9 }
  0x17   : > { %266 = vst [vmem:[%s1610_s27 + $0x50] sm:$0xff] %v265_v10  ;;  %268 = vst [vmem:[%s1610_s27 + $0x58] sm:$0xff] %v267_v11  ;;  %v269_v12 = vld [vmem:[%s1602_s26 + $0xc0] sm:$0xff]  ;;  %v271_v13 = vld [vmem:[%s1602_s26 + $0xd0] sm:$0xff] }
  0x18   : > { %v273_v14 = vld [vmem:[%s1602_s26 + $0xe0] sm:$0xff]  ;;  %270 = vst [vmem:[%s1610_s27 + $0x60] sm:$0xff] %v269_v12  ;;  %272 = vst [vmem:[%s1610_s27 + $0x68] sm:$0xff] %v271_v13  ;;  %v275_v15 = vld [vmem:[%s1602_s26 + $0xf0] sm:$0xff] }
  0x19   : > { %274 = vst [vmem:[%s1610_s27 + $0x70] sm:$0xff] %v273_v14  ;;  %v277_v16 = vld [vmem:[%s1602_s26 + $0x100] sm:$0xff]  ;;  %v279_v17 = vld [vmem:[%s1602_s26 + $0x110] sm:$0xff]  ;;  %276 = vst [vmem:[%s1610_s27 + $0x78] sm:$0xff] %v275_v15 }
  0x1a   : > { %278 = vst [vmem:[%s1610_s27 + $0x80] sm:$0xff] %v277_v16  ;;  %280 = vst [vmem:[%s1610_s27 + $0x88] sm:$0xff] %v279_v17  ;;  %v281_v18 = vld [vmem:[%s1602_s26 + $0x120] sm:$0xff]  ;;  %v283_v19 = vld [vmem:[%s1602_s26 + $0x130] sm:$0xff] }
  0x1b   : > { %v285_v20 = vld [vmem:[%s1602_s26 + $0x140] sm:$0xff]  ;;  %282 = vst [vmem:[%s1610_s27 + $0x90] sm:$0xff] %v281_v18  ;;  %284 = vst [vmem:[%s1610_s27 + $0x98] sm:$0xff] %v283_v19  ;;  %v287_v21 = vld [vmem:[%s1602_s26 + $0x150] sm:$0xff] }
  0x1c   : > { %286 = vst [vmem:[%s1610_s27 + $0xa0] sm:$0xff] %v285_v20  ;;  %288 = vst [vmem:[%s1610_s27 + $0xa8] sm:$0xff] %v287_v21 }
  0x1d PF: > { %p1150_p6 = scmp.ge.s32.totalorder %s1536_s16, 1  ;;  %p305_p7 = scmp.lt.s32.totalorder %s1536_s16, 3 }
  0x1f   : > { %p306_p8 = pnand %p1150_p6, %p305_p7 }
  0x20   : > { %s312_s28 = sand.u32 (!%p306_p8), 1, %s1520_s12   ;;  %s1151_s29 = sshll.u32 (!%p306_p8), %s1528_s14, 5 }
  0x21   : > { %309 = sbr.rel (%p306_p8) target bundleno = 360 (0x168), region = 66  ;;  %p352_p9 = scmp.lt.s32.totalorder (!%p306_p8), %s1151_s29, 63 }
  0x22   : > { %s1407_s30 = smul.u32 (!%p306_p8), 176, %s312_s28  ;;  %p1153_p10 = scmp.ne.s32.totalorder (!%p306_p8), %s1528_s14, 0 }
  0x24   : > { %s1659_s8 = scalar_lea.vmem (!%p306_p8), [#allocation3], %s1407_s30 }
  0x28   : > { %s1787_s29 = smov (!%p352_p9, %s1151_s29), 63  ;;  %376 = sbr.rel (%p1153_p10) target bundleno = 53 (0x35), region = 74 }
  0x29   : > { %s1152_s4 = sshll.u32 %s1787_s29, 2  ;;  %v1538_v22 = vmov (!%p1153_p10), 0.0  }
  0x2a   : > { %s1657_s7 = scalar_lea.vmem %s1777_s1, %s1152_s4  ;;  %377 = vst [vmem:[#allocation2] sm:$0xff] (!%p1153_p10), %v1538_v22  ;;  %378 = vst [vmem:[#allocation2 + $0x8] sm:$0xff] (!%p1153_p10), %v1538_v22 }
  0x2b   : > { %379 = vst [vmem:[#allocation2 + $0x10] sm:$0xff] (!%p1153_p10), %v1538_v22  ;;  %380 = vst [vmem:[#allocation2 + $0x18] sm:$0xff] (!%p1153_p10), %v1538_v22 }
  0x2c   : > { %381 = vst [vmem:[#allocation2 + $0x20] sm:$0xff] (!%p1153_p10), %v1538_v22  ;;  %382 = vst [vmem:[#allocation2 + $0x28] sm:$0xff] (!%p1153_p10), %v1538_v22 }
  0x2d   : > { %383 = vst [vmem:[#allocation2 + $0x30] sm:$0xff] (!%p1153_p10), %v1538_v22  ;;  %384 = vst [vmem:[#allocation2 + $0x38] sm:$0xff] (!%p1153_p10), %v1538_v22 }
  0x2e   : > { %385 = vst [vmem:[#allocation2 + $0x40] sm:$0xff] (!%p1153_p10), %v1538_v22  ;;  %386 = vst [vmem:[#allocation2 + $0x48] sm:$0xff] (!%p1153_p10), %v1538_v22 }
  0x2f   : > { %387 = vst [vmem:[#allocation2 + $0x50] sm:$0xff] %v1538_v22  ;;  %388 = vst [vmem:[#allocation2 + $0x58] sm:$0xff] %v1538_v22 }
  0x30   : > { %389 = vst [vmem:[#allocation2 + $0x60] sm:$0xff] %v1538_v22  ;;  %390 = vst [vmem:[#allocation2 + $0x68] sm:$0xff] %v1538_v22 }
  0x31   : > { %391 = vst [vmem:[#allocation2 + $0x70] sm:$0xff] %v1538_v22  ;;  %392 = vst [vmem:[#allocation2 + $0x78] sm:$0xff] %v1538_v22 }
  0x32   : > { %393 = vst [vmem:[#allocation2 + $0x80] sm:$0xff] %v1538_v22  ;;  %394 = vst [vmem:[#allocation2 + $0x88] sm:$0xff] %v1538_v22 }
  0x33   : > { %395 = vst [vmem:[#allocation2 + $0x90] sm:$0xff] %v1538_v22  ;;  %396 = vst [vmem:[#allocation2 + $0x98] sm:$0xff] %v1538_v22 }
  0x34   : > { %397 = vst [vmem:[#allocation2 + $0xa0] sm:$0xff] %v1538_v22  ;;  %398 = vst [vmem:[#allocation2 + $0xa8] sm:$0xff] %v1538_v22 }
  0x35 PF: > { %v1449_v23 = vld [vmem:[%s1657_s7 + $0x40] sm:$0xff]   ;;  %v1451_v25 = vld [vmem:[%s1657_s7 + $0x48] sm:$0xff]   ;;  %v1453_v27 = vld [vmem:[%s1657_s7 + $0x50] sm:$0xff]   ;;  %p1192_p11 = scmp.ne.s32.totalorder %s1528_s14, 1 }
  0x36   : > { %v1450_v24 = vld [vmem:[%s1657_s7] sm:$0xff]   ;;  %1308 = vmatprep.subr.bf16.mxu0 %v1449_v23  ;;  %1390 = vmatprep.subr.bf16.mxu1 %v1449_v23  ;;  %v1452_v26 = vld [vmem:[%s1657_s7 + $0x8] sm:$0xff]   ;;  %v1454_v28 = vld [vmem:[%s1657_s7 + $0x10] sm:$0xff]  }
  0x37   : > { %1309 = vmatpush3.bf16.msra.mxu0 %v1450_v24  ;;  %1398 = vmatpush3.bf16.msra.mxu1 %v1450_v24  ;;  %v1455_v29 = vld [vmem:[%s1657_s7 + $0x58] sm:$0xff]   ;;  %v1457_v31 = vld [vmem:[%s1657_s7 + $0x60] sm:$0xff]   ;;  %v1459_v33 = vld [vmem:[%s1657_s7 + $0x68] sm:$0xff]  }
  0x38   : > { %1310 = vmatprep.subr.bf16.mxu0 %v1451_v25  ;;  %1391 = vmatprep.subr.bf16.mxu1 %v1451_v25  ;;  %v1456_v30 = vld [vmem:[%s1657_s7 + $0x18] sm:$0xff]   ;;  %v1458_v32 = vld [vmem:[%s1657_s7 + $0x20] sm:$0xff]   ;;  %v1460_v36 = vld [vmem:[%s1657_s7 + $0x28] sm:$0xff]  }
  0x39   : > { %v1467_v34 = vld [vmem:[%s1659_s8 + $0x4] ss:$8 sps:$4 sm:$0xff]   ;;  %v1465_v41 = vld [vmem:[%s1659_s8] ss:$8 sps:$4 sm:$0xff]   ;;  %v1471_v43 = vld [vmem:[%s1659_s8 + $0x14] ss:$8 sps:$4 sm:$0xff]  }
  0x3a   : > { %v1470_v35 = vld [vmem:[%s1659_s8 + $0x64] ss:$8 sps:$4 sm:$0xff]   ;;  %713 = vmatprep.mubr.bf16.mxu0 %v1467_v34  ;;  %v1468_v42 = vld [vmem:[%s1659_s8 + $0x60] ss:$8 sps:$4 sm:$0xff]   ;;  %v1474_v44 = vld [vmem:[%s1659_s8 + $0x74] ss:$8 sps:$4 sm:$0xff]  }
  0x3b   : > { %1311 = vmatpush3.bf16.msra.mxu0 %v1452_v26  ;;  %1399 = vmatpush3.bf16.msra.mxu1 %v1452_v26  ;;  %v1461_v37 = vld [vmem:[%s1657_s7 + $0x70] sm:$0xff]   ;;  %v1463_v39 = vld [vmem:[%s1657_s7 + $0x78] sm:$0xff]   ;;  %v399_v63 = vld [vmem:[#allocation2] sm:$0xff] }
  0x3c   : > { %1312 = vmatprep.subr.bf16.mxu0 %v1453_v27  ;;  %1392 = vmatprep.subr.bf16.mxu1 %v1453_v27  ;;  %v1462_v38 = vld [vmem:[%s1657_s7 + $0x30] sm:$0xff]   ;;  %v1464_v40 = vld [vmem:[%s1657_s7 + $0x38] sm:$0xff]   ;;  %v411_v1 = vld [vmem:[#allocation2 + $0x60] sm:$0xff] }
  0x3d   : > { %761 = vmatprep.mubr.bf16.mxu1 %v1470_v35  ;;  %v1473_v45 = vld [vmem:[%s1659_s8 + $0x10] ss:$8 sps:$4 sm:$0xff]   ;;  %v1477_v47 = vld [vmem:[%s1659_s8 + $0x24] ss:$8 sps:$4 sm:$0xff]   ;;  %v1479_v49 = vld [vmem:[%s1659_s8 + $0x20] ss:$8 sps:$4 sm:$0xff]  }
  0x3e   : > { %v1476_v46 = vld [vmem:[%s1659_s8 + $0x70] ss:$8 sps:$4 sm:$0xff]   ;;  %v1480_v48 = vld [vmem:[%s1659_s8 + $0x84] ss:$8 sps:$4 sm:$0xff]   ;;  %v1482_v50 = vld [vmem:[%s1659_s8 + $0x80] ss:$8 sps:$4 sm:$0xff]  }
  0x3f   : > { %1313 = vmatpush3.bf16.msra.mxu0 %v1454_v28  ;;  %1400 = vmatpush3.bf16.msra.mxu1 %v1454_v28  ;;  %v1483_v51 = vld [vmem:[%s1659_s8 + $0x34] ss:$8 sps:$4 sm:$0xff]   ;;  %v1485_v53 = vld [vmem:[%s1659_s8 + $0x30] ss:$8 sps:$4 sm:$0xff]   ;;  %v1489_v55 = vld [vmem:[%s1659_s8 + $0x44] ss:$8 sps:$4 sm:$0xff]  }
  0x40   : > { %1314 = vmatprep.subr.bf16.mxu0 %v1455_v29  ;;  %1393 = vmatprep.subr.bf16.mxu1 %v1455_v29  ;;  %v1486_v52 = vld [vmem:[%s1659_s8 + $0x94] ss:$8 sps:$4 sm:$0xff]   ;;  %v1488_v54 = vld [vmem:[%s1659_s8 + $0x90] ss:$8 sps:$4 sm:$0xff]   ;;  %v1492_v56 = vld [vmem:[%s1659_s8 + $0xa4] ss:$8 sps:$4 sm:$0xff]  }
  0x41   : > { %v1491_v57 = vld [vmem:[%s1659_s8 + $0x40] ss:$8 sps:$4 sm:$0xff]   ;;  %v1495_v59 = vld [vmem:[%s1659_s8 + $0x54] ss:$8 sps:$4 sm:$0xff]   ;;  %v1497_v60 = vld [vmem:[%s1659_s8 + $0x50] ss:$8 sps:$4 sm:$0xff]  }
  0x42   : > { %v1494_v58 = vld [vmem:[%s1659_s8 + $0xa0] ss:$8 sps:$4 sm:$0xff]  }
  0x43   : > { %1315 = vmatpush3.bf16.msra.mxu0 %v1456_v30  ;;  %1401 = vmatpush3.bf16.msra.mxu1 %v1456_v30  ;;  %v400_v7 = vld [vmem:[#allocation2 + $0x8] sm:$0xff]  ;;  %v401_v19 = vld [vmem:[#allocation2 + $0x10] sm:$0xff]  ;;  %v402_v27 = vld [vmem:[#allocation2 + $0x18] sm:$0xff] }
  0x44   : > { %1316 = vmatprep.subr.bf16.mxu0 %v1457_v31  ;;  %1394 = vmatprep.subr.bf16.mxu1 %v1457_v31  ;;  %v412_v9 = vld [vmem:[#allocation2 + $0x68] sm:$0xff]  ;;  %v413_v21 = vld [vmem:[#allocation2 + $0x70] sm:$0xff]  ;;  %v414_v29 = vld [vmem:[#allocation2 + $0x78] sm:$0xff] }
  0x47   : > { %1317 = vmatpush3.bf16.msra.mxu0 %v1458_v32  ;;  %1402 = vmatpush3.bf16.msra.mxu1 %v1458_v32 }
  0x48   : > { %1318 = vmatprep.subr.bf16.mxu0 %v1459_v33  ;;  %1395 = vmatprep.subr.bf16.mxu1 %v1459_v33 }
  0x4b   : > { %1319 = vmatpush3.bf16.msra.mxu0 %v1460_v36  ;;  %1403 = vmatpush3.bf16.msra.mxu1 %v1460_v36 }
  0x4c   : > { %1320 = vmatprep.subr.bf16.mxu0 %v1461_v37  ;;  %1396 = vmatprep.subr.bf16.mxu1 %v1461_v37 }
  0x4f   : > { %1321 = vmatpush3.bf16.msra.mxu0 %v1462_v38  ;;  %1404 = vmatpush3.bf16.msra.mxu1 %v1462_v38 }
  0x50   : > { %1322 = vmatprep.subr.bf16.mxu0 %v1463_v39  ;;  %1397 = vmatprep.subr.bf16.mxu1 %v1463_v39  ;;  %v403_v39 = vld [vmem:[#allocation2 + $0x20] sm:$0xff] }
  0x53   : > { %1323 = vmatpush3.bf16.msra.mxu0 %v1464_v40  ;;  %1405 = vmatpush3.bf16.msra.mxu1 %v1464_v40 }
  0x56   : > { %714 = vmatmul.mubr.bf16.vlgmr.msra.gmra.mrb[0].mxu0 %v1465_v41  ;;  %762 = vmatmul.mubr.bf16.vlgmr.msra.gmra.mrb[0].mxu1 %v1468_v42  ;;  %v415_v41 = vld [vmem:[#allocation2 + $0x80] sm:$0xff] }
  0x57   : > { %721 = vmatprep.mubr.bf16.mxu0 %v1471_v43  ;;  %769 = vmatprep.mubr.bf16.mxu1 %v1474_v44 }
  0x5e   : > { %722 = vmatmul.mubr.bf16.gmra.mrb[4].mxu0 %v1473_v45  ;;  %770 = vmatmul.mubr.bf16.gmra.mrb[4].mxu1 %v1476_v46 }
  0x5f   : > { %729 = vmatprep.mubr.bf16.mxu0 %v1477_v47  ;;  %777 = vmatprep.mubr.bf16.mxu1 %v1480_v48  ;;  %v404_v47 = vld [vmem:[#allocation2 + $0x28] sm:$0xff] }
  0x66   : > { %730 = vmatmul.mubr.bf16.gmra.mrb[8].mxu0 %v1479_v49  ;;  %778 = vmatmul.mubr.bf16.gmra.mrb[8].mxu1 %v1482_v50  ;;  %v416_v49 = vld [vmem:[#allocation2 + $0x88] sm:$0xff] }
  0x67   : > { %737 = vmatprep.mubr.bf16.mxu0 %v1483_v51  ;;  %785 = vmatprep.mubr.bf16.mxu1 %v1486_v52 }
  0x6e   : > { %738 = vmatmul.mubr.bf16.gmra.mrb[12].mxu0 %v1485_v53  ;;  %786 = vmatmul.mubr.bf16.gmra.mrb[12].mxu1 %v1488_v54 }
  0x6f   : > { %745 = vmatprep.mubr.bf16.mxu0 %v1489_v55  ;;  %793 = vmatprep.mubr.bf16.mxu1 %v1492_v56 }
  0x76   : > { %746 = vmatmul.mubr.bf16.gmra.mrb[16].mxu0 %v1491_v57  ;;  %794 = vmatmul.mubr.bf16.gmra.mrb[16].mxu1 %v1494_v58 }
  0x77   : > { %753 = vmatprep.mubr.bf16.mxu0 %v1495_v59  ;;  %v405_v59 = vld [vmem:[#allocation2 + $0x30] sm:$0xff] }
  0x7e   : > { %754 = vmatmul.mubr.bf16.gmra.mrb[20].mxu0 %v1497_v60 }
 0x129   : > { %v1324_v61 = vpop.f32.mrb[0].mxu0  ;;  %v1360_v62 = vpop.f32.mrb[0].mxu1 }
 0x12a   : > { %v1325_v0 = vpop.f32.mrb[1].mxu0  ;;  %v1361_v2 = vpop.f32.mrb[1].mxu1 }
 0x12b   : > { %v1326_v3 = vadd.f32 %v1325_v0, %v1324_v61  ;;  %v1327_v4 = vpop.f32.mrb[2].mxu0  ;;  %v1362_v5 = vadd.f32 %v1361_v2, %v1360_v62  ;;  %v1363_v6 = vpop.f32.mrb[2].mxu1  ;;  %v417_v61 = vld [vmem:[#allocation2 + $0x90] sm:$0xff] }
 0x12c   : > { %v1328_v8 = vpop.f32.mrb[3].mxu0  ;;  %v1364_v10 = vpop.f32.mrb[3].mxu1 }
 0x12d   : > { %v802_v11 = vadd.f32 %v1326_v3, %v399_v63  ;;  %v1329_v12 = vadd.f32 %v1328_v8, %v1327_v4  ;;  %v814_v13 = vadd.f32 %v1362_v5, %v411_v1  ;;  %v1365_v14 = vadd.f32 %v1364_v10, %v1363_v6  ;;  %v406_v3 = vld [vmem:[#allocation2 + $0x38] sm:$0xff] }
 0x12e   : > { %v418_v5 = vld [vmem:[#allocation2 + $0x98] sm:$0xff] }
 0x12f   : > { %824 = vst [vmem:[#allocation2] sm:$0xff] %v802_v11  ;;  %v803_v15 = vadd.f32 %v1329_v12, %v400_v7  ;;  %836 = vst [vmem:[#allocation2 + $0x60] sm:$0xff] %v814_v13  ;;  %v815_v16 = vadd.f32 %v1365_v14, %v412_v9 }
 0x131   : > { %825 = vst [vmem:[#allocation2 + $0x8] sm:$0xff] %v803_v15  ;;  %v1330_v17 = vpop.f32.mrb[4].mxu0  ;;  %837 = vst [vmem:[#allocation2 + $0x68] sm:$0xff] %v815_v16  ;;  %v1366_v18 = vpop.f32.mrb[4].mxu1  ;;  %v407_v15 = vld [vmem:[#allocation2 + $0x40] sm:$0xff] }
 0x132   : > { %v1331_v20 = vpop.f32.mrb[5].mxu0  ;;  %v1367_v22 = vpop.f32.mrb[5].mxu1 }
 0x133   : > { %v1332_v23 = vadd.f32 %v1331_v20, %v1330_v17  ;;  %v1333_v24 = vpop.f32.mrb[6].mxu0  ;;  %v1368_v25 = vadd.f32 %v1367_v22, %v1366_v18  ;;  %v1369_v26 = vpop.f32.mrb[6].mxu1  ;;  %v419_v17 = vld [vmem:[#allocation2 + $0xa0] sm:$0xff] }
 0x134   : > { %v1334_v28 = vpop.f32.mrb[7].mxu0  ;;  %v1370_v30 = vpop.f32.mrb[7].mxu1 }
 0x135   : > { %v804_v31 = vadd.f32 %v1332_v23, %v401_v19  ;;  %v1335_v32 = vadd.f32 %v1334_v28, %v1333_v24  ;;  %v816_v33 = vadd.f32 %v1368_v25, %v413_v21  ;;  %v1371_v34 = vadd.f32 %v1370_v30, %v1369_v26  ;;  %v408_v23 = vld [vmem:[#allocation2 + $0x48] sm:$0xff] }
 0x136   : > { %v420_v25 = vld [vmem:[#allocation2 + $0xa8] sm:$0xff] }
 0x137   : > { %826 = vst [vmem:[#allocation2 + $0x10] sm:$0xff] %v804_v31  ;;  %v805_v35 = vadd.f32 %v1335_v32, %v402_v27  ;;  %838 = vst [vmem:[#allocation2 + $0x70] sm:$0xff] %v816_v33  ;;  %v817_v36 = vadd.f32 %v1371_v34, %v414_v29  ;;  %v409_v34 = vld [vmem:[#allocation2 + $0x50] sm:$0xff] }
 0x139   : > { %827 = vst [vmem:[#allocation2 + $0x18] sm:$0xff] %v805_v35  ;;  %v1336_v37 = vpop.f32.mrb[8].mxu0  ;;  %839 = vst [vmem:[#allocation2 + $0x78] sm:$0xff] %v817_v36  ;;  %v1372_v38 = vpop.f32.mrb[8].mxu1 }
 0x13a   : > { %v1337_v40 = vpop.f32.mrb[9].mxu0  ;;  %v1373_v42 = vpop.f32.mrb[9].mxu1 }
 0x13b   : > { %v1338_v43 = vadd.f32 %v1337_v40, %v1336_v37  ;;  %v1339_v44 = vpop.f32.mrb[10].mxu0  ;;  %v1374_v45 = vadd.f32 %v1373_v42, %v1372_v38  ;;  %v1375_v46 = vpop.f32.mrb[10].mxu1  ;;  %v410_v38 = vld [vmem:[#allocation2 + $0x58] sm:$0xff] }
 0x13c   : > { %v1340_v48 = vpop.f32.mrb[11].mxu0  ;;  %v1376_v50 = vpop.f32.mrb[11].mxu1 }
 0x13d   : > { %v806_v51 = vadd.f32 %v1338_v43, %v403_v39  ;;  %v1341_v52 = vadd.f32 %v1340_v48, %v1339_v44  ;;  %v818_v53 = vadd.f32 %v1374_v45, %v415_v41  ;;  %v1377_v54 = vadd.f32 %v1376_v50, %v1375_v46  ;;  %v850_v43 = vld [vmem:[#allocation2] sm:$0xff] (!%p1192_p11)  ;;  %v851_v44 = vld [vmem:[#allocation2 + $0x8] sm:$0xff] (!%p1192_p11) }
 0x13e   : > { %v1704_v45 = vld [vmem:[%s1778_s2] ss:$0 sm:$0xff] (!%p1192_p11)  ;;  %v852_v48 = vld [vmem:[#allocation2 + $0x10] sm:$0xff] (!%p1192_p11) }
 0x13f   : > { %828 = vst [vmem:[#allocation2 + $0x20] sm:$0xff] %v806_v51  ;;  %v807_v55 = vadd.f32 %v1341_v52, %v404_v47  ;;  %840 = vst [vmem:[#allocation2 + $0x80] sm:$0xff] %v818_v53  ;;  %v819_v56 = vadd.f32 %v1377_v54, %v416_v49  ;;  %v879_v46 = vadd.f32 (!%p1192_p11), %v1704_v45, %v850_v43 }
 0x140   : > { %v880_v47 = vadd.f32 (!%p1192_p11), %v1704_v45, %v851_v44  ;;  %v853_v49 = vld [vmem:[#allocation2 + $0x18] sm:$0xff] (!%p1192_p11)  ;;  %v881_v51 = vadd.f32 (!%p1192_p11), %v1704_v45, %v852_v48 }
 0x141   : > { %829 = vst [vmem:[#allocation2 + $0x28] sm:$0xff] %v807_v55  ;;  %v1342_v57 = vpop.f32.mrb[12].mxu0  ;;  %841 = vst [vmem:[#allocation2 + $0x88] sm:$0xff] %v819_v56  ;;  %v1378_v58 = vpop.f32.mrb[12].mxu1  ;;  %v882_v52 = vadd.f32 (!%p1192_p11), %v1704_v45, %v853_v49 }
 0x142   : > { %v1343_v60 = vpop.f32.mrb[13].mxu0  ;;  %v1379_v62 = vpop.f32.mrb[13].mxu1 }
 0x143   : > { %v1344_v63 = vadd.f32 %v1343_v60, %v1342_v57  ;;  %v1345_v0 = vpop.f32.mrb[14].mxu0  ;;  %v1380_v1 = vadd.f32 %v1379_v62, %v1378_v58  ;;  %v1381_v2 = vpop.f32.mrb[14].mxu1  ;;  %v901_v57 = vmax.f32 (!%p1192_p11), %v879_v46, 0.0  ;;  %v902_v58 = vmax.f32 (!%p1192_p11), %v880_v47, 0.0 }
 0x144   : > { %v1346_v4 = vpop.f32.mrb[15].mxu0  ;;  %v1382_v6 = vpop.f32.mrb[15].mxu1 }
 0x145   : > { %v808_v7 = vadd.f32 %v1344_v63, %v405_v59  ;;  %v1347_v8 = vadd.f32 %v1346_v4, %v1345_v0  ;;  %v820_v9 = vadd.f32 %v1380_v1, %v417_v61  ;;  %v1383_v10 = vadd.f32 %v1382_v6, %v1381_v2 }
 0x146   : > { %v854_v50 = vld [vmem:[#allocation2 + $0x20] sm:$0xff] (!%p1192_p11)  ;;  %v903_v0 = vmax.f32 (!%p1192_p11), %v881_v51, 0.0  ;;  %v904_v1 = vmax.f32 (!%p1192_p11), %v882_v52, 0.0  ;;  %v1246_v6 = vpack.c.bf16 (!%p1192_p11), %v902_v58, %v901_v57 }
 0x147   : > { %830 = vst [vmem:[#allocation2 + $0x30] sm:$0xff] %v808_v7  ;;  %v809_v11 = vadd.f32 %v1347_v8, %v406_v3  ;;  %842 = vst [vmem:[#allocation2 + $0x90] sm:$0xff] %v820_v9  ;;  %v821_v12 = vadd.f32 %v1383_v10, %v418_v5  ;;  %v883_v54 = vadd.f32 (!%p1192_p11), %v1704_v45, %v854_v50  ;;  %v862_v5 = vld [vmem:[#allocation2 + $0x60] sm:$0xff] (!%p1192_p11)  ;;  %v863_v10 = vld [vmem:[#allocation2 + $0x68] sm:$0xff] (!%p1192_p11) }
 0x148   : > { %v855_v53 = vld [vmem:[#allocation2 + $0x28] sm:$0xff] (!%p1192_p11)  ;;  %1247 = vst [vmem:[%s1779_s3] sm:$0xff] (!%p1192_p11), %v1246_v6  }
 0x149   : > { %831 = vst [vmem:[#allocation2 + $0x38] sm:$0xff] %v809_v11  ;;  %v1348_v13 = vpop.f32.mrb[16].mxu0  ;;  %843 = vst [vmem:[#allocation2 + $0x98] sm:$0xff] %v821_v12  ;;  %v1384_v14 = vpop.f32.mrb[16].mxu1  ;;  %v884_v59 = vadd.f32 (!%p1192_p11), %v1704_v45, %v855_v53  ;;  %v905_v2 = vmax.f32 (!%p1192_p11), %v883_v54, 0.0  ;;  %v1251_v11 = vpack.c.bf16 (!%p1192_p11), %v904_v1, %v903_v0 }
 0x14a   : > { %v1349_v16 = vpop.f32.mrb[17].mxu0  ;;  %v1385_v18 = vpop.f32.mrb[17].mxu1 }
 0x14b   : > { %v1350_v19 = vadd.f32 %v1349_v16, %v1348_v13  ;;  %v1351_v20 = vpop.f32.mrb[18].mxu0  ;;  %v1386_v21 = vadd.f32 %v1385_v18, %v1384_v14  ;;  %v1387_v22 = vpop.f32.mrb[18].mxu1  ;;  %v906_v7 = vmax.f32 (!%p1192_p11), %v884_v59, 0.0  ;;  %v865_v16 = vld [vmem:[#allocation2 + $0x78] sm:$0xff] (!%p1192_p11)  ;;  %1298 = vst [vmem:[%s1779_s3 + $0x8] sm:$0xff] (!%p1192_p11), %v1251_v11  }
 0x14c   : > { %v1352_v24 = vpop.f32.mrb[19].mxu0  ;;  %v1388_v26 = vpop.f32.mrb[19].mxu1 }
 0x14d   : > { %v810_v27 = vadd.f32 %v1350_v19, %v407_v15  ;;  %v1353_v28 = vadd.f32 %v1352_v24, %v1351_v20  ;;  %v822_v29 = vadd.f32 %v1386_v21, %v419_v17  ;;  %v1389_v30 = vadd.f32 %v1388_v26, %v1387_v22  ;;  %v864_v15 = vld [vmem:[#allocation2 + $0x70] sm:$0xff] (!%p1192_p11)  ;;  %v866_v21 = vld [vmem:[#allocation2 + $0x80] sm:$0xff] (!%p1192_p11)  ;;  %v867_v22 = vld [vmem:[#allocation2 + $0x88] sm:$0xff] (!%p1192_p11) }
 0x14e   : > { %v856_v55 = vld [vmem:[#allocation2 + $0x30] sm:$0xff] (!%p1192_p11)  ;;  %v1256_v17 = vpack.c.bf16 (!%p1192_p11), %v906_v7, %v905_v2  ;;  %v891_v20 = vadd.f32 (!%p1192_p11), %v1704_v45, %v862_v5  ;;  %v892_v26 = vadd.f32 (!%p1192_p11), %v1704_v45, %v863_v10 }
 0x14f   : > { %832 = vst [vmem:[#allocation2 + $0x40] sm:$0xff] %v810_v27  ;;  %v811_v31 = vadd.f32 %v1353_v28, %v408_v23  ;;  %844 = vst [vmem:[#allocation2 + $0xa0] sm:$0xff] %v822_v29  ;;  %v823_v32 = vadd.f32 %v1389_v30, %v420_v25  ;;  %v885_v60 = vadd.f32 (!%p1192_p11), %v1704_v45, %v856_v55  ;;  %v868_v27 = vld [vmem:[#allocation2 + $0x90] sm:$0xff] (!%p1192_p11) }
 0x150   : > { %v857_v56 = vld [vmem:[#allocation2 + $0x38] sm:$0xff] (!%p1192_p11)  ;;  %1299 = vst [vmem:[%s1779_s3 + $0x10] sm:$0xff] (!%p1192_p11), %v1256_v17   ;;  %v913_v29 = vmax.f32 (!%p1192_p11), %v891_v20, 0.0  ;;  %v893_v30 = vadd.f32 (!%p1192_p11), %v1704_v45, %v864_v15 }
 0x151   : > { %833 = vst [vmem:[#allocation2 + $0x48] sm:$0xff] %v811_v31  ;;  %v1354_v33 = vpop.f32.mrb[20].mxu0  ;;  %845 = vst [vmem:[#allocation2 + $0xa8] sm:$0xff] %v823_v32  ;;  %v886_v3 = vadd.f32 (!%p1192_p11), %v1704_v45, %v857_v56  ;;  %v907_v8 = vmax.f32 (!%p1192_p11), %v885_v60, 0.0  ;;  %v894_v31 = vadd.f32 (!%p1192_p11), %v1704_v45, %v865_v16  ;;  %v869_v32 = vld [vmem:[#allocation2 + $0x98] sm:$0xff] (!%p1192_p11) }
 0x152   : > { %v1355_v35 = vpop.f32.mrb[21].mxu0  ;;  %v898_v47 = vadd.f32 (!%p1192_p11), %v1704_v45, %v869_v32 }
 0x153   : > { %v1356_v36 = vadd.f32 %v1355_v35, %v1354_v33  ;;  %v1357_v37 = vpop.f32.mrb[22].mxu0  ;;  %849 = sbr.rel (%p1192_p11) target bundleno = 360 (0x168), region = 78  ;;  %v908_v12 = vmax.f32 (!%p1192_p11), %v886_v3, 0.0  ;;  %v895_v35 = vadd.f32 (!%p1192_p11), %v1704_v45, %v866_v21 }
 0x154   : > { %v1358_v39 = vpop.f32.mrb[23].mxu0  ;;  %v920_v53 = vmax.f32 (!%p1192_p11), %v898_v47, 0.0 }
 0x155   : > { %v812_v40 = vadd.f32 %v1356_v36, %v409_v34  ;;  %v1359_v41 = vadd.f32 %v1358_v39, %v1357_v37  ;;  %v1261_v23 = vpack.c.bf16 (!%p1192_p11), %v908_v12, %v907_v8  ;;  %v914_v34 = vmax.f32 (!%p1192_p11), %v892_v26, 0.0 }
 0x156   : > { %v858_v61 = vld [vmem:[#allocation2 + $0x40] sm:$0xff] (!%p1192_p11)  ;;  %v896_v36 = vadd.f32 (!%p1192_p11), %v1704_v45, %v867_v22  ;;  %v917_v44 = vmax.f32 (!%p1192_p11), %v895_v35, 0.0 }
 0x157   : > { %834 = vst [vmem:[#allocation2 + $0x50] sm:$0xff] %v812_v40  ;;  %v813_v42 = vadd.f32 %v1359_v41, %v410_v38  ;;  %v887_v9 = vadd.f32 (!%p1192_p11), %v1704_v45, %v858_v61  ;;  %1300 = vst [vmem:[%s1779_s3 + $0x18] sm:$0xff] (!%p1192_p11), %v1261_v23   ;;  %v870_v37 = vld [vmem:[#allocation2 + $0xa0] sm:$0xff] (!%p1192_p11)  ;;  %v915_v40 = vmax.f32 (!%p1192_p11), %v893_v30, 0.0  ;;  %v916_v41 = vmax.f32 (!%p1192_p11), %v894_v31, 0.0 }
 0x158   : > { %v859_v62 = vld [vmem:[#allocation2 + $0x48] sm:$0xff] (!%p1192_p11)  ;;  %v1276_v43 = vpack.c.bf16 (!%p1192_p11), %v914_v34, %v913_v29  ;;  %v918_v46 = vmax.f32 (!%p1192_p11), %v896_v36, 0.0  ;;  %v899_v50 = vadd.f32 (!%p1192_p11), %v1704_v45, %v870_v37 }
 0x159   : > { %835 = vst [vmem:[#allocation2 + $0x58] sm:$0xff] %v813_v42  ;;  %v888_v13 = vadd.f32 (!%p1192_p11), %v1704_v45, %v859_v62  ;;  %v909_v18 = vmax.f32 (!%p1192_p11), %v887_v9, 0.0  ;;  %v871_v38 = vld [vmem:[#allocation2 + $0xa8] sm:$0xff] (!%p1192_p11)  ;;  %v897_v42 = vadd.f32 (!%p1192_p11), %v1704_v45, %v868_v27  ;;  %v1281_v48 = vpack.c.bf16 (!%p1192_p11), %v916_v41, %v915_v40 }
 0x15a   : > { %v900_v51 = vadd.f32 %v1704_v45, %v871_v38  ;;  %1303 = vst [vmem:[%s1779_s3 + $0x30] sm:$0xff] %v1276_v43   ;;  %v1286_v52 = vpack.c.bf16 %v918_v46, %v917_v44  ;;  %v921_v54 = vmax.f32 %v899_v50, 0.0 }
 0x15b   : > { %v910_v24 = vmax.f32 %v888_v13, 0.0  ;;  %v919_v49 = vmax.f32 %v897_v42, 0.0  ;;  %1304 = vst [vmem:[%s1779_s3 + $0x38] sm:$0xff] %v1281_v48  }
 0x15c   : > { %v922_v55 = vmax.f32 %v900_v51, 0.0  ;;  %1305 = vst [vmem:[%s1779_s3 + $0x40] sm:$0xff] %v1286_v52  }
 0x15d   : > { %v1266_v33 = vpack.c.bf16 %v910_v24, %v909_v18  ;;  %v1291_v56 = vpack.c.bf16 %v920_v53, %v919_v49 }
 0x15e   : > { %v860_v63 = vld [vmem:[#allocation2 + $0x50] sm:$0xff]  ;;  %v1296_v57 = vpack.c.bf16 %v922_v55, %v921_v54 }
 0x15f   : > { %v889_v14 = vadd.f32 %v1704_v45, %v860_v63  ;;  %1301 = vst [vmem:[%s1779_s3 + $0x20] sm:$0xff] %v1266_v33   ;;  %1306 = vst [vmem:[%s1779_s3 + $0x48] sm:$0xff] %v1291_v56  }
 0x160   : > { %v861_v4 = vld [vmem:[#allocation2 + $0x58] sm:$0xff]  ;;  %1307 = vst [vmem:[%s1779_s3 + $0x50] sm:$0xff] %v1296_v57  }
 0x161   : > { %v890_v19 = vadd.f32 %v1704_v45, %v861_v4  ;;  %v911_v25 = vmax.f32 %v889_v14, 0.0 }
 0x163   : > { %v912_v28 = vmax.f32 %v890_v19, 0.0 }
 0x165   : > { %v1271_v39 = vpack.c.bf16 %v912_v28, %v911_v25 }
 0x167   : > { %1302 = vst [vmem:[%s1779_s3 + $0x28] sm:$0xff] %v1271_v39  }
 0x168 PF: > { %s13_s16 = sadd.s32 1, %s1536_s16   ;;  %s1780_s12 = smov %s1524_s13 }
 0x169   : > { %p10_p12 = scmp.ge.s32.totalorder %s13_s16, 4   ;;  %s1781_s13 = smov %s1594_s20 }
 0x16a   : > { %s1782_s14 = smov %s1532_s15  ;;  %s1783_s15 = smov %s1785_s17 }
 0x16b   :  { %12 = sbr.rel (!%p10_p12) target bundleno = 3 (0x3), region = 119 }

// kernel: distributional_dqn_forward.6
= control target key start
LH: loop header
LB: loop body
LE: loop exit
PB: predicated region body
PF: predicated region fallthrough
CT: control target
= control target key end

     0   :  { %s1267_s12 = smov 0   ;;  %s1269_s13 = smov 0   ;;  %s1392_s0 = inlined_call_operand.vmem [shape: bf16[112,768], index: 0, kind: input, shape index: {}]   ;;  %s1393_s1 = inlined_call_operand.vmem [shape: bf16[768,128], index: 1, kind: input, shape index: {}]   ;;  %s1394_s2 = inlined_call_operand.vmem [shape: f32[1,128], index: 2, kind: input, shape index: {}]   ;;  %s1395_s3 = inlined_call_operand.vmem [shape: bf16[112,128], index: 3, kind: output, shape index: {}]  }
   0x1   :  { %s1271_s14 = smov 0   ;;  %s1273_s15 = smov 0  }
   0x2   :  { %s1275_s16 = smov 0  }
   0x3 LB: > { %s25_s17 = sadd.s32 1, %s1240_s15  ;;  %p48_p1 = scmp.ne.s32.totalorder %s1232_s13, %s1228_s12  ;;  %s1244_s16 = sphi %s1275_s16, %s13_s16   ;;  %s1240_s15 = sphi %s1273_s15, %s1399_s15   ;;  %s1236_s14 = sphi %s1271_s14, %s1398_s14   ;;  %s1232_s13 = sphi %s1269_s13, %s1397_s13   ;;  %s1228_s12 = sphi %s1267_s12, %s1396_s12  }
   0x4   : > { %p26_p0 = scmp.ge.s32.totalorder %s25_s17, 3  ;;  %p49_p2 = scmp.eq.s32.totalorder %s1244_s16, 0 }
   0x5   : > { %s41_s19 = sadd.s32 1, %s1232_s13  ;;  %p939_p5 = scmp.ge.s32.totalorder %s1244_s16, 3 }
   0x6   : > { %s1401_s17 = smov (%p26_p0, %s25_s17), 0  ;;  %p50_p3 = por %p49_p2, %p48_p1 }
   0x7   : > { %s37_s18 = ssub.s32 %s1240_s15, %s1401_s17  ;;  %162 = sbr.rel (%p939_p5) target bundleno = 26 (0x1a), region = 20 }
   0x8   : > { %p39_p4 = scmp.eq.s32.totalorder %s37_s18, 0 }
   0xa   : > { %s1302_s20 = scalar_select %p39_p4, %s1232_s13, %s41_s19  }
   0xe   : > { %165 = sbr.rel (!%p50_p3) target bundleno = 26 (0x1a), region = 24  ;;  %s167_s21 = sand.u32 (%p50_p3), 1, %s1232_s13  }
   0xf   : > { %s996_s22 = sshll.u32 (%p50_p3), %s1240_s15, 3  ;;  %s1126_s23 = smul.u32 (%p50_p3), 112, %s167_s21 }
  0x10   : > { %s175_s26 = scalar_lea.vmem (%p50_p3), %s1392_s0, %s996_s22 }
  0x11   : > { %v229_v0 = vld [vmem:[%s175_s26] sm:$0xff] (%p50_p3)  ;;  %v231_v1 = vld [vmem:[%s175_s26 + $0x18] sm:$0xff] (%p50_p3)  ;;  %v233_v2 = vld [vmem:[%s175_s26 + $0x30] sm:$0xff] (%p50_p3)  ;;  %s169_s27 = scalar_lea.vmem (%p50_p3), [#allocation3], %s1126_s23 }
  0x12   : > { %v235_v3 = vld [vmem:[%s175_s26 + $0x48] sm:$0xff] (%p50_p3)  ;;  %v237_v4 = vld [vmem:[%s175_s26 + $0x60] sm:$0xff] (%p50_p3)  ;;  %v239_v5 = vld [vmem:[%s175_s26 + $0x78] sm:$0xff] (%p50_p3)  ;;  %230 = vst [vmem:[%s169_s27] sm:$0xff] (%p50_p3), %v229_v0 }
  0x13   : > { %232 = vst [vmem:[%s169_s27 + $0x8] sm:$0xff] (%p50_p3), %v231_v1  ;;  %234 = vst [vmem:[%s169_s27 + $0x10] sm:$0xff] (%p50_p3), %v233_v2  ;;  %v241_v6 = vld [vmem:[%s175_s26 + $0x90] sm:$0xff] (%p50_p3)  ;;  %v243_v7 = vld [vmem:[%s175_s26 + $0xa8] sm:$0xff] (%p50_p3) }
  0x14   : > { %236 = vst [vmem:[%s169_s27 + $0x18] sm:$0xff] (%p50_p3), %v235_v3  ;;  %238 = vst [vmem:[%s169_s27 + $0x20] sm:$0xff] (%p50_p3), %v237_v4  ;;  %v245_v8 = vld [vmem:[%s175_s26 + $0xc0] sm:$0xff] (%p50_p3)  ;;  %v247_v9 = vld [vmem:[%s175_s26 + $0xd8] sm:$0xff] (%p50_p3) }
  0x15   : > { %240 = vst [vmem:[%s169_s27 + $0x28] sm:$0xff] %v239_v5  ;;  %242 = vst [vmem:[%s169_s27 + $0x30] sm:$0xff] %v241_v6  ;;  %v249_v10 = vld [vmem:[%s175_s26 + $0xf0] sm:$0xff]  ;;  %v251_v11 = vld [vmem:[%s175_s26 + $0x108] sm:$0xff] }
  0x16   : > { %244 = vst [vmem:[%s169_s27 + $0x38] sm:$0xff] %v243_v7  ;;  %246 = vst [vmem:[%s169_s27 + $0x40] sm:$0xff] %v245_v8  ;;  %v253_v12 = vld [vmem:[%s175_s26 + $0x120] sm:$0xff]  ;;  %v255_v13 = vld [vmem:[%s175_s26 + $0x138] sm:$0xff] }
  0x17   : > { %248 = vst [vmem:[%s169_s27 + $0x48] sm:$0xff] %v247_v9  ;;  %250 = vst [vmem:[%s169_s27 + $0x50] sm:$0xff] %v249_v10 }
  0x18   : > { %252 = vst [vmem:[%s169_s27 + $0x58] sm:$0xff] %v251_v11  ;;  %254 = vst [vmem:[%s169_s27 + $0x60] sm:$0xff] %v253_v12 }
  0x19   : > { %256 = vst [vmem:[%s169_s27 + $0x68] sm:$0xff] %v255_v13 }
  0x1a PF: > { %p942_p6 = scmp.ge.s32.totalorder %s1244_s16, 1  ;;  %p273_p7 = scmp.lt.s32.totalorder %s1244_s16, 4 }
  0x1c   : > { %p274_p8 = pnand %p942_p6, %p273_p7 }
  0x1d   : > { %s280_s28 = sand.u32 (!%p274_p8), 1, %s1228_s12   ;;  %s943_s29 = sshll.u32 (!%p274_p8), %s1236_s14, 5 }
  0x1e   : > { %277 = sbr.rel (%p274_p8) target bundleno = 337 (0x151), region = 66  ;;  %p320_p9 = scmp.lt.s32.totalorder (!%p274_p8), %s943_s29, 95 }
  0x1f   : > { %s1127_s30 = smul.u32 (!%p274_p8), 112, %s280_s28  ;;  %p945_p10 = scmp.ne.s32.totalorder (!%p274_p8), %s1236_s14, 0 }
  0x21   : > { %s1319_s8 = scalar_lea.vmem (!%p274_p8), [#allocation3], %s1127_s30 }
  0x25   : > { %s1403_s29 = smov (!%p320_p9, %s943_s29), 95  ;;  %344 = sbr.rel (%p945_p10) target bundleno = 46 (0x2e), region = 74 }
  0x26   : > { %s944_s4 = sshll.u32 %s1403_s29, 2  ;;  %v1246_v14 = vmov (!%p945_p10), 0.0  }
  0x27   : > { %s1317_s7 = scalar_lea.vmem %s1393_s1, %s944_s4  ;;  %345 = vst [vmem:[#allocation2] sm:$0xff] (!%p945_p10), %v1246_v14  ;;  %346 = vst [vmem:[#allocation2 + $0x8] sm:$0xff] (!%p945_p10), %v1246_v14 }
  0x28   : > { %347 = vst [vmem:[#allocation2 + $0x10] sm:$0xff] (!%p945_p10), %v1246_v14  ;;  %348 = vst [vmem:[#allocation2 + $0x18] sm:$0xff] (!%p945_p10), %v1246_v14 }
  0x29   : > { %349 = vst [vmem:[#allocation2 + $0x20] sm:$0xff] (!%p945_p10), %v1246_v14  ;;  %350 = vst [vmem:[#allocation2 + $0x28] sm:$0xff] (!%p945_p10), %v1246_v14 }
  0x2a   : > { %351 = vst [vmem:[#allocation2 + $0x30] sm:$0xff] (!%p945_p10), %v1246_v14  ;;  %352 = vst [vmem:[#allocation2 + $0x38] sm:$0xff] (!%p945_p10), %v1246_v14 }
  0x2b   : > { %353 = vst [vmem:[#allocation2 + $0x40] sm:$0xff] (!%p945_p10), %v1246_v14  ;;  %354 = vst [vmem:[#allocation2 + $0x48] sm:$0xff] (!%p945_p10), %v1246_v14 }
  0x2c   : > { %355 = vst [vmem:[#allocation2 + $0x50] sm:$0xff] %v1246_v14  ;;  %356 = vst [vmem:[#allocation2 + $0x58] sm:$0xff] %v1246_v14 }
  0x2d   : > { %357 = vst [vmem:[#allocation2 + $0x60] sm:$0xff] %v1246_v14  ;;  %358 = vst [vmem:[#allocation2 + $0x68] sm:$0xff] %v1246_v14 }
  0x2e PF: > { %v1169_v15 = vld [vmem:[%s1317_s7 + $0x40] sm:$0xff]   ;;  %v1171_v17 = vld [vmem:[%s1317_s7 + $0x48] sm:$0xff]   ;;  %v1173_v19 = vld [vmem:[%s1317_s7 + $0x50] sm:$0xff]   ;;  %p976_p11 = scmp.ne.s32.totalorder %s1236_s14, 2 }
  0x2f   : > { %v1170_v16 = vld [vmem:[%s1317_s7] sm:$0xff]   ;;  %1052 = vmatprep.subr.bf16.mxu0 %v1169_v15  ;;  %1110 = vmatprep.subr.bf16.mxu1 %v1169_v15  ;;  %v1172_v18 = vld [vmem:[%s1317_s7 + $0x8] sm:$0xff]   ;;  %v1174_v20 = vld [vmem:[%s1317_s7 + $0x10] sm:$0xff]  }
  0x30   : > { %1053 = vmatpush3.bf16.msra.mxu0 %v1170_v16  ;;  %1118 = vmatpush3.bf16.msra.mxu1 %v1170_v16  ;;  %v1175_v21 = vld [vmem:[%s1317_s7 + $0x58] sm:$0xff]   ;;  %v1177_v23 = vld [vmem:[%s1317_s7 + $0x60] sm:$0xff]   ;;  %v1179_v25 = vld [vmem:[%s1317_s7 + $0x68] sm:$0xff]  }
  0x31   : > { %1054 = vmatprep.subr.bf16.mxu0 %v1171_v17  ;;  %1111 = vmatprep.subr.bf16.mxu1 %v1171_v17  ;;  %v1176_v22 = vld [vmem:[%s1317_s7 + $0x18] sm:$0xff]   ;;  %v1178_v24 = vld [vmem:[%s1317_s7 + $0x20] sm:$0xff]   ;;  %v1180_v28 = vld [vmem:[%s1317_s7 + $0x28] sm:$0xff]  }
  0x32   : > { %v1187_v26 = vld [vmem:[%s1319_s8 + $0x4] ss:$8 sps:$4 sm:$0xff]   ;;  %v1185_v33 = vld [vmem:[%s1319_s8] ss:$8 sps:$4 sm:$0xff]   ;;  %v1191_v35 = vld [vmem:[%s1319_s8 + $0x14] ss:$8 sps:$4 sm:$0xff]  }
  0x33   : > { %v1190_v27 = vld [vmem:[%s1319_s8 + $0x44] ss:$8 sps:$4 sm:$0xff]   ;;  %617 = vmatprep.mubr.bf16.mxu0 %v1187_v26  ;;  %v1188_v34 = vld [vmem:[%s1319_s8 + $0x40] ss:$8 sps:$4 sm:$0xff]   ;;  %v1194_v36 = vld [vmem:[%s1319_s8 + $0x54] ss:$8 sps:$4 sm:$0xff]  }
  0x34   : > { %1055 = vmatpush3.bf16.msra.mxu0 %v1172_v18  ;;  %1119 = vmatpush3.bf16.msra.mxu1 %v1172_v18  ;;  %v1181_v29 = vld [vmem:[%s1317_s7 + $0x70] sm:$0xff]   ;;  %v1183_v31 = vld [vmem:[%s1317_s7 + $0x78] sm:$0xff]   ;;  %v359_v47 = vld [vmem:[#allocation2] sm:$0xff] }
  0x35   : > { %1056 = vmatprep.subr.bf16.mxu0 %v1173_v19  ;;  %1112 = vmatprep.subr.bf16.mxu1 %v1173_v19  ;;  %v1182_v30 = vld [vmem:[%s1317_s7 + $0x30] sm:$0xff]   ;;  %v1184_v32 = vld [vmem:[%s1317_s7 + $0x38] sm:$0xff]   ;;  %v367_v49 = vld [vmem:[#allocation2 + $0x40] sm:$0xff] }
  0x36   : > { %649 = vmatprep.mubr.bf16.mxu1 %v1190_v27  ;;  %v1193_v37 = vld [vmem:[%s1319_s8 + $0x10] ss:$8 sps:$4 sm:$0xff]   ;;  %v1197_v39 = vld [vmem:[%s1319_s8 + $0x24] ss:$8 sps:$4 sm:$0xff]   ;;  %v1199_v41 = vld [vmem:[%s1319_s8 + $0x20] ss:$8 sps:$4 sm:$0xff]  }
  0x37   : > { %v1196_v38 = vld [vmem:[%s1319_s8 + $0x50] ss:$8 sps:$4 sm:$0xff]   ;;  %v1200_v40 = vld [vmem:[%s1319_s8 + $0x64] ss:$8 sps:$4 sm:$0xff]   ;;  %v1202_v42 = vld [vmem:[%s1319_s8 + $0x60] ss:$8 sps:$4 sm:$0xff]  }
  0x38   : > { %1057 = vmatpush3.bf16.msra.mxu0 %v1174_v20  ;;  %1120 = vmatpush3.bf16.msra.mxu1 %v1174_v20  ;;  %v1203_v43 = vld [vmem:[%s1319_s8 + $0x34] ss:$8 sps:$4 sm:$0xff]   ;;  %v1205_v44 = vld [vmem:[%s1319_s8 + $0x30] ss:$8 sps:$4 sm:$0xff]  }
  0x39   : > { %1058 = vmatprep.subr.bf16.mxu0 %v1175_v21  ;;  %1113 = vmatprep.subr.bf16.mxu1 %v1175_v21  ;;  %v360_v55 = vld [vmem:[#allocation2 + $0x8] sm:$0xff]  ;;  %v361_v3 = vld [vmem:[#allocation2 + $0x10] sm:$0xff]  ;;  %v362_v11 = vld [vmem:[#allocation2 + $0x18] sm:$0xff] }
  0x3a   : > { %v368_v57 = vld [vmem:[#allocation2 + $0x48] sm:$0xff]  ;;  %v369_v5 = vld [vmem:[#allocation2 + $0x50] sm:$0xff]  ;;  %v370_v13 = vld [vmem:[#allocation2 + $0x58] sm:$0xff] }
  0x3c   : > { %1059 = vmatpush3.bf16.msra.mxu0 %v1176_v22  ;;  %1121 = vmatpush3.bf16.msra.mxu1 %v1176_v22 }
  0x3d   : > { %1060 = vmatprep.subr.bf16.mxu0 %v1177_v23  ;;  %1114 = vmatprep.subr.bf16.mxu1 %v1177_v23  ;;  %v363_v23 = vld [vmem:[#allocation2 + $0x20] sm:$0xff] }
  0x40   : > { %1061 = vmatpush3.bf16.msra.mxu0 %v1178_v24  ;;  %1122 = vmatpush3.bf16.msra.mxu1 %v1178_v24 }
  0x41   : > { %1062 = vmatprep.subr.bf16.mxu0 %v1179_v25  ;;  %1115 = vmatprep.subr.bf16.mxu1 %v1179_v25  ;;  %v371_v25 = vld [vmem:[#allocation2 + $0x60] sm:$0xff] }
  0x44   : > { %1063 = vmatpush3.bf16.msra.mxu0 %v1180_v28  ;;  %1123 = vmatpush3.bf16.msra.mxu1 %v1180_v28 }
  0x45   : > { %1064 = vmatprep.subr.bf16.mxu0 %v1181_v29  ;;  %1116 = vmatprep.subr.bf16.mxu1 %v1181_v29 }
  0x48   : > { %1065 = vmatpush3.bf16.msra.mxu0 %v1182_v30  ;;  %1124 = vmatpush3.bf16.msra.mxu1 %v1182_v30 }
  0x49   : > { %1066 = vmatprep.subr.bf16.mxu0 %v1183_v31  ;;  %1117 = vmatprep.subr.bf16.mxu1 %v1183_v31  ;;  %v364_v31 = vld [vmem:[#allocation2 + $0x28] sm:$0xff] }
  0x4c   : > { %1067 = vmatpush3.bf16.msra.mxu0 %v1184_v32  ;;  %1125 = vmatpush3.bf16.msra.mxu1 %v1184_v32 }
  0x4f   : > { %618 = vmatmul.mubr.bf16.vlgmr.msra.gmra.mrb[0].mxu0 %v1185_v33  ;;  %650 = vmatmul.mubr.bf16.vlgmr.msra.gmra.mrb[0].mxu1 %v1188_v34  ;;  %v372_v33 = vld [vmem:[#allocation2 + $0x68] sm:$0xff] }
  0x50   : > { %625 = vmatprep.mubr.bf16.mxu0 %v1191_v35  ;;  %657 = vmatprep.mubr.bf16.mxu1 %v1194_v36 }
  0x57   : > { %626 = vmatmul.mubr.bf16.gmra.mrb[4].mxu0 %v1193_v37  ;;  %658 = vmatmul.mubr.bf16.gmra.mrb[4].mxu1 %v1196_v38 }
  0x58   : > { %633 = vmatprep.mubr.bf16.mxu0 %v1197_v39  ;;  %665 = vmatprep.mubr.bf16.mxu1 %v1200_v40 }
  0x5f   : > { %634 = vmatmul.mubr.bf16.gmra.mrb[8].mxu0 %v1199_v41  ;;  %666 = vmatmul.mubr.bf16.gmra.mrb[8].mxu1 %v1202_v42  ;;  %v365_v42 = vld [vmem:[#allocation2 + $0x30] sm:$0xff] }
  0x60   : > { %641 = vmatprep.mubr.bf16.mxu0 %v1203_v43 }
  0x67   : > { %642 = vmatmul.mubr.bf16.gmra.mrb[12].mxu0 %v1205_v44 }
 0x122   : > { %v1068_v45 = vpop.f32.mrb[0].mxu0  ;;  %v1092_v46 = vpop.f32.mrb[0].mxu1 }
 0x123   : > { %v1069_v48 = vpop.f32.mrb[1].mxu0  ;;  %v1093_v50 = vpop.f32.mrb[1].mxu1 }
 0x124   : > { %v1070_v51 = vadd.f32 %v1069_v48, %v1068_v45  ;;  %v1071_v52 = vpop.f32.mrb[2].mxu0  ;;  %v1094_v53 = vadd.f32 %v1093_v50, %v1092_v46  ;;  %v1095_v54 = vpop.f32.mrb[2].mxu1  ;;  %v366_v46 = vld [vmem:[#allocation2 + $0x38] sm:$0xff] }
 0x125   : > { %v1072_v56 = vpop.f32.mrb[3].mxu0  ;;  %v1096_v58 = vpop.f32.mrb[3].mxu1 }
 0x126   : > { %v674_v59 = vadd.f32 %v1070_v51, %v359_v47  ;;  %v1073_v60 = vadd.f32 %v1072_v56, %v1071_v52  ;;  %v682_v61 = vadd.f32 %v1094_v53, %v367_v49  ;;  %v1097_v62 = vadd.f32 %v1096_v58, %v1095_v54  ;;  %v977_v53 = vld [vmem:[%s1394_s2] ss:$0 sm:$0xff] (!%p976_p11) }
 0x128   : > { %688 = vst [vmem:[#allocation2] sm:$0xff] %v674_v59  ;;  %v675_v63 = vadd.f32 %v1073_v60, %v360_v55  ;;  %696 = vst [vmem:[#allocation2 + $0x40] sm:$0xff] %v682_v61  ;;  %v683_v0 = vadd.f32 %v1097_v62, %v368_v57 }
 0x12a   : > { %689 = vst [vmem:[#allocation2 + $0x8] sm:$0xff] %v675_v63  ;;  %v1074_v1 = vpop.f32.mrb[4].mxu0  ;;  %697 = vst [vmem:[#allocation2 + $0x48] sm:$0xff] %v683_v0  ;;  %v1098_v2 = vpop.f32.mrb[4].mxu1 }
 0x12b   : > { %v1075_v4 = vpop.f32.mrb[5].mxu0  ;;  %v1099_v6 = vpop.f32.mrb[5].mxu1 }
 0x12c   : > { %v1076_v7 = vadd.f32 %v1075_v4, %v1074_v1  ;;  %v1077_v8 = vpop.f32.mrb[6].mxu0  ;;  %v1100_v9 = vadd.f32 %v1099_v6, %v1098_v2  ;;  %v1101_v10 = vpop.f32.mrb[6].mxu1 }
 0x12d   : > { %v1078_v12 = vpop.f32.mrb[7].mxu0  ;;  %v1102_v14 = vpop.f32.mrb[7].mxu1 }
 0x12e   : > { %v676_v15 = vadd.f32 %v1076_v7, %v361_v3  ;;  %v1079_v16 = vadd.f32 %v1078_v12, %v1077_v8  ;;  %v684_v17 = vadd.f32 %v1100_v9, %v369_v5  ;;  %v1103_v18 = vadd.f32 %v1102_v14, %v1101_v10 }
 0x12f   : > { %v706_v51 = vld [vmem:[#allocation2] sm:$0xff] (!%p976_p11) }
 0x130   : > { %690 = vst [vmem:[#allocation2 + $0x10] sm:$0xff] %v676_v15  ;;  %v677_v19 = vadd.f32 %v1079_v16, %v362_v11  ;;  %698 = vst [vmem:[#allocation2 + $0x50] sm:$0xff] %v684_v17  ;;  %v685_v20 = vadd.f32 %v1103_v18, %v370_v13  ;;  %v727_v54 = vadd.f32 (!%p976_p11), %v977_v53, %v706_v51  ;;  %v714_v5 = vld [vmem:[#allocation2 + $0x40] sm:$0xff] (!%p976_p11) }
 0x131   : > { %v707_v52 = vld [vmem:[#allocation2 + $0x8] sm:$0xff] (!%p976_p11)  ;;  %v735_v17 = vadd.f32 (!%p976_p11), %v977_v53, %v714_v5 }
 0x132   : > { %691 = vst [vmem:[#allocation2 + $0x18] sm:$0xff] %v677_v19  ;;  %v1080_v21 = vpop.f32.mrb[8].mxu0  ;;  %699 = vst [vmem:[#allocation2 + $0x58] sm:$0xff] %v685_v20  ;;  %v1104_v22 = vpop.f32.mrb[8].mxu1  ;;  %v728_v55 = vadd.f32 (!%p976_p11), %v977_v53, %v707_v52  ;;  %v741_v1 = vmax.f32 (!%p976_p11), %v727_v54, 0.0  ;;  %v715_v6 = vld [vmem:[#allocation2 + $0x48] sm:$0xff] (!%p976_p11) }
 0x133   : > { %v1081_v24 = vpop.f32.mrb[9].mxu0  ;;  %v1105_v26 = vpop.f32.mrb[9].mxu1 }
 0x134   : > { %v1082_v27 = vadd.f32 %v1081_v24, %v1080_v21  ;;  %v1083_v28 = vpop.f32.mrb[10].mxu0  ;;  %v1106_v29 = vadd.f32 %v1105_v26, %v1104_v22  ;;  %v1107_v30 = vpop.f32.mrb[10].mxu1  ;;  %v742_v2 = vmax.f32 (!%p976_p11), %v728_v55, 0.0  ;;  %v736_v21 = vadd.f32 (!%p976_p11), %v977_v53, %v715_v6 }
 0x135   : > { %v1084_v32 = vpop.f32.mrb[11].mxu0  ;;  %v1108_v34 = vpop.f32.mrb[11].mxu1  ;;  %v749_v24 = vmax.f32 (!%p976_p11), %v735_v17, 0.0 }
 0x136   : > { %v678_v35 = vadd.f32 %v1082_v27, %v363_v23  ;;  %v1085_v36 = vadd.f32 %v1084_v32, %v1083_v28  ;;  %v686_v37 = vadd.f32 %v1106_v29, %v371_v25  ;;  %v1109_v38 = vadd.f32 %v1108_v34, %v1107_v30 }
 0x137   : > { %v708_v56 = vld [vmem:[#allocation2 + $0x10] sm:$0xff] (!%p976_p11)  ;;  %v1014_v14 = vpack.c.bf16 (!%p976_p11), %v742_v2, %v741_v1  ;;  %v750_v28 = vmax.f32 (!%p976_p11), %v736_v21, 0.0 }
 0x138   : > { %692 = vst [vmem:[#allocation2 + $0x20] sm:$0xff] %v678_v35  ;;  %v679_v39 = vadd.f32 %v1085_v36, %v364_v31  ;;  %700 = vst [vmem:[#allocation2 + $0x60] sm:$0xff] %v686_v37  ;;  %v687_v40 = vadd.f32 %v1109_v38, %v372_v33  ;;  %v729_v59 = vadd.f32 (!%p976_p11), %v977_v53, %v708_v56  ;;  %v716_v7 = vld [vmem:[#allocation2 + $0x50] sm:$0xff] (!%p976_p11) }
 0x139   : > { %v709_v57 = vld [vmem:[#allocation2 + $0x18] sm:$0xff] (!%p976_p11)  ;;  %v737_v22 = vadd.f32 (!%p976_p11), %v977_v53, %v716_v7  ;;  %1015 = vst [vmem:[%s1395_s3] sm:$0xff] (!%p976_p11), %v1014_v14   ;;  %v1034_v33 = vpack.c.bf16 (!%p976_p11), %v750_v28, %v749_v24 }
 0x13a   : > { %693 = vst [vmem:[#allocation2 + $0x28] sm:$0xff] %v679_v39  ;;  %v1086_v41 = vpop.f32.mrb[12].mxu0  ;;  %701 = vst [vmem:[#allocation2 + $0x68] sm:$0xff] %v687_v40  ;;  %v730_v60 = vadd.f32 (!%p976_p11), %v977_v53, %v709_v57  ;;  %v743_v8 = vmax.f32 (!%p976_p11), %v729_v59, 0.0  ;;  %v717_v12 = vld [vmem:[#allocation2 + $0x58] sm:$0xff] (!%p976_p11) }
 0x13b   : > { %v1087_v43 = vpop.f32.mrb[13].mxu0  ;;  %v738_v25 = vadd.f32 (!%p976_p11), %v977_v53, %v717_v12  ;;  %v751_v29 = vmax.f32 (!%p976_p11), %v737_v22, 0.0  ;;  %1049 = vst [vmem:[%s1395_s3 + $0x20] sm:$0xff] (!%p976_p11), %v1034_v33  }
 0x13c   : > { %v1088_v44 = vadd.f32 %v1087_v43, %v1086_v41  ;;  %v1089_v45 = vpop.f32.mrb[14].mxu0  ;;  %705 = sbr.rel (%p976_p11) target bundleno = 337 (0x151), region = 78  ;;  %v744_v9 = vmax.f32 (!%p976_p11), %v730_v60, 0.0 }
 0x13d   : > { %v1090_v47 = vpop.f32.mrb[15].mxu0  ;;  %v752_v31 = vmax.f32 (!%p976_p11), %v738_v25, 0.0 }
 0x13e   : > { %v680_v48 = vadd.f32 %v1088_v44, %v365_v42  ;;  %v1091_v49 = vadd.f32 %v1090_v47, %v1089_v45  ;;  %v1019_v19 = vpack.c.bf16 (!%p976_p11), %v744_v9, %v743_v8 }
 0x13f   : > { %v710_v58 = vld [vmem:[#allocation2 + $0x20] sm:$0xff] (!%p976_p11)  ;;  %v1039_v35 = vpack.c.bf16 (!%p976_p11), %v752_v31, %v751_v29 }
 0x140   : > { %694 = vst [vmem:[#allocation2 + $0x30] sm:$0xff] %v680_v48  ;;  %v681_v50 = vadd.f32 %v1091_v49, %v366_v46  ;;  %v731_v62 = vadd.f32 (!%p976_p11), %v977_v53, %v710_v58  ;;  %v718_v13 = vld [vmem:[#allocation2 + $0x60] sm:$0xff] (!%p976_p11)  ;;  %1046 = vst [vmem:[%s1395_s3 + $0x8] sm:$0xff] (!%p976_p11), %v1019_v19  }
 0x141   : > { %v711_v61 = vld [vmem:[#allocation2 + $0x28] sm:$0xff] (!%p976_p11)  ;;  %v739_v26 = vadd.f32 (!%p976_p11), %v977_v53, %v718_v13  ;;  %1050 = vst [vmem:[%s1395_s3 + $0x28] sm:$0xff] (!%p976_p11), %v1039_v35  }
 0x142   : > { %695 = vst [vmem:[#allocation2 + $0x38] sm:$0xff] %v681_v50  ;;  %v732_v3 = vadd.f32 (!%p976_p11), %v977_v53, %v711_v61  ;;  %v745_v10 = vmax.f32 (!%p976_p11), %v731_v62, 0.0  ;;  %v719_v18 = vld [vmem:[#allocation2 + $0x68] sm:$0xff] (!%p976_p11) }
 0x143   : > { %v740_v30 = vadd.f32 %v977_v53, %v719_v18  ;;  %v753_v32 = vmax.f32 %v739_v26, 0.0 }
 0x144   : > { %v746_v15 = vmax.f32 %v732_v3, 0.0 }
 0x145   : > { %v754_v34 = vmax.f32 %v740_v30, 0.0 }
 0x146   : > { %v1024_v23 = vpack.c.bf16 %v746_v15, %v745_v10 }
 0x147   : > { %v712_v63 = vld [vmem:[#allocation2 + $0x30] sm:$0xff]  ;;  %v1044_v36 = vpack.c.bf16 %v754_v34, %v753_v32 }
 0x148   : > { %v733_v4 = vadd.f32 %v977_v53, %v712_v63  ;;  %1047 = vst [vmem:[%s1395_s3 + $0x10] sm:$0xff] %v1024_v23  }
 0x149   : > { %v713_v0 = vld [vmem:[#allocation2 + $0x38] sm:$0xff]  ;;  %1051 = vst [vmem:[%s1395_s3 + $0x30] sm:$0xff] %v1044_v36  }
 0x14a   : > { %v734_v11 = vadd.f32 %v977_v53, %v713_v0  ;;  %v747_v16 = vmax.f32 %v733_v4, 0.0 }
 0x14c   : > { %v748_v20 = vmax.f32 %v734_v11, 0.0 }
 0x14e   : > { %v1029_v27 = vpack.c.bf16 %v748_v20, %v747_v16 }
 0x150   : > { %1048 = vst [vmem:[%s1395_s3 + $0x18] sm:$0xff] %v1029_v27  }
 0x151 PF: > { %s13_s16 = sadd.s32 1, %s1244_s16   ;;  %s1396_s12 = smov %s1232_s13 }
 0x152   : > { %p10_p12 = scmp.ge.s32.totalorder %s13_s16, 5   ;;  %s1397_s13 = smov %s1302_s20 }
 0x153   : > { %s1398_s14 = smov %s1240_s15  ;;  %s1399_s15 = smov %s1401_s17 }
 0x154   :  { %12 = sbr.rel (!%p10_p12) target bundleno = 3 (0x3), region = 119 }

// kernel: distributional_dqn_forward.7
= control target key start
LH: loop header
LB: loop body
LE: loop exit
PB: predicated region body
PF: predicated region fallthrough
CT: control target
= control target key end

     0   :  { %vm4898_vm0 = vcmask 523264   ;;  %vm6547_vm1 = vcmask 834968   ;;  %vm6584_vm2 = vcmask 1048368   ;;  %vm6586_vm3 = vcmask 203776   ;;  %s9031_s16 = smov 77   ;;  %s9032_s17 = smov 26   ;;  %s11937_s1 = inlined_call_operand.vmem [shape: bf16[3136,512], index: 1, kind: input, shape index: {}]   ;;  %s11938_s0 = inlined_call_operand.vmem [shape: bf16[16,3136], index: 0, kind: input, shape index: {}]   ;;  %s11939_s3 = inlined_call_operand.vmem [shape: bf16[512,256], index: 3, kind: input, shape index: {}]   ;;  %s11940_s2 = inlined_call_operand.vmem [shape: f32[1,512], index: 2, kind: input, shape index: {}]   ;;  %s11941_s4 = inlined_call_operand.vmem [shape: f32[1,256], index: 4, kind: input, shape index: {}]   ;;  %s11942_s5 = inlined_call_operand.vmem [shape: f32[16,256], index: 5, kind: output, shape index: {}]  }
   0x1   :  { %v7681_v0 = vld [vmem:[%s11937_s1 + $0x4] ss:$16 sps:$4 sm:$0xff]   ;;  %v7685_v2 = vld [vmem:[%s11937_s1] ss:$16 sps:$4 sm:$0xff]   ;;  %vm6649_vm4 = vcmask 621768   ;;  %vm6518_vm5 = vcmask 416768  }
   0x2   :  { %v7683_v1 = vld [vmem:[%s11937_s1 + $0x204] ss:$16 sps:$4 sm:$0xff]   ;;  %4902 = vmatprep.subr.bf16.mxu1 %v7681_v0  ;;  %v7686_v3 = vld [vmem:[%s11937_s1 + $0x200] ss:$16 sps:$4 sm:$0xff]   ;;  %s9033_s18 = smov 103   ;;  %vm6620_vm6 = vcmask 211968  }
   0x3   :  { %4945 = vmatprep.subr.bf16.mxu0 %v7683_v1  ;;  %v7687_v4 = vld [vmem:[%s11937_s1 + $0x24] ss:$16 sps:$4 sm:$0xff]   ;;  %4903 = vmatpush1.bf16.msra.mxu1 %v7685_v2  ;;  %v7691_v6 = vld [vmem:[%s11937_s1 + $0x20] ss:$16 sps:$4 sm:$0xff]  }
   0x4   :  { %4946 = vmatpush1.bf16.msra.mxu0 %v7686_v3  ;;  %v7689_v5 = vld [vmem:[%s11937_s1 + $0x224] ss:$16 sps:$4 sm:$0xff]   ;;  %4904 = vmatprep.subr.bf16.mxu1 %v7687_v4  ;;  %v7692_v7 = vld [vmem:[%s11937_s1 + $0x220] ss:$16 sps:$4 sm:$0xff]   ;;  %v7788_v3 = vld [vmem:[%s11937_s1 + $0xc] ss:$16 sps:$4 sm:$0xff]  }
   0x5   :  { %4947 = vmatprep.subr.bf16.mxu0 %v7689_v5  ;;  %v7693_v8 = vld [vmem:[%s11937_s1 + $0x44] ss:$16 sps:$4 sm:$0xff]   ;;  %v7697_v10 = vld [vmem:[%s11937_s1 + $0x40] ss:$16 sps:$4 sm:$0xff]   ;;  %v9279_v5 = vld [vmem:[%s11938_s0 + $0x8] ss:$100 sps:$4 sm:$0xff]  }
   0x6   :  { %v7695_v9 = vld [vmem:[%s11937_s1 + $0x244] ss:$16 sps:$4 sm:$0xff]   ;;  %v7698_v11 = vld [vmem:[%s11937_s1 + $0x240] ss:$16 sps:$4 sm:$0xff]  }
   0x7   :  { %4905 = vmatpush1.bf16.msra.mxu1 %v7691_v6  ;;  %v7699_v12 = vld [vmem:[%s11937_s1 + $0x64] ss:$16 sps:$4 sm:$0xff]   ;;  %v7703_v14 = vld [vmem:[%s11937_s1 + $0x60] ss:$16 sps:$4 sm:$0xff]  }
   0x8   :  { %4948 = vmatpush1.bf16.msra.mxu0 %v7692_v7  ;;  %4906 = vmatprep.subr.bf16.mxu1 %v7693_v8  ;;  %v7701_v13 = vld [vmem:[%s11937_s1 + $0x264] ss:$16 sps:$4 sm:$0xff]   ;;  %v7704_v15 = vld [vmem:[%s11937_s1 + $0x260] ss:$16 sps:$4 sm:$0xff]   ;;  %v7786_v7 = vld [vmem:[%s11937_s1 + $0x8] ss:$16 sps:$4 sm:$0xff]  }
   0x9   :  { %4949 = vmatprep.subr.bf16.mxu0 %v7695_v9  ;;  %v7705_v16 = vld [vmem:[%s11937_s1 + $0x84] ss:$16 sps:$4 sm:$0xff]   ;;  %v7709_v18 = vld [vmem:[%s11937_s1 + $0x80] ss:$16 sps:$4 sm:$0xff]   ;;  %v7794_v9 = vld [vmem:[%s11937_s1 + $0x2c] ss:$16 sps:$4 sm:$0xff]  }
   0xa   :  { %v7707_v17 = vld [vmem:[%s11937_s1 + $0x284] ss:$16 sps:$4 sm:$0xff]   ;;  %v7710_v19 = vld [vmem:[%s11937_s1 + $0x280] ss:$16 sps:$4 sm:$0xff]  }
   0xb   :  { %4907 = vmatpush1.bf16.msra.mxu1 %v7697_v10  ;;  %v7711_v20 = vld [vmem:[%s11937_s1 + $0xa4] ss:$16 sps:$4 sm:$0xff]   ;;  %v7715_v22 = vld [vmem:[%s11937_s1 + $0xa0] ss:$16 sps:$4 sm:$0xff]  }
   0xc   :  { %4950 = vmatpush1.bf16.msra.mxu0 %v7698_v11  ;;  %4908 = vmatprep.subr.bf16.mxu1 %v7699_v12  ;;  %v7713_v21 = vld [vmem:[%s11937_s1 + $0x2a4] ss:$16 sps:$4 sm:$0xff]   ;;  %v7716_v23 = vld [vmem:[%s11937_s1 + $0x2a0] ss:$16 sps:$4 sm:$0xff]   ;;  %v7792_v11 = vld [vmem:[%s11937_s1 + $0x28] ss:$16 sps:$4 sm:$0xff]  }
   0xd   :  { %4951 = vmatprep.subr.bf16.mxu0 %v7701_v13  ;;  %v7717_v24 = vld [vmem:[%s11937_s1 + $0xc4] ss:$16 sps:$4 sm:$0xff]   ;;  %v7721_v26 = vld [vmem:[%s11937_s1 + $0xc0] ss:$16 sps:$4 sm:$0xff]   ;;  %v7800_v13 = vld [vmem:[%s11937_s1 + $0x4c] ss:$16 sps:$4 sm:$0xff]  }
   0xe   :  { %v7719_v25 = vld [vmem:[%s11937_s1 + $0x2c4] ss:$16 sps:$4 sm:$0xff]   ;;  %v7722_v27 = vld [vmem:[%s11937_s1 + $0x2c0] ss:$16 sps:$4 sm:$0xff]  }
   0xf   :  { %4909 = vmatpush1.bf16.msra.mxu1 %v7703_v14  ;;  %v7723_v28 = vld [vmem:[%s11937_s1 + $0xe4] ss:$16 sps:$4 sm:$0xff]   ;;  %v7727_v30 = vld [vmem:[%s11937_s1 + $0xe0] ss:$16 sps:$4 sm:$0xff]  }
  0x10   :  { %4952 = vmatpush1.bf16.msra.mxu0 %v7704_v15  ;;  %4910 = vmatprep.subr.bf16.mxu1 %v7705_v16  ;;  %v7725_v29 = vld [vmem:[%s11937_s1 + $0x2e4] ss:$16 sps:$4 sm:$0xff]   ;;  %v7728_v31 = vld [vmem:[%s11937_s1 + $0x2e0] ss:$16 sps:$4 sm:$0xff]   ;;  %v7798_v15 = vld [vmem:[%s11937_s1 + $0x48] ss:$16 sps:$4 sm:$0xff]  }
  0x11   :  { %4953 = vmatprep.subr.bf16.mxu0 %v7707_v17  ;;  %v7729_v32 = vld [vmem:[%s11937_s1 + $0x104] ss:$16 sps:$4 sm:$0xff]   ;;  %v7733_v34 = vld [vmem:[%s11937_s1 + $0x100] ss:$16 sps:$4 sm:$0xff]   ;;  %v7806_v17 = vld [vmem:[%s11937_s1 + $0x6c] ss:$16 sps:$4 sm:$0xff]  }
  0x12   :  { %v7731_v33 = vld [vmem:[%s11937_s1 + $0x304] ss:$16 sps:$4 sm:$0xff]   ;;  %v7734_v35 = vld [vmem:[%s11937_s1 + $0x300] ss:$16 sps:$4 sm:$0xff]  }
  0x13   :  { %4911 = vmatpush1.bf16.msra.mxu1 %v7709_v18  ;;  %v7735_v36 = vld [vmem:[%s11937_s1 + $0x124] ss:$16 sps:$4 sm:$0xff]   ;;  %v7739_v38 = vld [vmem:[%s11937_s1 + $0x120] ss:$16 sps:$4 sm:$0xff]  }
  0x14   :  { %4954 = vmatpush1.bf16.msra.mxu0 %v7710_v19  ;;  %4912 = vmatprep.subr.bf16.mxu1 %v7711_v20  ;;  %v7737_v37 = vld [vmem:[%s11937_s1 + $0x324] ss:$16 sps:$4 sm:$0xff]   ;;  %v7740_v39 = vld [vmem:[%s11937_s1 + $0x320] ss:$16 sps:$4 sm:$0xff]   ;;  %v7804_v19 = vld [vmem:[%s11937_s1 + $0x68] ss:$16 sps:$4 sm:$0xff]  }
  0x15   :  { %4955 = vmatprep.subr.bf16.mxu0 %v7713_v21  ;;  %v7741_v40 = vld [vmem:[%s11937_s1 + $0x144] ss:$16 sps:$4 sm:$0xff]   ;;  %v7745_v42 = vld [vmem:[%s11937_s1 + $0x140] ss:$16 sps:$4 sm:$0xff]   ;;  %v7812_v21 = vld [vmem:[%s11937_s1 + $0x8c] ss:$16 sps:$4 sm:$0xff]  }
  0x16   :  { %v7743_v41 = vld [vmem:[%s11937_s1 + $0x344] ss:$16 sps:$4 sm:$0xff]   ;;  %v7746_v43 = vld [vmem:[%s11937_s1 + $0x340] ss:$16 sps:$4 sm:$0xff]  }
  0x17   :  { %4913 = vmatpush1.bf16.msra.mxu1 %v7715_v22  ;;  %v7747_v44 = vld [vmem:[%s11937_s1 + $0x164] ss:$16 sps:$4 sm:$0xff]   ;;  %v7751_v46 = vld [vmem:[%s11937_s1 + $0x160] ss:$16 sps:$4 sm:$0xff]  }
  0x18   :  { %4956 = vmatpush1.bf16.msra.mxu0 %v7716_v23  ;;  %4914 = vmatprep.subr.bf16.mxu1 %v7717_v24  ;;  %v7749_v45 = vld [vmem:[%s11937_s1 + $0x364] ss:$16 sps:$4 sm:$0xff]   ;;  %v7752_v47 = vld [vmem:[%s11937_s1 + $0x360] ss:$16 sps:$4 sm:$0xff]   ;;  %v7810_v23 = vld [vmem:[%s11937_s1 + $0x88] ss:$16 sps:$4 sm:$0xff]  }
  0x19   :  { %4957 = vmatprep.subr.bf16.mxu0 %v7719_v25  ;;  %v7753_v48 = vld [vmem:[%s11937_s1 + $0x184] ss:$16 sps:$4 sm:$0xff]   ;;  %v9220_v51 = vld [vmem:[%s11938_s0 + $0xc] ss:$100 sps:$4 sm:$0xff]  }
  0x1a   :  { %v7779_v49 = vld [vmem:[%s11938_s0 + $0x4] ss:$100 sps:$4 sm:$0xff]   ;;  %v7757_v52 = vld [vmem:[%s11937_s1 + $0x180] ss:$16 sps:$4 sm:$0xff]   ;;  %4977 = vmatprep.mubr.bf16.mxu0 %v9220_v51  ;;  %v7818_v25 = vld [vmem:[%s11937_s1 + $0xac] ss:$16 sps:$4 sm:$0xff]  }
  0x1b   :  { %4915 = vmatpush1.bf16.msra.mxu1 %v7721_v26  ;;  %v7755_v50 = vld [vmem:[%s11937_s1 + $0x384] ss:$16 sps:$4 sm:$0xff]   ;;  %4934 = vmatprep.mubr.bf16.mxu1 %v7779_v49  ;;  %v7758_v53 = vld [vmem:[%s11937_s1 + $0x380] ss:$16 sps:$4 sm:$0xff]  }
  0x1c   :  { %4958 = vmatpush1.bf16.msra.mxu0 %v7722_v27  ;;  %4916 = vmatprep.subr.bf16.mxu1 %v7723_v28  ;;  %v7759_v54 = vld [vmem:[%s11937_s1 + $0x1a4] ss:$16 sps:$4 sm:$0xff]   ;;  %v7763_v56 = vld [vmem:[%s11937_s1 + $0x1a0] ss:$16 sps:$4 sm:$0xff]   ;;  %v7816_v27 = vld [vmem:[%s11937_s1 + $0xa8] ss:$16 sps:$4 sm:$0xff]  }
  0x1d   :  { %4959 = vmatprep.subr.bf16.mxu0 %v7725_v29  ;;  %v7761_v55 = vld [vmem:[%s11937_s1 + $0x3a4] ss:$16 sps:$4 sm:$0xff]   ;;  %v7764_v57 = vld [vmem:[%s11937_s1 + $0x3a0] ss:$16 sps:$4 sm:$0xff]   ;;  %v7824_v29 = vld [vmem:[%s11937_s1 + $0xcc] ss:$16 sps:$4 sm:$0xff]  }
  0x1e   :  { %v7765_v58 = vld [vmem:[%s11937_s1 + $0x1c4] ss:$16 sps:$4 sm:$0xff]   ;;  %v7769_v60 = vld [vmem:[%s11937_s1 + $0x1c0] ss:$16 sps:$4 sm:$0xff]  }
  0x1f   :  { %4917 = vmatpush1.bf16.msra.mxu1 %v7727_v30  ;;  %v7767_v59 = vld [vmem:[%s11937_s1 + $0x3c4] ss:$16 sps:$4 sm:$0xff]   ;;  %v7770_v61 = vld [vmem:[%s11937_s1 + $0x3c0] ss:$16 sps:$4 sm:$0xff]  }
  0x20   :  { %4960 = vmatpush1.bf16.msra.mxu0 %v7728_v31  ;;  %4918 = vmatprep.subr.bf16.mxu1 %v7729_v32  ;;  %v7771_v62 = vld [vmem:[%s11937_s1 + $0x1e4] ss:$16 sps:$4 sm:$0xff]   ;;  %v7775_v0 = vld [vmem:[%s11937_s1 + $0x1e0] ss:$16 sps:$4 sm:$0xff]   ;;  %v7822_v31 = vld [vmem:[%s11937_s1 + $0xc8] ss:$16 sps:$4 sm:$0xff]  }
  0x21   :  { %4961 = vmatprep.subr.bf16.mxu0 %v7731_v33  ;;  %v7773_v63 = vld [vmem:[%s11937_s1 + $0x3e4] ss:$16 sps:$4 sm:$0xff]   ;;  %v7776_v1 = vld [vmem:[%s11937_s1 + $0x3e0] ss:$16 sps:$4 sm:$0xff]   ;;  %v7830_v33 = vld [vmem:[%s11937_s1 + $0xec] ss:$16 sps:$4 sm:$0xff]  }
  0x22   :  { %v7785_v2 = vld [vmem:[%s11937_s1 + $0x404] ss:$16 sps:$4 sm:$0xff]   ;;  %v7783_v6 = vld [vmem:[%s11937_s1 + $0x400] ss:$16 sps:$4 sm:$0xff]  }
  0x23   :  { %4919 = vmatpush1.bf16.msra.mxu1 %v7733_v34  ;;  %v9274_v4 = vld [vmem:[%s11938_s0] ss:$100 sps:$4 sm:$0xff]   ;;  %v9370_v34 = vld [vmem:[%s11938_s0 + $0x14] ss:$100 sps:$4 sm:$0xff]  }
  0x24   :  { %4962 = vmatpush1.bf16.msra.mxu0 %v7734_v35  ;;  %4920 = vmatprep.subr.bf16.mxu1 %v7735_v36  ;;  %v7791_v8 = vld [vmem:[%s11937_s1 + $0x424] ss:$16 sps:$4 sm:$0xff]   ;;  %v7789_v10 = vld [vmem:[%s11937_s1 + $0x420] ss:$16 sps:$4 sm:$0xff]   ;;  %v7828_v36 = vld [vmem:[%s11937_s1 + $0xe8] ss:$16 sps:$4 sm:$0xff]  }
  0x25   :  { %4963 = vmatprep.subr.bf16.mxu0 %v7737_v37  ;;  %v7797_v12 = vld [vmem:[%s11937_s1 + $0x444] ss:$16 sps:$4 sm:$0xff]   ;;  %v7795_v14 = vld [vmem:[%s11937_s1 + $0x440] ss:$16 sps:$4 sm:$0xff]  }
  0x26   :  { %v7803_v16 = vld [vmem:[%s11937_s1 + $0x464] ss:$16 sps:$4 sm:$0xff]   ;;  %v7801_v18 = vld [vmem:[%s11937_s1 + $0x460] ss:$16 sps:$4 sm:$0xff]  }
  0x27   :  { %4921 = vmatpush1.bf16.msra.mxu1 %v7739_v38  ;;  %v7809_v20 = vld [vmem:[%s11937_s1 + $0x484] ss:$16 sps:$4 sm:$0xff]   ;;  %v7807_v22 = vld [vmem:[%s11937_s1 + $0x480] ss:$16 sps:$4 sm:$0xff]   ;;  %v7836_v38 = vld [vmem:[%s11937_s1 + $0x10c] ss:$16 sps:$4 sm:$0xff]  }
  0x28   :  { %4964 = vmatpush1.bf16.msra.mxu0 %v7740_v39  ;;  %4922 = vmatprep.subr.bf16.mxu1 %v7741_v40  ;;  %v7815_v24 = vld [vmem:[%s11937_s1 + $0x4a4] ss:$16 sps:$4 sm:$0xff]   ;;  %v7813_v26 = vld [vmem:[%s11937_s1 + $0x4a0] ss:$16 sps:$4 sm:$0xff]   ;;  %v7834_v40 = vld [vmem:[%s11937_s1 + $0x108] ss:$16 sps:$4 sm:$0xff]  }
  0x29   :  { %4965 = vmatprep.subr.bf16.mxu0 %v7743_v41  ;;  %v7821_v28 = vld [vmem:[%s11937_s1 + $0x4c4] ss:$16 sps:$4 sm:$0xff]   ;;  %v7819_v30 = vld [vmem:[%s11937_s1 + $0x4c0] ss:$16 sps:$4 sm:$0xff]  }
  0x2a   :  { %v7827_v32 = vld [vmem:[%s11937_s1 + $0x4e4] ss:$16 sps:$4 sm:$0xff]   ;;  %v7825_v35 = vld [vmem:[%s11937_s1 + $0x4e0] ss:$16 sps:$4 sm:$0xff]  }
  0x2b   :  { %4923 = vmatpush1.bf16.msra.mxu1 %v7745_v42  ;;  %v7833_v37 = vld [vmem:[%s11937_s1 + $0x504] ss:$16 sps:$4 sm:$0xff]   ;;  %v7831_v39 = vld [vmem:[%s11937_s1 + $0x500] ss:$16 sps:$4 sm:$0xff]   ;;  %v7842_v42 = vld [vmem:[%s11937_s1 + $0x12c] ss:$16 sps:$4 sm:$0xff]  }
  0x2c   :  { %4966 = vmatpush1.bf16.msra.mxu0 %v7746_v43  ;;  %4924 = vmatprep.subr.bf16.mxu1 %v7747_v44  ;;  %v7839_v41 = vld [vmem:[%s11937_s1 + $0x524] ss:$16 sps:$4 sm:$0xff]   ;;  %v7837_v43 = vld [vmem:[%s11937_s1 + $0x520] ss:$16 sps:$4 sm:$0xff]   ;;  %v7840_v44 = vld [vmem:[%s11937_s1 + $0x128] ss:$16 sps:$4 sm:$0xff]  }
  0x2d   :  { %4967 = vmatprep.subr.bf16.mxu0 %v7749_v45  ;;  %v7845_v45 = vld [vmem:[%s11937_s1 + $0x544] ss:$16 sps:$4 sm:$0xff]  }
  0x2f   :  { %4925 = vmatpush1.bf16.msra.mxu1 %v7751_v46  ;;  %v7848_v46 = vld [vmem:[%s11937_s1 + $0x14c] ss:$16 sps:$4 sm:$0xff]  }
  0x30   :  { %4968 = vmatpush1.bf16.msra.mxu0 %v7752_v47  ;;  %4926 = vmatprep.subr.bf16.mxu1 %v7753_v48  ;;  %v7843_v47 = vld [vmem:[%s11937_s1 + $0x540] ss:$16 sps:$4 sm:$0xff]   ;;  %v7846_v48 = vld [vmem:[%s11937_s1 + $0x148] ss:$16 sps:$4 sm:$0xff]  }
  0x31   :  { %4969 = vmatprep.subr.bf16.mxu0 %v7755_v50  ;;  %v7854_v50 = vld [vmem:[%s11937_s1 + $0x16c] ss:$16 sps:$4 sm:$0xff]  }
  0x33   :  { %4927 = vmatpush1.bf16.msra.mxu1 %v7757_v52  ;;  %v7849_v52 = vld [vmem:[%s11937_s1 + $0x560] ss:$16 sps:$4 sm:$0xff]  }
  0x34   :  { %4970 = vmatpush1.bf16.msra.mxu0 %v7758_v53  ;;  %4928 = vmatprep.subr.bf16.mxu1 %v7759_v54  ;;  %v7852_v53 = vld [vmem:[%s11937_s1 + $0x168] ss:$16 sps:$4 sm:$0xff]   ;;  %v7857_v54 = vld [vmem:[%s11937_s1 + $0x584] ss:$16 sps:$4 sm:$0xff]  }
  0x35   :  { %4971 = vmatprep.subr.bf16.mxu0 %v7761_v55  ;;  %v7860_v55 = vld [vmem:[%s11937_s1 + $0x18c] ss:$16 sps:$4 sm:$0xff]  }
  0x37   :  { %4929 = vmatpush1.bf16.msra.mxu1 %v7763_v56  ;;  %v7855_v56 = vld [vmem:[%s11937_s1 + $0x580] ss:$16 sps:$4 sm:$0xff]  }
  0x38   :  { %4972 = vmatpush1.bf16.msra.mxu0 %v7764_v57  ;;  %4930 = vmatprep.subr.bf16.mxu1 %v7765_v58  ;;  %v7858_v57 = vld [vmem:[%s11937_s1 + $0x188] ss:$16 sps:$4 sm:$0xff]   ;;  %v7863_v58 = vld [vmem:[%s11937_s1 + $0x5a4] ss:$16 sps:$4 sm:$0xff]  }
  0x39   :  { %4973 = vmatprep.subr.bf16.mxu0 %v7767_v59  ;;  %v7866_v59 = vld [vmem:[%s11937_s1 + $0x1ac] ss:$16 sps:$4 sm:$0xff]  }
  0x3b   :  { %4931 = vmatpush1.bf16.msra.mxu1 %v7769_v60  ;;  %v7861_v60 = vld [vmem:[%s11937_s1 + $0x5a0] ss:$16 sps:$4 sm:$0xff]  }
  0x3c   :  { %4974 = vmatpush1.bf16.msra.mxu0 %v7770_v61  ;;  %4932 = vmatprep.subr.bf16.mxu1 %v7771_v62  ;;  %v7864_v61 = vld [vmem:[%s11937_s1 + $0x1a8] ss:$16 sps:$4 sm:$0xff]   ;;  %v7869_v62 = vld [vmem:[%s11937_s1 + $0x5c4] ss:$16 sps:$4 sm:$0xff]  }
  0x3d   :  { %4975 = vmatprep.subr.bf16.mxu0 %v7773_v63  ;;  %v7872_v63 = vld [vmem:[%s11937_s1 + $0x1cc] ss:$16 sps:$4 sm:$0xff]  }
  0x3f   :  { %4933 = vmatpush1.bf16.msra.mxu1 %v7775_v0  ;;  %v7867_v0 = vld [vmem:[%s11937_s1 + $0x5c0] ss:$16 sps:$4 sm:$0xff]  }
  0x40   :  { %4976 = vmatpush1.bf16.msra.mxu0 %v7776_v1  ;;  %5461 = vmatprep.subr.bf16.mxu1 %v7788_v3  ;;  %v7870_v1 = vld [vmem:[%s11937_s1 + $0x1c8] ss:$16 sps:$4 sm:$0xff]   ;;  %v7878_v3 = vld [vmem:[%s11937_s1 + $0x1ec] ss:$16 sps:$4 sm:$0xff]  }
  0x41   :  { %4988 = vmatprep.subr.bf16.mxu0 %v7785_v2  ;;  %v7875_v2 = vld [vmem:[%s11937_s1 + $0x5e4] ss:$16 sps:$4 sm:$0xff]  }
  0x42   :  { %4935 = vmatmul.mubr.bf16.vlgmr.msra.gmra.mrb[0].mxu1 %v9274_v4 }
  0x43   :  { %4978 = vmatmul.mubr.bf16.vlgmr.msra.gmra.mrb[0].mxu0 %v9279_v5  ;;  %5462 = vmatpush1.bf16.msra.mxu1 %v7786_v7  ;;  %v7876_v7 = vld [vmem:[%s11937_s1 + $0x1e8] ss:$16 sps:$4 sm:$0xff]  }
  0x44   :  { %4989 = vmatpush1.bf16.msra.mxu0 %v7783_v6  ;;  %5463 = vmatprep.subr.bf16.mxu1 %v7794_v9  ;;  %v7873_v6 = vld [vmem:[%s11937_s1 + $0x5e0] ss:$16 sps:$4 sm:$0xff]   ;;  %v7887_v9 = vld [vmem:[%s11937_s1 + $0x20c] ss:$16 sps:$4 sm:$0xff]  }
  0x45   :  { %4990 = vmatprep.subr.bf16.mxu0 %v7791_v8  ;;  %5493 = vmatprep.mubr.bf16.mxu1 %v7779_v49  ;;  %v7851_v49 = vld [vmem:[%s11937_s1 + $0x564] ss:$16 sps:$4 sm:$0xff]  }
  0x46   :  { %5020 = vmatprep.mubr.bf16.mxu0 %v9370_v34  ;;  %v7884_v8 = vld [vmem:[%s11937_s1 + $0x604] ss:$16 sps:$4 sm:$0xff]  }
  0x47   :  { %5464 = vmatpush1.bf16.msra.mxu1 %v7792_v11  ;;  %v7882_v11 = vld [vmem:[%s11937_s1 + $0x600] ss:$16 sps:$4 sm:$0xff]  }
  0x48   :  { %4991 = vmatpush1.bf16.msra.mxu0 %v7789_v10  ;;  %5465 = vmatprep.subr.bf16.mxu1 %v7800_v13  ;;  %v9484_v10 = vld [vmem:[%s11938_s0 + $0x10] ss:$100 sps:$4 sm:$0xff]  }
  0x49   :  { %4992 = vmatprep.subr.bf16.mxu0 %v7797_v12  ;;  %v7885_v12 = vld [vmem:[%s11937_s1 + $0x208] ss:$16 sps:$4 sm:$0xff]   ;;  %v7890_v13 = vld [vmem:[%s11937_s1 + $0x624] ss:$16 sps:$4 sm:$0xff]  }
  0x4b   :  { %5466 = vmatpush1.bf16.msra.mxu1 %v7798_v15  ;;  %v7888_v15 = vld [vmem:[%s11937_s1 + $0x620] ss:$16 sps:$4 sm:$0xff]  }
  0x4c   :  { %4993 = vmatpush1.bf16.msra.mxu0 %v7795_v14  ;;  %5467 = vmatprep.subr.bf16.mxu1 %v7806_v17  ;;  %v7893_v14 = vld [vmem:[%s11937_s1 + $0x22c] ss:$16 sps:$4 sm:$0xff]   ;;  %v7896_v17 = vld [vmem:[%s11937_s1 + $0x644] ss:$16 sps:$4 sm:$0xff]  }
  0x4d   :  { %4994 = vmatprep.subr.bf16.mxu0 %v7803_v16  ;;  %v7891_v16 = vld [vmem:[%s11937_s1 + $0x228] ss:$16 sps:$4 sm:$0xff]  }
  0x4f   :  { %5468 = vmatpush1.bf16.msra.mxu1 %v7804_v19  ;;  %v7894_v19 = vld [vmem:[%s11937_s1 + $0x640] ss:$16 sps:$4 sm:$0xff]  }
  0x50   :  { %4995 = vmatpush1.bf16.msra.mxu0 %v7801_v18  ;;  %5469 = vmatprep.subr.bf16.mxu1 %v7812_v21  ;;  %v7899_v18 = vld [vmem:[%s11937_s1 + $0x24c] ss:$16 sps:$4 sm:$0xff]   ;;  %v7902_v21 = vld [vmem:[%s11937_s1 + $0x664] ss:$16 sps:$4 sm:$0xff]  }
  0x51   :  { %4996 = vmatprep.subr.bf16.mxu0 %v7809_v20  ;;  %v7897_v20 = vld [vmem:[%s11937_s1 + $0x248] ss:$16 sps:$4 sm:$0xff]  }
  0x53   :  { %5470 = vmatpush1.bf16.msra.mxu1 %v7810_v23  ;;  %v7903_v23 = vld [vmem:[%s11937_s1 + $0x268] ss:$16 sps:$4 sm:$0xff]  }
  0x54   :  { %4997 = vmatpush1.bf16.msra.mxu0 %v7807_v22  ;;  %5471 = vmatprep.subr.bf16.mxu1 %v7818_v25  ;;  %v7900_v22 = vld [vmem:[%s11937_s1 + $0x660] ss:$16 sps:$4 sm:$0xff]   ;;  %v7911_v25 = vld [vmem:[%s11937_s1 + $0x28c] ss:$16 sps:$4 sm:$0xff]  }
  0x55   :  { %4998 = vmatprep.subr.bf16.mxu0 %v7815_v24  ;;  %v7908_v24 = vld [vmem:[%s11937_s1 + $0x684] ss:$16 sps:$4 sm:$0xff]  }
  0x57   :  { %5472 = vmatpush1.bf16.msra.mxu1 %v7816_v27  ;;  %v7909_v27 = vld [vmem:[%s11937_s1 + $0x288] ss:$16 sps:$4 sm:$0xff]  }
  0x58   :  { %4999 = vmatpush1.bf16.msra.mxu0 %v7813_v26  ;;  %5473 = vmatprep.subr.bf16.mxu1 %v7824_v29  ;;  %v7906_v26 = vld [vmem:[%s11937_s1 + $0x680] ss:$16 sps:$4 sm:$0xff]   ;;  %v7917_v29 = vld [vmem:[%s11937_s1 + $0x2ac] ss:$16 sps:$4 sm:$0xff]  }
  0x59   :  { %5000 = vmatprep.subr.bf16.mxu0 %v7821_v28  ;;  %v7914_v28 = vld [vmem:[%s11937_s1 + $0x6a4] ss:$16 sps:$4 sm:$0xff]  }
  0x5b   :  { %5474 = vmatpush1.bf16.msra.mxu1 %v7822_v31  ;;  %v7915_v31 = vld [vmem:[%s11937_s1 + $0x2a8] ss:$16 sps:$4 sm:$0xff]  }
  0x5c   :  { %5001 = vmatpush1.bf16.msra.mxu0 %v7819_v30  ;;  %5475 = vmatprep.subr.bf16.mxu1 %v7830_v33  ;;  %v7912_v30 = vld [vmem:[%s11937_s1 + $0x6a0] ss:$16 sps:$4 sm:$0xff]   ;;  %v7923_v33 = vld [vmem:[%s11937_s1 + $0x2cc] ss:$16 sps:$4 sm:$0xff]  }
  0x5d   :  { %5002 = vmatprep.subr.bf16.mxu0 %v7827_v32  ;;  %v7920_v32 = vld [vmem:[%s11937_s1 + $0x6c4] ss:$16 sps:$4 sm:$0xff]  }
  0x5f   :  { %5476 = vmatpush1.bf16.msra.mxu1 %v7828_v36  ;;  %v7921_v36 = vld [vmem:[%s11937_s1 + $0x2c8] ss:$16 sps:$4 sm:$0xff]  }
  0x60   :  { %5003 = vmatpush1.bf16.msra.mxu0 %v7825_v35  ;;  %5477 = vmatprep.subr.bf16.mxu1 %v7836_v38  ;;  %v7918_v35 = vld [vmem:[%s11937_s1 + $0x6c0] ss:$16 sps:$4 sm:$0xff]   ;;  %v7929_v38 = vld [vmem:[%s11937_s1 + $0x2ec] ss:$16 sps:$4 sm:$0xff]  }
  0x61   :  { %5004 = vmatprep.subr.bf16.mxu0 %v7833_v37  ;;  %v7926_v37 = vld [vmem:[%s11937_s1 + $0x6e4] ss:$16 sps:$4 sm:$0xff]  }
  0x63   :  { %5478 = vmatpush1.bf16.msra.mxu1 %v7834_v40  ;;  %v7927_v40 = vld [vmem:[%s11937_s1 + $0x2e8] ss:$16 sps:$4 sm:$0xff]  }
  0x64   :  { %5005 = vmatpush1.bf16.msra.mxu0 %v7831_v39  ;;  %5479 = vmatprep.subr.bf16.mxu1 %v7842_v42  ;;  %v7924_v39 = vld [vmem:[%s11937_s1 + $0x6e0] ss:$16 sps:$4 sm:$0xff]   ;;  %v7935_v42 = vld [vmem:[%s11937_s1 + $0x30c] ss:$16 sps:$4 sm:$0xff]  }
  0x65   :  { %5006 = vmatprep.subr.bf16.mxu0 %v7839_v41  ;;  %v7932_v41 = vld [vmem:[%s11937_s1 + $0x704] ss:$16 sps:$4 sm:$0xff]  }
  0x67   :  { %5480 = vmatpush1.bf16.msra.mxu1 %v7840_v44  ;;  %v7933_v44 = vld [vmem:[%s11937_s1 + $0x308] ss:$16 sps:$4 sm:$0xff]  }
  0x68   :  { %5007 = vmatpush1.bf16.msra.mxu0 %v7837_v43  ;;  %5481 = vmatprep.subr.bf16.mxu1 %v7848_v46  ;;  %v7930_v43 = vld [vmem:[%s11937_s1 + $0x700] ss:$16 sps:$4 sm:$0xff]   ;;  %v7941_v46 = vld [vmem:[%s11937_s1 + $0x32c] ss:$16 sps:$4 sm:$0xff]  }
  0x69   :  { %5008 = vmatprep.subr.bf16.mxu0 %v7845_v45  ;;  %v7938_v45 = vld [vmem:[%s11937_s1 + $0x724] ss:$16 sps:$4 sm:$0xff]  }
  0x6b   :  { %5482 = vmatpush1.bf16.msra.mxu1 %v7846_v48  ;;  %v7939_v48 = vld [vmem:[%s11937_s1 + $0x328] ss:$16 sps:$4 sm:$0xff]  }
  0x6c   :  { %5009 = vmatpush1.bf16.msra.mxu0 %v7843_v47  ;;  %5483 = vmatprep.subr.bf16.mxu1 %v7854_v50  ;;  %v7936_v47 = vld [vmem:[%s11937_s1 + $0x720] ss:$16 sps:$4 sm:$0xff]   ;;  %v7947_v50 = vld [vmem:[%s11937_s1 + $0x34c] ss:$16 sps:$4 sm:$0xff]  }
  0x6d   :  { %5010 = vmatprep.subr.bf16.mxu0 %v7851_v49  ;;  %v7944_v49 = vld [vmem:[%s11937_s1 + $0x744] ss:$16 sps:$4 sm:$0xff]  }
  0x6f   :  { %5484 = vmatpush1.bf16.msra.mxu1 %v7852_v53  ;;  %v7945_v53 = vld [vmem:[%s11937_s1 + $0x348] ss:$16 sps:$4 sm:$0xff]  }
  0x70   :  { %5011 = vmatpush1.bf16.msra.mxu0 %v7849_v52  ;;  %5485 = vmatprep.subr.bf16.mxu1 %v7860_v55  ;;  %v7942_v52 = vld [vmem:[%s11937_s1 + $0x740] ss:$16 sps:$4 sm:$0xff]   ;;  %v7953_v55 = vld [vmem:[%s11937_s1 + $0x36c] ss:$16 sps:$4 sm:$0xff]  }
  0x71   :  { %5012 = vmatprep.subr.bf16.mxu0 %v7857_v54  ;;  %v7950_v54 = vld [vmem:[%s11937_s1 + $0x764] ss:$16 sps:$4 sm:$0xff]  }
  0x73   :  { %5486 = vmatpush1.bf16.msra.mxu1 %v7858_v57  ;;  %v7951_v57 = vld [vmem:[%s11937_s1 + $0x368] ss:$16 sps:$4 sm:$0xff]  }
  0x74   :  { %5013 = vmatpush1.bf16.msra.mxu0 %v7855_v56  ;;  %5487 = vmatprep.subr.bf16.mxu1 %v7866_v59  ;;  %v7948_v56 = vld [vmem:[%s11937_s1 + $0x760] ss:$16 sps:$4 sm:$0xff]   ;;  %v7959_v59 = vld [vmem:[%s11937_s1 + $0x38c] ss:$16 sps:$4 sm:$0xff]  }
  0x75   :  { %5014 = vmatprep.subr.bf16.mxu0 %v7863_v58  ;;  %v7956_v58 = vld [vmem:[%s11937_s1 + $0x784] ss:$16 sps:$4 sm:$0xff]  }
  0x77   :  { %5488 = vmatpush1.bf16.msra.mxu1 %v7864_v61  ;;  %v7957_v61 = vld [vmem:[%s11937_s1 + $0x388] ss:$16 sps:$4 sm:$0xff]  }
  0x78   :  { %5015 = vmatpush1.bf16.msra.mxu0 %v7861_v60  ;;  %5489 = vmatprep.subr.bf16.mxu1 %v7872_v63  ;;  %v7954_v60 = vld [vmem:[%s11937_s1 + $0x780] ss:$16 sps:$4 sm:$0xff]   ;;  %v7965_v63 = vld [vmem:[%s11937_s1 + $0x3ac] ss:$16 sps:$4 sm:$0xff]  }
  0x79   :  { %5016 = vmatprep.subr.bf16.mxu0 %v7869_v62  ;;  %v7962_v62 = vld [vmem:[%s11937_s1 + $0x7a4] ss:$16 sps:$4 sm:$0xff]  }
  0x7b   :  { %5490 = vmatpush1.bf16.msra.mxu1 %v7870_v1  ;;  %v7963_v1 = vld [vmem:[%s11937_s1 + $0x3a8] ss:$16 sps:$4 sm:$0xff]  }
  0x7c   :  { %5017 = vmatpush1.bf16.msra.mxu0 %v7867_v0  ;;  %5491 = vmatprep.subr.bf16.mxu1 %v7878_v3  ;;  %v7960_v0 = vld [vmem:[%s11937_s1 + $0x7a0] ss:$16 sps:$4 sm:$0xff]   ;;  %v7971_v3 = vld [vmem:[%s11937_s1 + $0x3cc] ss:$16 sps:$4 sm:$0xff]  }
  0x7d   :  { %5018 = vmatprep.subr.bf16.mxu0 %v7875_v2  ;;  %v7968_v2 = vld [vmem:[%s11937_s1 + $0x7c4] ss:$16 sps:$4 sm:$0xff]  }
  0x7f   :  { %5492 = vmatpush1.bf16.msra.mxu1 %v7876_v7  ;;  %v7969_v7 = vld [vmem:[%s11937_s1 + $0x3c8] ss:$16 sps:$4 sm:$0xff]  }
  0x80   :  { %5019 = vmatpush1.bf16.msra.mxu0 %v7873_v6  ;;  %5504 = vmatprep.subr.bf16.mxu1 %v7887_v9  ;;  %v7966_v6 = vld [vmem:[%s11937_s1 + $0x7c0] ss:$16 sps:$4 sm:$0xff]   ;;  %v7977_v9 = vld [vmem:[%s11937_s1 + $0x3ec] ss:$16 sps:$4 sm:$0xff]  }
  0x81   :  { %5031 = vmatprep.subr.bf16.mxu0 %v7884_v8  ;;  %v7974_v8 = vld [vmem:[%s11937_s1 + $0x7e4] ss:$16 sps:$4 sm:$0xff]  }
  0x82   :  { %5494 = vmatmul.mubr.bf16.vlgmr.msra.gmra.mrb[4].mxu1 %v9274_v4  ;;  %v9515_v4 = vld [vmem:[%s11938_s0 + $0x1c] ss:$100 sps:$4 sm:$0xff]  }
  0x83   :  { %5021 = vmatmul.mubr.bf16.vlgmr.msra.gmra.mrb[0].mxu0 %v9484_v10  ;;  %5505 = vmatpush1.bf16.msra.mxu1 %v7885_v12  ;;  %v7975_v12 = vld [vmem:[%s11937_s1 + $0x3e8] ss:$16 sps:$4 sm:$0xff]  }
  0x84   :  { %5032 = vmatpush1.bf16.msra.mxu0 %v7882_v11  ;;  %5506 = vmatprep.subr.bf16.mxu1 %v7893_v14  ;;  %v7972_v11 = vld [vmem:[%s11937_s1 + $0x7e0] ss:$16 sps:$4 sm:$0xff]   ;;  %v7986_v14 = vld [vmem:[%s11937_s1 + $0x40c] ss:$16 sps:$4 sm:$0xff]  }
  0x85   :  { %5033 = vmatprep.subr.bf16.mxu0 %v7890_v13  ;;  %5536 = vmatprep.mubr.bf16.mxu1 %v9220_v51  ;;  %v7905_v51 = vld [vmem:[%s11937_s1 + $0x26c] ss:$16 sps:$4 sm:$0xff]   ;;  %v7983_v13 = vld [vmem:[%s11937_s1 + $0x804] ss:$16 sps:$4 sm:$0xff]  }
  0x86   :  { %5063 = vmatprep.mubr.bf16.mxu0 %v9515_v4 }
  0x87   :  { %5507 = vmatpush1.bf16.msra.mxu1 %v7891_v16  ;;  %v7981_v16 = vld [vmem:[%s11937_s1 + $0x800] ss:$16 sps:$4 sm:$0xff]  }
  0x88   :  { %5034 = vmatpush1.bf16.msra.mxu0 %v7888_v15  ;;  %5508 = vmatprep.subr.bf16.mxu1 %v7899_v18  ;;  %v9690_v15 = vld [vmem:[%s11938_s0 + $0x18] ss:$100 sps:$4 sm:$0xff]   ;;  %v7989_v18 = vld [vmem:[%s11937_s1 + $0x824] ss:$16 sps:$4 sm:$0xff]  }
  0x89   :  { %5035 = vmatprep.subr.bf16.mxu0 %v7896_v17  ;;  %v7984_v17 = vld [vmem:[%s11937_s1 + $0x408] ss:$16 sps:$4 sm:$0xff]  }
  0x8b   :  { %5509 = vmatpush1.bf16.msra.mxu1 %v7897_v20  ;;  %v9707_v20 = vld [vmem:[%s11938_s0 + $0x24] ss:$100 sps:$4 sm:$0xff]  }
  0x8c   :  { %5036 = vmatpush1.bf16.msra.mxu0 %v7894_v19  ;;  %5510 = vmatprep.subr.bf16.mxu1 %v7905_v51  ;;  %v7992_v19 = vld [vmem:[%s11937_s1 + $0x42c] ss:$16 sps:$4 sm:$0xff]   ;;  %v7990_v51 = vld [vmem:[%s11937_s1 + $0x428] ss:$16 sps:$4 sm:$0xff]  }
  0x8d   :  { %5037 = vmatprep.subr.bf16.mxu0 %v7902_v21  ;;  %v7987_v21 = vld [vmem:[%s11937_s1 + $0x820] ss:$16 sps:$4 sm:$0xff]  }
  0x8f   :  { %5511 = vmatpush1.bf16.msra.mxu1 %v7903_v23  ;;  %v7993_v23 = vld [vmem:[%s11937_s1 + $0x840] ss:$16 sps:$4 sm:$0xff]  }
  0x90   :  { %5038 = vmatpush1.bf16.msra.mxu0 %v7900_v22  ;;  %5512 = vmatprep.subr.bf16.mxu1 %v7911_v25  ;;  %v7995_v22 = vld [vmem:[%s11937_s1 + $0x844] ss:$16 sps:$4 sm:$0xff]  }
  0x91   :  { %5039 = vmatprep.subr.bf16.mxu0 %v7908_v24  ;;  %v7996_v24 = vld [vmem:[%s11937_s1 + $0x448] ss:$16 sps:$4 sm:$0xff]   ;;  %v8001_v25 = vld [vmem:[%s11937_s1 + $0x864] ss:$16 sps:$4 sm:$0xff]  }
  0x93   :  { %5513 = vmatpush1.bf16.msra.mxu1 %v7909_v27  ;;  %v8002_v27 = vld [vmem:[%s11937_s1 + $0x468] ss:$16 sps:$4 sm:$0xff]  }
  0x94   :  { %5040 = vmatpush1.bf16.msra.mxu0 %v7906_v26  ;;  %5514 = vmatprep.subr.bf16.mxu1 %v7917_v29  ;;  %v7999_v26 = vld [vmem:[%s11937_s1 + $0x860] ss:$16 sps:$4 sm:$0xff]   ;;  %v8010_v29 = vld [vmem:[%s11937_s1 + $0x48c] ss:$16 sps:$4 sm:$0xff]  }
  0x95   :  { %5041 = vmatprep.subr.bf16.mxu0 %v7914_v28  ;;  %v8007_v28 = vld [vmem:[%s11937_s1 + $0x884] ss:$16 sps:$4 sm:$0xff]  }
  0x97   :  { %5515 = vmatpush1.bf16.msra.mxu1 %v7915_v31  ;;  %v8008_v31 = vld [vmem:[%s11937_s1 + $0x488] ss:$16 sps:$4 sm:$0xff]  }
  0x98   :  { %5042 = vmatpush1.bf16.msra.mxu0 %v7912_v30  ;;  %5516 = vmatprep.subr.bf16.mxu1 %v7923_v33  ;;  %v8005_v30 = vld [vmem:[%s11937_s1 + $0x880] ss:$16 sps:$4 sm:$0xff]   ;;  %v8016_v33 = vld [vmem:[%s11937_s1 + $0x4ac] ss:$16 sps:$4 sm:$0xff]  }
  0x99   :  { %5043 = vmatprep.subr.bf16.mxu0 %v7920_v32  ;;  %v8013_v32 = vld [vmem:[%s11937_s1 + $0x8a4] ss:$16 sps:$4 sm:$0xff]  }
  0x9b   :  { %5517 = vmatpush1.bf16.msra.mxu1 %v7921_v36  ;;  %v8014_v36 = vld [vmem:[%s11937_s1 + $0x4a8] ss:$16 sps:$4 sm:$0xff]  }
  0x9c   :  { %5044 = vmatpush1.bf16.msra.mxu0 %v7918_v35  ;;  %5518 = vmatprep.subr.bf16.mxu1 %v7929_v38  ;;  %v8011_v35 = vld [vmem:[%s11937_s1 + $0x8a0] ss:$16 sps:$4 sm:$0xff]   ;;  %v8022_v38 = vld [vmem:[%s11937_s1 + $0x4cc] ss:$16 sps:$4 sm:$0xff]  }
  0x9d   :  { %5045 = vmatprep.subr.bf16.mxu0 %v7926_v37  ;;  %v8019_v37 = vld [vmem:[%s11937_s1 + $0x8c4] ss:$16 sps:$4 sm:$0xff]  }
  0x9f   :  { %5519 = vmatpush1.bf16.msra.mxu1 %v7927_v40  ;;  %v8020_v40 = vld [vmem:[%s11937_s1 + $0x4c8] ss:$16 sps:$4 sm:$0xff]  }
  0xa0   :  { %5046 = vmatpush1.bf16.msra.mxu0 %v7924_v39  ;;  %5520 = vmatprep.subr.bf16.mxu1 %v7935_v42  ;;  %v8017_v39 = vld [vmem:[%s11937_s1 + $0x8c0] ss:$16 sps:$4 sm:$0xff]   ;;  %v8028_v42 = vld [vmem:[%s11937_s1 + $0x4ec] ss:$16 sps:$4 sm:$0xff]  }
  0xa1   :  { %5047 = vmatprep.subr.bf16.mxu0 %v7932_v41  ;;  %v8025_v41 = vld [vmem:[%s11937_s1 + $0x8e4] ss:$16 sps:$4 sm:$0xff]  }
  0xa3   :  { %5521 = vmatpush1.bf16.msra.mxu1 %v7933_v44  ;;  %v8026_v44 = vld [vmem:[%s11937_s1 + $0x4e8] ss:$16 sps:$4 sm:$0xff]  }
  0xa4   :  { %5048 = vmatpush1.bf16.msra.mxu0 %v7930_v43  ;;  %5522 = vmatprep.subr.bf16.mxu1 %v7941_v46  ;;  %v8023_v43 = vld [vmem:[%s11937_s1 + $0x8e0] ss:$16 sps:$4 sm:$0xff]   ;;  %v8034_v46 = vld [vmem:[%s11937_s1 + $0x50c] ss:$16 sps:$4 sm:$0xff]  }
  0xa5   :  { %5049 = vmatprep.subr.bf16.mxu0 %v7938_v45  ;;  %v8031_v45 = vld [vmem:[%s11937_s1 + $0x904] ss:$16 sps:$4 sm:$0xff]  }
  0xa7   :  { %5523 = vmatpush1.bf16.msra.mxu1 %v7939_v48  ;;  %v8032_v48 = vld [vmem:[%s11937_s1 + $0x508] ss:$16 sps:$4 sm:$0xff]  }
  0xa8   :  { %5050 = vmatpush1.bf16.msra.mxu0 %v7936_v47  ;;  %5524 = vmatprep.subr.bf16.mxu1 %v7947_v50  ;;  %v8029_v47 = vld [vmem:[%s11937_s1 + $0x900] ss:$16 sps:$4 sm:$0xff]   ;;  %v8040_v50 = vld [vmem:[%s11937_s1 + $0x52c] ss:$16 sps:$4 sm:$0xff]  }
  0xa9   :  { %5051 = vmatprep.subr.bf16.mxu0 %v7944_v49  ;;  %v8037_v49 = vld [vmem:[%s11937_s1 + $0x924] ss:$16 sps:$4 sm:$0xff]  }
  0xab   :  { %5525 = vmatpush1.bf16.msra.mxu1 %v7945_v53  ;;  %v8038_v53 = vld [vmem:[%s11937_s1 + $0x528] ss:$16 sps:$4 sm:$0xff]  }
  0xac   :  { %5052 = vmatpush1.bf16.msra.mxu0 %v7942_v52  ;;  %5526 = vmatprep.subr.bf16.mxu1 %v7953_v55  ;;  %v8035_v52 = vld [vmem:[%s11937_s1 + $0x920] ss:$16 sps:$4 sm:$0xff]   ;;  %v8046_v55 = vld [vmem:[%s11937_s1 + $0x54c] ss:$16 sps:$4 sm:$0xff]  }
  0xad   :  { %5053 = vmatprep.subr.bf16.mxu0 %v7950_v54  ;;  %v8043_v54 = vld [vmem:[%s11937_s1 + $0x944] ss:$16 sps:$4 sm:$0xff]  }
  0xaf   :  { %5527 = vmatpush1.bf16.msra.mxu1 %v7951_v57  ;;  %v8044_v57 = vld [vmem:[%s11937_s1 + $0x548] ss:$16 sps:$4 sm:$0xff]  }
  0xb0   :  { %5054 = vmatpush1.bf16.msra.mxu0 %v7948_v56  ;;  %5528 = vmatprep.subr.bf16.mxu1 %v7959_v59  ;;  %v8041_v56 = vld [vmem:[%s11937_s1 + $0x940] ss:$16 sps:$4 sm:$0xff]   ;;  %v8052_v59 = vld [vmem:[%s11937_s1 + $0x56c] ss:$16 sps:$4 sm:$0xff]  }
  0xb1   :  { %5055 = vmatprep.subr.bf16.mxu0 %v7956_v58  ;;  %v8049_v58 = vld [vmem:[%s11937_s1 + $0x964] ss:$16 sps:$4 sm:$0xff]  }
  0xb3   :  { %5529 = vmatpush1.bf16.msra.mxu1 %v7957_v61  ;;  %v8050_v61 = vld [vmem:[%s11937_s1 + $0x568] ss:$16 sps:$4 sm:$0xff]  }
  0xb4   :  { %5056 = vmatpush1.bf16.msra.mxu0 %v7954_v60  ;;  %5530 = vmatprep.subr.bf16.mxu1 %v7965_v63  ;;  %v8047_v60 = vld [vmem:[%s11937_s1 + $0x960] ss:$16 sps:$4 sm:$0xff]   ;;  %v8058_v63 = vld [vmem:[%s11937_s1 + $0x58c] ss:$16 sps:$4 sm:$0xff]  }
  0xb5   :  { %5057 = vmatprep.subr.bf16.mxu0 %v7962_v62  ;;  %v8055_v62 = vld [vmem:[%s11937_s1 + $0x984] ss:$16 sps:$4 sm:$0xff]  }
  0xb7   :  { %5531 = vmatpush1.bf16.msra.mxu1 %v7963_v1  ;;  %v8056_v1 = vld [vmem:[%s11937_s1 + $0x588] ss:$16 sps:$4 sm:$0xff]  }
  0xb8   :  { %5058 = vmatpush1.bf16.msra.mxu0 %v7960_v0  ;;  %5532 = vmatprep.subr.bf16.mxu1 %v7971_v3  ;;  %v8053_v0 = vld [vmem:[%s11937_s1 + $0x980] ss:$16 sps:$4 sm:$0xff]   ;;  %v8064_v3 = vld [vmem:[%s11937_s1 + $0x5ac] ss:$16 sps:$4 sm:$0xff]  }
  0xb9   :  { %5059 = vmatprep.subr.bf16.mxu0 %v7968_v2  ;;  %v8061_v2 = vld [vmem:[%s11937_s1 + $0x9a4] ss:$16 sps:$4 sm:$0xff]  }
  0xbb   :  { %5533 = vmatpush1.bf16.msra.mxu1 %v7969_v7  ;;  %v8062_v7 = vld [vmem:[%s11937_s1 + $0x5a8] ss:$16 sps:$4 sm:$0xff]  }
  0xbc   :  { %5060 = vmatpush1.bf16.msra.mxu0 %v7966_v6  ;;  %5534 = vmatprep.subr.bf16.mxu1 %v7977_v9  ;;  %v8059_v6 = vld [vmem:[%s11937_s1 + $0x9a0] ss:$16 sps:$4 sm:$0xff]   ;;  %v8070_v9 = vld [vmem:[%s11937_s1 + $0x5cc] ss:$16 sps:$4 sm:$0xff]  }
  0xbd   :  { %5061 = vmatprep.subr.bf16.mxu0 %v7974_v8  ;;  %v8067_v8 = vld [vmem:[%s11937_s1 + $0x9c4] ss:$16 sps:$4 sm:$0xff]  }
  0xbf   :  { %5535 = vmatpush1.bf16.msra.mxu1 %v7975_v12  ;;  %v8068_v12 = vld [vmem:[%s11937_s1 + $0x5c8] ss:$16 sps:$4 sm:$0xff]  }
  0xc0   :  { %5062 = vmatpush1.bf16.msra.mxu0 %v7972_v11  ;;  %5547 = vmatprep.subr.bf16.mxu1 %v7986_v14  ;;  %v8065_v11 = vld [vmem:[%s11937_s1 + $0x9c0] ss:$16 sps:$4 sm:$0xff]   ;;  %v8076_v14 = vld [vmem:[%s11937_s1 + $0x5ec] ss:$16 sps:$4 sm:$0xff]  }
  0xc1   :  { %5074 = vmatprep.subr.bf16.mxu0 %v7983_v13  ;;  %v8073_v13 = vld [vmem:[%s11937_s1 + $0x9e4] ss:$16 sps:$4 sm:$0xff]  }
  0xc2   :  { %5537 = vmatmul.mubr.bf16.vlgmr.msra.gmra.mrb[4].mxu1 %v9279_v5  ;;  %v7998_v5 = vld [vmem:[%s11937_s1 + $0x44c] ss:$16 sps:$4 sm:$0xff]  }
  0xc3   :  { %5064 = vmatmul.mubr.bf16.vlgmr.msra.gmra.mrb[0].mxu0 %v9690_v15  ;;  %5548 = vmatpush1.bf16.msra.mxu1 %v7984_v17  ;;  %v8074_v17 = vld [vmem:[%s11937_s1 + $0x5e8] ss:$16 sps:$4 sm:$0xff]  }
  0xc4   :  { %5075 = vmatpush1.bf16.msra.mxu0 %v7981_v16  ;;  %5549 = vmatprep.subr.bf16.mxu1 %v7992_v19  ;;  %v8071_v16 = vld [vmem:[%s11937_s1 + $0x9e0] ss:$16 sps:$4 sm:$0xff]   ;;  %v8085_v19 = vld [vmem:[%s11937_s1 + $0x60c] ss:$16 sps:$4 sm:$0xff]  }
  0xc5   :  { %5076 = vmatprep.subr.bf16.mxu0 %v7989_v18  ;;  %5106 = vmatprep.mubr.bf16.mxu0 %v9707_v20  ;;  %v8082_v18 = vld [vmem:[%s11937_s1 + $0xa04] ss:$16 sps:$4 sm:$0xff]  }
  0xc6   :  { %5579 = vmatprep.mubr.bf16.mxu1 %v9370_v34  ;;  %v8004_v34 = vld [vmem:[%s11937_s1 + $0x46c] ss:$16 sps:$4 sm:$0xff]  }
  0xc7   :  { %5550 = vmatpush1.bf16.msra.mxu1 %v7990_v51  ;;  %v8080_v51 = vld [vmem:[%s11937_s1 + $0xa00] ss:$16 sps:$4 sm:$0xff]  }
  0xc8   :  { %5077 = vmatpush1.bf16.msra.mxu0 %v7987_v21  ;;  %5551 = vmatprep.subr.bf16.mxu1 %v7998_v5  ;;  %v8077_v21 = vld [vmem:[%s11938_s0 + $0x20] ss:$100 sps:$4 sm:$0xff]  }
  0xc9   :  { %5078 = vmatprep.subr.bf16.mxu0 %v7995_v22  ;;  %v8083_v22 = vld [vmem:[%s11937_s1 + $0x608] ss:$16 sps:$4 sm:$0xff]   ;;  %v8088_v5 = vld [vmem:[%s11937_s1 + $0xa24] ss:$16 sps:$4 sm:$0xff]  }
  0xcb   :  { %5552 = vmatpush1.bf16.msra.mxu1 %v7996_v24  ;;  %v8178_v24 = vld [vmem:[%s11938_s0 + $0x2c] ss:$100 sps:$4 sm:$0xff]  }
  0xcc   :  { %5079 = vmatpush1.bf16.msra.mxu0 %v7993_v23  ;;  %5553 = vmatprep.subr.bf16.mxu1 %v8004_v34  ;;  %v8091_v23 = vld [vmem:[%s11937_s1 + $0x62c] ss:$16 sps:$4 sm:$0xff]   ;;  %v8089_v34 = vld [vmem:[%s11937_s1 + $0x628] ss:$16 sps:$4 sm:$0xff]  }
  0xcd   :  { %5080 = vmatprep.subr.bf16.mxu0 %v8001_v25  ;;  %v8086_v25 = vld [vmem:[%s11937_s1 + $0xa20] ss:$16 sps:$4 sm:$0xff]  }
  0xcf   :  { %5554 = vmatpush1.bf16.msra.mxu1 %v8002_v27  ;;  %v8092_v27 = vld [vmem:[%s11937_s1 + $0xa40] ss:$16 sps:$4 sm:$0xff]  }
  0xd0   :  { %5081 = vmatpush1.bf16.msra.mxu0 %v7999_v26  ;;  %5555 = vmatprep.subr.bf16.mxu1 %v8010_v29  ;;  %v8094_v26 = vld [vmem:[%s11937_s1 + $0xa44] ss:$16 sps:$4 sm:$0xff]  }
  0xd1   :  { %5082 = vmatprep.subr.bf16.mxu0 %v8007_v28  ;;  %v8095_v28 = vld [vmem:[%s11937_s1 + $0x648] ss:$16 sps:$4 sm:$0xff]   ;;  %v8100_v29 = vld [vmem:[%s11937_s1 + $0xa64] ss:$16 sps:$4 sm:$0xff]  }
  0xd3   :  { %5556 = vmatpush1.bf16.msra.mxu1 %v8008_v31  ;;  %v8101_v31 = vld [vmem:[%s11937_s1 + $0x668] ss:$16 sps:$4 sm:$0xff]  }
  0xd4   :  { %5083 = vmatpush1.bf16.msra.mxu0 %v8005_v30  ;;  %5557 = vmatprep.subr.bf16.mxu1 %v8016_v33  ;;  %v8098_v30 = vld [vmem:[%s11937_s1 + $0xa60] ss:$16 sps:$4 sm:$0xff]   ;;  %v8109_v33 = vld [vmem:[%s11937_s1 + $0x68c] ss:$16 sps:$4 sm:$0xff]  }
  0xd5   :  { %5084 = vmatprep.subr.bf16.mxu0 %v8013_v32  ;;  %v8106_v32 = vld [vmem:[%s11937_s1 + $0xa84] ss:$16 sps:$4 sm:$0xff]  }
  0xd7   :  { %5558 = vmatpush1.bf16.msra.mxu1 %v8014_v36  ;;  %v8107_v36 = vld [vmem:[%s11937_s1 + $0x688] ss:$16 sps:$4 sm:$0xff]  }
  0xd8   :  { %5085 = vmatpush1.bf16.msra.mxu0 %v8011_v35  ;;  %5559 = vmatprep.subr.bf16.mxu1 %v8022_v38  ;;  %v8104_v35 = vld [vmem:[%s11937_s1 + $0xa80] ss:$16 sps:$4 sm:$0xff]   ;;  %v8115_v38 = vld [vmem:[%s11937_s1 + $0x6ac] ss:$16 sps:$4 sm:$0xff]  }
  0xd9   :  { %5086 = vmatprep.subr.bf16.mxu0 %v8019_v37  ;;  %v8112_v37 = vld [vmem:[%s11937_s1 + $0xaa4] ss:$16 sps:$4 sm:$0xff]  }
  0xdb   :  { %5560 = vmatpush1.bf16.msra.mxu1 %v8020_v40  ;;  %v8113_v40 = vld [vmem:[%s11937_s1 + $0x6a8] ss:$16 sps:$4 sm:$0xff]  }
  0xdc   :  { %5087 = vmatpush1.bf16.msra.mxu0 %v8017_v39  ;;  %5561 = vmatprep.subr.bf16.mxu1 %v8028_v42  ;;  %v8110_v39 = vld [vmem:[%s11937_s1 + $0xaa0] ss:$16 sps:$4 sm:$0xff]   ;;  %v8121_v42 = vld [vmem:[%s11937_s1 + $0x6cc] ss:$16 sps:$4 sm:$0xff]  }
  0xdd   :  { %5088 = vmatprep.subr.bf16.mxu0 %v8025_v41  ;;  %v8118_v41 = vld [vmem:[%s11937_s1 + $0xac4] ss:$16 sps:$4 sm:$0xff]  }
  0xdf   :  { %5562 = vmatpush1.bf16.msra.mxu1 %v8026_v44 }
  0xe0   :  { %5089 = vmatpush1.bf16.msra.mxu0 %v8023_v43  ;;  %5563 = vmatprep.subr.bf16.mxu1 %v8034_v46 }
  0xe1   :  { %5090 = vmatprep.subr.bf16.mxu0 %v8031_v45  ;;  %v8116_v45 = vld [vmem:[%s11937_s1 + $0xac0] ss:$16 sps:$4 sm:$0xff]  }
  0xe3   :  { %5564 = vmatpush1.bf16.msra.mxu1 %v8032_v48 }
  0xe4   :  { %5091 = vmatpush1.bf16.msra.mxu0 %v8029_v47  ;;  %5565 = vmatprep.subr.bf16.mxu1 %v8040_v50  ;;  %v8119_v47 = vld [vmem:[%s11937_s1 + $0x6c8] ss:$16 sps:$4 sm:$0xff]   ;;  %v8127_v50 = vld [vmem:[%s11937_s1 + $0x6ec] ss:$16 sps:$4 sm:$0xff]  }
  0xe5   :  { %5092 = vmatprep.subr.bf16.mxu0 %v8037_v49  ;;  %v8124_v49 = vld [vmem:[%s11937_s1 + $0xae4] ss:$16 sps:$4 sm:$0xff]  }
  0xe7   :  { %5566 = vmatpush1.bf16.msra.mxu1 %v8038_v53  ;;  %v8125_v53 = vld [vmem:[%s11937_s1 + $0x6e8] ss:$16 sps:$4 sm:$0xff]  }
  0xe8   :  { %5093 = vmatpush1.bf16.msra.mxu0 %v8035_v52  ;;  %5567 = vmatprep.subr.bf16.mxu1 %v8046_v55  ;;  %v8122_v52 = vld [vmem:[%s11937_s1 + $0xae0] ss:$16 sps:$4 sm:$0xff]   ;;  %v8133_v55 = vld [vmem:[%s11937_s1 + $0x70c] ss:$16 sps:$4 sm:$0xff]  }
  0xe9   :  { %5094 = vmatprep.subr.bf16.mxu0 %v8043_v54  ;;  %v8130_v54 = vld [vmem:[%s11937_s1 + $0xb04] ss:$16 sps:$4 sm:$0xff]  }
  0xeb   :  { %5568 = vmatpush1.bf16.msra.mxu1 %v8044_v57  ;;  %v8131_v57 = vld [vmem:[%s11937_s1 + $0x708] ss:$16 sps:$4 sm:$0xff]  }
  0xec   :  { %5095 = vmatpush1.bf16.msra.mxu0 %v8041_v56  ;;  %5569 = vmatprep.subr.bf16.mxu1 %v8052_v59  ;;  %v8128_v56 = vld [vmem:[%s11937_s1 + $0xb00] ss:$16 sps:$4 sm:$0xff]   ;;  %v8139_v59 = vld [vmem:[%s11937_s1 + $0x72c] ss:$16 sps:$4 sm:$0xff]  }
  0xed   :  { %5096 = vmatprep.subr.bf16.mxu0 %v8049_v58  ;;  %v8136_v58 = vld [vmem:[%s11937_s1 + $0xb24] ss:$16 sps:$4 sm:$0xff]  }
  0xef   :  { %5570 = vmatpush1.bf16.msra.mxu1 %v8050_v61  ;;  %v8137_v61 = vld [vmem:[%s11937_s1 + $0x728] ss:$16 sps:$4 sm:$0xff]  }
  0xf0   :  { %5097 = vmatpush1.bf16.msra.mxu0 %v8047_v60  ;;  %5571 = vmatprep.subr.bf16.mxu1 %v8058_v63  ;;  %v8134_v60 = vld [vmem:[%s11937_s1 + $0xb20] ss:$16 sps:$4 sm:$0xff]   ;;  %v8145_v63 = vld [vmem:[%s11937_s1 + $0x74c] ss:$16 sps:$4 sm:$0xff]  }
  0xf1   :  { %5098 = vmatprep.subr.bf16.mxu0 %v8055_v62  ;;  %v8142_v62 = vld [vmem:[%s11937_s1 + $0xb44] ss:$16 sps:$4 sm:$0xff]  }
  0xf3   :  { %5572 = vmatpush1.bf16.msra.mxu1 %v8056_v1  ;;  %v8143_v1 = vld [vmem:[%s11937_s1 + $0x748] ss:$16 sps:$4 sm:$0xff]  }
  0xf4   :  { %5099 = vmatpush1.bf16.msra.mxu0 %v8053_v0  ;;  %5573 = vmatprep.subr.bf16.mxu1 %v8064_v3  ;;  %v8140_v0 = vld [vmem:[%s11937_s1 + $0xb40] ss:$16 sps:$4 sm:$0xff]   ;;  %v8151_v3 = vld [vmem:[%s11937_s1 + $0x76c] ss:$16 sps:$4 sm:$0xff]  }
  0xf5   :  { %5100 = vmatprep.subr.bf16.mxu0 %v8061_v2  ;;  %v8148_v2 = vld [vmem:[%s11937_s1 + $0xb64] ss:$16 sps:$4 sm:$0xff]  }
  0xf7   :  { %5574 = vmatpush1.bf16.msra.mxu1 %v8062_v7  ;;  %v8149_v7 = vld [vmem:[%s11937_s1 + $0x768] ss:$16 sps:$4 sm:$0xff]  }
  0xf8   :  { %5101 = vmatpush1.bf16.msra.mxu0 %v8059_v6  ;;  %5575 = vmatprep.subr.bf16.mxu1 %v8070_v9  ;;  %v8146_v6 = vld [vmem:[%s11937_s1 + $0xb60] ss:$16 sps:$4 sm:$0xff]   ;;  %v8157_v9 = vld [vmem:[%s11937_s1 + $0x78c] ss:$16 sps:$4 sm:$0xff]  }
  0xf9   :  { %5102 = vmatprep.subr.bf16.mxu0 %v8067_v8  ;;  %v8154_v8 = vld [vmem:[%s11937_s1 + $0xb84] ss:$16 sps:$4 sm:$0xff]  }
  0xfb   :  { %5576 = vmatpush1.bf16.msra.mxu1 %v8068_v12  ;;  %v8155_v12 = vld [vmem:[%s11937_s1 + $0x788] ss:$16 sps:$4 sm:$0xff]  }
  0xfc   :  { %5103 = vmatpush1.bf16.msra.mxu0 %v8065_v11  ;;  %5577 = vmatprep.subr.bf16.mxu1 %v8076_v14  ;;  %v8152_v11 = vld [vmem:[%s11937_s1 + $0xb80] ss:$16 sps:$4 sm:$0xff]   ;;  %v8163_v14 = vld [vmem:[%s11937_s1 + $0x7ac] ss:$16 sps:$4 sm:$0xff]  }
  0xfd   :  { %5104 = vmatprep.subr.bf16.mxu0 %v8073_v13  ;;  %v8160_v13 = vld [vmem:[%s11937_s1 + $0xba4] ss:$16 sps:$4 sm:$0xff]  }
  0xff   :  { %5578 = vmatpush1.bf16.msra.mxu1 %v8074_v17  ;;  %v8161_v17 = vld [vmem:[%s11937_s1 + $0x7a8] ss:$16 sps:$4 sm:$0xff]  }
 0x100   :  { %5105 = vmatpush1.bf16.msra.mxu0 %v8071_v16  ;;  %5590 = vmatprep.subr.bf16.mxu1 %v8085_v19  ;;  %v8158_v16 = vld [vmem:[%s11937_s1 + $0xba0] ss:$16 sps:$4 sm:$0xff]   ;;  %v8169_v19 = vld [vmem:[%s11937_s1 + $0x7cc] ss:$16 sps:$4 sm:$0xff]  }
 0x101   :  { %5117 = vmatprep.subr.bf16.mxu0 %v8082_v18  ;;  %v8166_v18 = vld [vmem:[%s11937_s1 + $0xbc4] ss:$16 sps:$4 sm:$0xff]  }
 0x102   :  { %5580 = vmatmul.mubr.bf16.vlgmr.msra.gmra.mrb[4].mxu1 %v9484_v10  ;;  %v8097_v10 = vld [vmem:[%s11937_s1 + $0x64c] ss:$16 sps:$4 sm:$0xff]  }
 0x103   :  { %5107 = vmatmul.mubr.bf16.vlgmr.msra.gmra.mrb[0].mxu0 %v8077_v21  ;;  %5591 = vmatpush1.bf16.msra.mxu1 %v8083_v22  ;;  %v8164_v21 = vld [vmem:[%s11937_s1 + $0xbc0] ss:$16 sps:$4 sm:$0xff]   ;;  %v8172_v22 = vld [vmem:[%s11937_s1 + $0xbe4] ss:$16 sps:$4 sm:$0xff]  }
 0x104   :  { %5118 = vmatpush1.bf16.msra.mxu0 %v8080_v51  ;;  %5592 = vmatprep.subr.bf16.mxu1 %v8091_v23  ;;  %v8167_v51 = vld [vmem:[%s11937_s1 + $0x7c8] ss:$16 sps:$4 sm:$0xff]   ;;  %v8170_v23 = vld [vmem:[%s11937_s1 + $0xbe0] ss:$16 sps:$4 sm:$0xff]  }
 0x105   :  { %5119 = vmatprep.subr.bf16.mxu0 %v8088_v5  ;;  %5149 = vmatprep.mubr.bf16.mxu0 %v8178_v24  ;;  %v8175_v5 = vld [vmem:[%s11937_s1 + $0x7ec] ss:$16 sps:$4 sm:$0xff]   ;;  %v8173_v24 = vld [vmem:[%s11937_s1 + $0x7e8] ss:$16 sps:$4 sm:$0xff]  }
 0x106   :  { %5622 = vmatprep.mubr.bf16.mxu1 %v9515_v4  ;;  %v8103_v4 = vld [vmem:[%s11937_s1 + $0x66c] ss:$16 sps:$4 sm:$0xff]  }
 0x107   :  { %5593 = vmatpush1.bf16.msra.mxu1 %v8089_v34  ;;  %v8181_v34 = vld [vmem:[%s11937_s1 + $0xc04] ss:$16 sps:$4 sm:$0xff]  }
 0x108   :  { %5120 = vmatpush1.bf16.msra.mxu0 %v8086_v25  ;;  %5594 = vmatprep.subr.bf16.mxu1 %v8097_v10  ;;  %v8176_v25 = vld [vmem:[%s11938_s0 + $0x28] ss:$100 sps:$4 sm:$0xff]   ;;  %v8179_v10 = vld [vmem:[%s11937_s1 + $0xc00] ss:$16 sps:$4 sm:$0xff]  }
 0x109   :  { %5121 = vmatprep.subr.bf16.mxu0 %v8094_v26  ;;  %v8184_v26 = vld [vmem:[%s11937_s1 + $0x80c] ss:$16 sps:$4 sm:$0xff]  }
 0x10b   :  { %5595 = vmatpush1.bf16.msra.mxu1 %v8095_v28  ;;  %v8187_v28 = vld [vmem:[%s11937_s1 + $0xc24] ss:$16 sps:$4 sm:$0xff]  }
 0x10c   :  { %5122 = vmatpush1.bf16.msra.mxu0 %v8092_v27  ;;  %5596 = vmatprep.subr.bf16.mxu1 %v8103_v4  ;;  %v8182_v27 = vld [vmem:[%s11937_s1 + $0x808] ss:$16 sps:$4 sm:$0xff]  }
 0x10d   :  { %5123 = vmatprep.subr.bf16.mxu0 %v8100_v29  ;;  %v8190_v29 = vld [vmem:[%s11937_s1 + $0x82c] ss:$16 sps:$4 sm:$0xff]   ;;  %v8277_v4 = vld [vmem:[%s11938_s0 + $0x34] ss:$100 sps:$4 sm:$0xff]  }
 0x10f   :  { %5597 = vmatpush1.bf16.msra.mxu1 %v8101_v31  ;;  %v8188_v31 = vld [vmem:[%s11937_s1 + $0x828] ss:$16 sps:$4 sm:$0xff]  }
 0x110   :  { %5124 = vmatpush1.bf16.msra.mxu0 %v8098_v30  ;;  %5598 = vmatprep.subr.bf16.mxu1 %v8109_v33  ;;  %v8185_v30 = vld [vmem:[%s11937_s1 + $0xc20] ss:$16 sps:$4 sm:$0xff]  }
 0x111   :  { %5125 = vmatprep.subr.bf16.mxu0 %v8106_v32  ;;  %v8193_v32 = vld [vmem:[%s11937_s1 + $0xc44] ss:$16 sps:$4 sm:$0xff]   ;;  %v8191_v33 = vld [vmem:[%s11937_s1 + $0xc40] ss:$16 sps:$4 sm:$0xff]  }
 0x113   :  { %5599 = vmatpush1.bf16.msra.mxu1 %v8107_v36  ;;  %v8199_v36 = vld [vmem:[%s11937_s1 + $0xc64] ss:$16 sps:$4 sm:$0xff]  }
 0x114   :  { %5126 = vmatpush1.bf16.msra.mxu0 %v8104_v35  ;;  %5600 = vmatprep.subr.bf16.mxu1 %v8115_v38  ;;  %v8194_v35 = vld [vmem:[%s11937_s1 + $0x848] ss:$16 sps:$4 sm:$0xff]  }
 0x115   :  { %5127 = vmatprep.subr.bf16.mxu0 %v8112_v37  ;;  %v9973_v43 = vpop.f32.mrb[0].mxu1  ;;  %v8197_v37 = vld [vmem:[%s11937_s1 + $0xc60] ss:$16 sps:$4 sm:$0xff]   ;;  %v8200_v38 = vld [vmem:[%s11937_s1 + $0x868] ss:$16 sps:$4 sm:$0xff]  }
 0x116   :  { %v9975_v44 = vpop.f32.mrb[1].mxu1 }
 0x117   :  { %v9980_v46 = vpop.f32.mrb[2].mxu1  ;;  %5601 = vmatpush1.bf16.msra.mxu1 %v8113_v40  ;;  %v8208_v40 = vld [vmem:[%s11937_s1 + $0x88c] ss:$16 sps:$4 sm:$0xff]  }
 0x118   :  { %5128 = vmatpush1.bf16.msra.mxu0 %v8110_v39  ;;  %v9985_v48 = vpop.f32.mrb[3].mxu1  ;;  %5602 = vmatprep.subr.bf16.mxu1 %v8121_v42  ;;  %v8205_v39 = vld [vmem:[%s11937_s1 + $0xc84] ss:$16 sps:$4 sm:$0xff]   ;;  %v8206_v42 = vld [vmem:[%s11937_s1 + $0x888] ss:$16 sps:$4 sm:$0xff]  }
 0x119   :  { %5129 = vmatprep.subr.bf16.mxu0 %v8118_v41  ;;  %v8203_v41 = vld [vmem:[%s11937_s1 + $0xc80] ss:$16 sps:$4 sm:$0xff]  }
 0x11b   :  { %5603 = vmatpush1.bf16.msra.mxu1 %v8119_v47  ;;  %v8214_v47 = vld [vmem:[%s11937_s1 + $0x8ac] ss:$16 sps:$4 sm:$0xff]  }
 0x11c   :  { %5130 = vmatpush1.bf16.msra.mxu0 %v8116_v45  ;;  %5604 = vmatprep.subr.bf16.mxu1 %v8127_v50  ;;  %v8211_v45 = vld [vmem:[%s11937_s1 + $0xca4] ss:$16 sps:$4 sm:$0xff]   ;;  %v8212_v50 = vld [vmem:[%s11937_s1 + $0x8a8] ss:$16 sps:$4 sm:$0xff]  }
 0x11d   :  { %5131 = vmatprep.subr.bf16.mxu0 %v8124_v49  ;;  %v8209_v49 = vld [vmem:[%s11937_s1 + $0xca0] ss:$16 sps:$4 sm:$0xff]  }
 0x11f   :  { %5605 = vmatpush1.bf16.msra.mxu1 %v8125_v53  ;;  %v8220_v53 = vld [vmem:[%s11937_s1 + $0x8cc] ss:$16 sps:$4 sm:$0xff]  }
 0x120   :  { %5132 = vmatpush1.bf16.msra.mxu0 %v8122_v52  ;;  %5606 = vmatprep.subr.bf16.mxu1 %v8133_v55  ;;  %v8217_v52 = vld [vmem:[%s11937_s1 + $0xcc4] ss:$16 sps:$4 sm:$0xff]   ;;  %v8218_v55 = vld [vmem:[%s11937_s1 + $0x8c8] ss:$16 sps:$4 sm:$0xff]  }
 0x121   :  { %5133 = vmatprep.subr.bf16.mxu0 %v8130_v54  ;;  %v8215_v54 = vld [vmem:[%s11937_s1 + $0xcc0] ss:$16 sps:$4 sm:$0xff]  }
 0x123   :  { %5607 = vmatpush1.bf16.msra.mxu1 %v8131_v57  ;;  %v8226_v57 = vld [vmem:[%s11937_s1 + $0x8ec] ss:$16 sps:$4 sm:$0xff]  }
 0x124   :  { %5134 = vmatpush1.bf16.msra.mxu0 %v8128_v56  ;;  %5608 = vmatprep.subr.bf16.mxu1 %v8139_v59  ;;  %v8223_v56 = vld [vmem:[%s11937_s1 + $0xce4] ss:$16 sps:$4 sm:$0xff]   ;;  %v8224_v59 = vld [vmem:[%s11937_s1 + $0x8e8] ss:$16 sps:$4 sm:$0xff]  }
 0x125   :  { %5135 = vmatprep.subr.bf16.mxu0 %v8136_v58  ;;  %v8221_v58 = vld [vmem:[%s11937_s1 + $0xce0] ss:$16 sps:$4 sm:$0xff]  }
 0x127   :  { %5609 = vmatpush1.bf16.msra.mxu1 %v8137_v61  ;;  %v8232_v61 = vld [vmem:[%s11937_s1 + $0x90c] ss:$16 sps:$4 sm:$0xff]  }
 0x128   :  { %5136 = vmatpush1.bf16.msra.mxu0 %v8134_v60  ;;  %5610 = vmatprep.subr.bf16.mxu1 %v8145_v63  ;;  %v8229_v60 = vld [vmem:[%s11937_s1 + $0xd04] ss:$16 sps:$4 sm:$0xff]   ;;  %v8230_v63 = vld [vmem:[%s11937_s1 + $0x908] ss:$16 sps:$4 sm:$0xff]  }
 0x129   :  { %5137 = vmatprep.subr.bf16.mxu0 %v8142_v62  ;;  %v8227_v62 = vld [vmem:[%s11937_s1 + $0xd00] ss:$16 sps:$4 sm:$0xff]  }
 0x12b   :  { %5611 = vmatpush1.bf16.msra.mxu1 %v8143_v1  ;;  %v8238_v1 = vld [vmem:[%s11937_s1 + $0x92c] ss:$16 sps:$4 sm:$0xff]  }
 0x12c   :  { %5138 = vmatpush1.bf16.msra.mxu0 %v8140_v0  ;;  %5612 = vmatprep.subr.bf16.mxu1 %v8151_v3  ;;  %v8235_v0 = vld [vmem:[%s11937_s1 + $0xd24] ss:$16 sps:$4 sm:$0xff]   ;;  %v8236_v3 = vld [vmem:[%s11937_s1 + $0x928] ss:$16 sps:$4 sm:$0xff]  }
 0x12d   :  { %5139 = vmatprep.subr.bf16.mxu0 %v8148_v2  ;;  %v8233_v2 = vld [vmem:[%s11937_s1 + $0xd20] ss:$16 sps:$4 sm:$0xff]  }
 0x12f   :  { %5613 = vmatpush1.bf16.msra.mxu1 %v8149_v7  ;;  %v8244_v7 = vld [vmem:[%s11937_s1 + $0x94c] ss:$16 sps:$4 sm:$0xff]  }
 0x130   :  { %5140 = vmatpush1.bf16.msra.mxu0 %v8146_v6  ;;  %5614 = vmatprep.subr.bf16.mxu1 %v8157_v9  ;;  %v8241_v6 = vld [vmem:[%s11937_s1 + $0xd44] ss:$16 sps:$4 sm:$0xff]   ;;  %v8242_v9 = vld [vmem:[%s11937_s1 + $0x948] ss:$16 sps:$4 sm:$0xff]  }
 0x131   :  { %5141 = vmatprep.subr.bf16.mxu0 %v8154_v8  ;;  %v8239_v8 = vld [vmem:[%s11937_s1 + $0xd40] ss:$16 sps:$4 sm:$0xff]  }
 0x133   :  { %5615 = vmatpush1.bf16.msra.mxu1 %v8155_v12  ;;  %v8250_v12 = vld [vmem:[%s11937_s1 + $0x96c] ss:$16 sps:$4 sm:$0xff]  }
 0x134   :  { %5142 = vmatpush1.bf16.msra.mxu0 %v8152_v11  ;;  %5616 = vmatprep.subr.bf16.mxu1 %v8163_v14  ;;  %v8247_v11 = vld [vmem:[%s11937_s1 + $0xd64] ss:$16 sps:$4 sm:$0xff]   ;;  %v8248_v14 = vld [vmem:[%s11937_s1 + $0x968] ss:$16 sps:$4 sm:$0xff]  }
 0x135   :  { %5143 = vmatprep.subr.bf16.mxu0 %v8160_v13  ;;  %v8245_v13 = vld [vmem:[%s11937_s1 + $0xd60] ss:$16 sps:$4 sm:$0xff]  }
 0x137   :  { %5617 = vmatpush1.bf16.msra.mxu1 %v8161_v17  ;;  %v8256_v17 = vld [vmem:[%s11937_s1 + $0x98c] ss:$16 sps:$4 sm:$0xff]  }
 0x138   :  { %5144 = vmatpush1.bf16.msra.mxu0 %v8158_v16  ;;  %5618 = vmatprep.subr.bf16.mxu1 %v8169_v19  ;;  %v8253_v16 = vld [vmem:[%s11937_s1 + $0xd84] ss:$16 sps:$4 sm:$0xff]   ;;  %v8254_v19 = vld [vmem:[%s11937_s1 + $0x988] ss:$16 sps:$4 sm:$0xff]  }
 0x139   :  { %5145 = vmatprep.subr.bf16.mxu0 %v8166_v18  ;;  %v8251_v18 = vld [vmem:[%s11937_s1 + $0xd80] ss:$16 sps:$4 sm:$0xff]  }
 0x13b   :  { %5619 = vmatpush1.bf16.msra.mxu1 %v8167_v51  ;;  %v8262_v51 = vld [vmem:[%s11937_s1 + $0x9ac] ss:$16 sps:$4 sm:$0xff]  }
 0x13c   :  { %5146 = vmatpush1.bf16.msra.mxu0 %v8164_v21  ;;  %5620 = vmatprep.subr.bf16.mxu1 %v8175_v5  ;;  %v8259_v21 = vld [vmem:[%s11937_s1 + $0xda4] ss:$16 sps:$4 sm:$0xff]   ;;  %v8260_v5 = vld [vmem:[%s11937_s1 + $0x9a8] ss:$16 sps:$4 sm:$0xff]  }
 0x13d   :  { %5147 = vmatprep.subr.bf16.mxu0 %v8172_v22  ;;  %v8257_v22 = vld [vmem:[%s11937_s1 + $0xda0] ss:$16 sps:$4 sm:$0xff]  }
 0x13f   :  { %5621 = vmatpush1.bf16.msra.mxu1 %v8173_v24  ;;  %v8268_v24 = vld [vmem:[%s11937_s1 + $0x9cc] ss:$16 sps:$4 sm:$0xff]  }
 0x140   :  { %5148 = vmatpush1.bf16.msra.mxu0 %v8170_v23  ;;  %5633 = vmatprep.subr.bf16.mxu1 %v8184_v26  ;;  %v8265_v23 = vld [vmem:[%s11937_s1 + $0xdc4] ss:$16 sps:$4 sm:$0xff]  }
 0x141   :  { %5160 = vmatprep.subr.bf16.mxu0 %v8181_v34  ;;  %v8266_v34 = vld [vmem:[%s11937_s1 + $0x9c8] ss:$16 sps:$4 sm:$0xff]   ;;  %v8271_v26 = vld [vmem:[%s11937_s1 + $0xde4] ss:$16 sps:$4 sm:$0xff]  }
 0x142   :  { %5623 = vmatmul.mubr.bf16.vlgmr.msra.gmra.mrb[4].mxu1 %v9690_v15  ;;  %v8196_v15 = vld [vmem:[%s11937_s1 + $0x84c] ss:$16 sps:$4 sm:$0xff]  }
 0x143   :  { %5150 = vmatmul.mubr.bf16.vlgmr.msra.gmra.mrb[0].mxu0 %v8176_v25  ;;  %5634 = vmatpush1.bf16.msra.mxu1 %v8182_v27  ;;  %v8263_v25 = vld [vmem:[%s11937_s1 + $0xdc0] ss:$16 sps:$4 sm:$0xff]  }
 0x144   :  { %5161 = vmatpush1.bf16.msra.mxu0 %v8179_v10  ;;  %5635 = vmatprep.subr.bf16.mxu1 %v8190_v29  ;;  %v8274_v10 = vld [vmem:[%s11937_s1 + $0x9ec] ss:$16 sps:$4 sm:$0xff]   ;;  %v8269_v27 = vld [vmem:[%s11937_s1 + $0xde0] ss:$16 sps:$4 sm:$0xff]  }
 0x145   :  { %5162 = vmatprep.subr.bf16.mxu0 %v8187_v28  ;;  %5192 = vmatprep.mubr.bf16.mxu0 %v8277_v4  ;;  %v8272_v28 = vld [vmem:[%s11937_s1 + $0x9e8] ss:$16 sps:$4 sm:$0xff]   ;;  %v10298_v29 = vld [vmem:[%s11938_s0 + $0x30] ss:$100 sps:$4 sm:$0xff]  }
 0x146   :  { %5665 = vmatprep.mubr.bf16.mxu1 %v9707_v20  ;;  %v8202_v20 = vld [vmem:[%s11937_s1 + $0x86c] ss:$16 sps:$4 sm:$0xff]   ;;  %v8280_v4 = vld [vmem:[%s11937_s1 + $0xe04] ss:$16 sps:$4 sm:$0xff]  }
 0x147   :  { %5636 = vmatpush1.bf16.msra.mxu1 %v8188_v31  ;;  %v8278_v31 = vld [vmem:[%s11937_s1 + $0xe00] ss:$16 sps:$4 sm:$0xff]  }
 0x148   :  { %5163 = vmatpush1.bf16.msra.mxu0 %v8185_v30  ;;  %5637 = vmatprep.subr.bf16.mxu1 %v8196_v15  ;;  %v8283_v30 = vld [vmem:[%s11937_s1 + $0xa0c] ss:$16 sps:$4 sm:$0xff]   ;;  %v8286_v15 = vld [vmem:[%s11937_s1 + $0xe24] ss:$16 sps:$4 sm:$0xff]  }
 0x149   :  { %5164 = vmatprep.subr.bf16.mxu0 %v8193_v32  ;;  %v8281_v32 = vld [vmem:[%s11937_s1 + $0xa08] ss:$16 sps:$4 sm:$0xff]  }
 0x14b   :  { %5638 = vmatpush1.bf16.msra.mxu1 %v8194_v35  ;;  %v10321_v35 = vld [vmem:[%s11938_s0 + $0x3c] ss:$100 sps:$4 sm:$0xff]  }
 0x14c   :  { %5165 = vmatpush1.bf16.msra.mxu0 %v8191_v33  ;;  %5639 = vmatprep.subr.bf16.mxu1 %v8202_v20  ;;  %v8289_v33 = vld [vmem:[%s11937_s1 + $0xa2c] ss:$16 sps:$4 sm:$0xff]   ;;  %v8284_v20 = vld [vmem:[%s11937_s1 + $0xe20] ss:$16 sps:$4 sm:$0xff]  }
 0x14d   :  { %5166 = vmatprep.subr.bf16.mxu0 %v8199_v36  ;;  %v9026_v36 = vld [vmem:[%s11938_s0 + $0x20] ss:$100 sps:$4 sm:$0xff]  }
 0x14f   :  { %5640 = vmatpush1.bf16.msra.mxu1 %v8200_v38  ;;  %v8292_v38 = vld [vmem:[%s11937_s1 + $0xe44] ss:$16 sps:$4 sm:$0xff]  }
 0x150   :  { %5167 = vmatpush1.bf16.msra.mxu0 %v8197_v37  ;;  %5641 = vmatprep.subr.bf16.mxu1 %v8208_v40  ;;  %v8287_v37 = vld [vmem:[%s11937_s1 + $0xa28] ss:$16 sps:$4 sm:$0xff]   ;;  %v9027_v40 = vld [vmem:[%s11938_s0 + $0x2c] ss:$100 sps:$4 sm:$0xff]  }
 0x151   :  { %5168 = vmatprep.subr.bf16.mxu0 %v8205_v39  ;;  %v8295_v39 = vld [vmem:[%s11937_s1 + $0xa4c] ss:$16 sps:$4 sm:$0xff]  }
 0x153   :  { %5642 = vmatpush1.bf16.msra.mxu1 %v8206_v42  ;;  %v8293_v42 = vld [vmem:[%s11937_s1 + $0xa48] ss:$16 sps:$4 sm:$0xff]  }
 0x154   :  { %5169 = vmatpush1.bf16.msra.mxu0 %v8203_v41  ;;  %5643 = vmatprep.subr.bf16.mxu1 %v8214_v47  ;;  %v8290_v41 = vld [vmem:[%s11937_s1 + $0xe40] ss:$16 sps:$4 sm:$0xff]   ;;  %v8301_v47 = vld [vmem:[%s11937_s1 + $0xa6c] ss:$16 sps:$4 sm:$0xff]  }
 0x155   :  { %5170 = vmatprep.subr.bf16.mxu0 %v8211_v45  ;;  %v8298_v45 = vld [vmem:[%s11937_s1 + $0xe64] ss:$16 sps:$4 sm:$0xff]  }
 0x157   :  { %5644 = vmatpush1.bf16.msra.mxu1 %v8212_v50  ;;  %v8299_v50 = vld [vmem:[%s11937_s1 + $0xa68] ss:$16 sps:$4 sm:$0xff]  }
 0x158   :  { %5171 = vmatpush1.bf16.msra.mxu0 %v8209_v49  ;;  %5645 = vmatprep.subr.bf16.mxu1 %v8220_v53  ;;  %v8296_v49 = vld [vmem:[%s11937_s1 + $0xe60] ss:$16 sps:$4 sm:$0xff]   ;;  %v8307_v53 = vld [vmem:[%s11937_s1 + $0xa8c] ss:$16 sps:$4 sm:$0xff]  }
 0x159   :  { %5172 = vmatprep.subr.bf16.mxu0 %v8217_v52  ;;  %v8304_v52 = vld [vmem:[%s11937_s1 + $0xe84] ss:$16 sps:$4 sm:$0xff]  }
 0x15b   :  { %5646 = vmatpush1.bf16.msra.mxu1 %v8218_v55  ;;  %v8305_v55 = vld [vmem:[%s11937_s1 + $0xa88] ss:$16 sps:$4 sm:$0xff]  }
 0x15c   :  { %5173 = vmatpush1.bf16.msra.mxu0 %v8215_v54  ;;  %5647 = vmatprep.subr.bf16.mxu1 %v8226_v57  ;;  %v8302_v54 = vld [vmem:[%s11937_s1 + $0xe80] ss:$16 sps:$4 sm:$0xff]   ;;  %v8313_v57 = vld [vmem:[%s11937_s1 + $0xaac] ss:$16 sps:$4 sm:$0xff]  }
 0x15d   :  { %5174 = vmatprep.subr.bf16.mxu0 %v8223_v56  ;;  %v8310_v56 = vld [vmem:[%s11937_s1 + $0xea4] ss:$16 sps:$4 sm:$0xff]  }
 0x15f   :  { %5648 = vmatpush1.bf16.msra.mxu1 %v8224_v59  ;;  %v8311_v59 = vld [vmem:[%s11937_s1 + $0xaa8] ss:$16 sps:$4 sm:$0xff]  }
 0x160   :  { %5175 = vmatpush1.bf16.msra.mxu0 %v8221_v58  ;;  %5649 = vmatprep.subr.bf16.mxu1 %v8232_v61  ;;  %v8308_v58 = vld [vmem:[%s11937_s1 + $0xea0] ss:$16 sps:$4 sm:$0xff]   ;;  %v8319_v61 = vld [vmem:[%s11937_s1 + $0xacc] ss:$16 sps:$4 sm:$0xff]  }
 0x161   :  { %5176 = vmatprep.subr.bf16.mxu0 %v8229_v60  ;;  %v8316_v60 = vld [vmem:[%s11937_s1 + $0xec4] ss:$16 sps:$4 sm:$0xff]  }
 0x163   :  { %5650 = vmatpush1.bf16.msra.mxu1 %v8230_v63  ;;  %v8317_v63 = vld [vmem:[%s11937_s1 + $0xac8] ss:$16 sps:$4 sm:$0xff]  }
 0x164   :  { %5177 = vmatpush1.bf16.msra.mxu0 %v8227_v62  ;;  %5651 = vmatprep.subr.bf16.mxu1 %v8238_v1  ;;  %v8314_v62 = vld [vmem:[%s11937_s1 + $0xec0] ss:$16 sps:$4 sm:$0xff]   ;;  %v8325_v1 = vld [vmem:[%s11937_s1 + $0xaec] ss:$16 sps:$4 sm:$0xff]  }
 0x165   :  { %5178 = vmatprep.subr.bf16.mxu0 %v8235_v0  ;;  %v8322_v0 = vld [vmem:[%s11937_s1 + $0xee4] ss:$16 sps:$4 sm:$0xff]  }
 0x167   :  { %5652 = vmatpush1.bf16.msra.mxu1 %v8236_v3  ;;  %v8323_v3 = vld [vmem:[%s11937_s1 + $0xae8] ss:$16 sps:$4 sm:$0xff]  }
 0x168   :  { %5179 = vmatpush1.bf16.msra.mxu0 %v8233_v2  ;;  %5653 = vmatprep.subr.bf16.mxu1 %v8244_v7  ;;  %v8320_v2 = vld [vmem:[%s11937_s1 + $0xee0] ss:$16 sps:$4 sm:$0xff]   ;;  %v8331_v7 = vld [vmem:[%s11937_s1 + $0xb0c] ss:$16 sps:$4 sm:$0xff]  }
 0x169   :  { %5180 = vmatprep.subr.bf16.mxu0 %v8241_v6  ;;  %v8328_v6 = vld [vmem:[%s11937_s1 + $0xf04] ss:$16 sps:$4 sm:$0xff]  }
 0x16b   :  { %5654 = vmatpush1.bf16.msra.mxu1 %v8242_v9  ;;  %v8329_v9 = vld [vmem:[%s11937_s1 + $0xb08] ss:$16 sps:$4 sm:$0xff]  }
 0x16c   :  { %5181 = vmatpush1.bf16.msra.mxu0 %v8239_v8  ;;  %5655 = vmatprep.subr.bf16.mxu1 %v8250_v12  ;;  %v8326_v8 = vld [vmem:[%s11937_s1 + $0xf00] ss:$16 sps:$4 sm:$0xff]   ;;  %v8337_v12 = vld [vmem:[%s11937_s1 + $0xb2c] ss:$16 sps:$4 sm:$0xff]  }
 0x16d   :  { %5182 = vmatprep.subr.bf16.mxu0 %v8247_v11  ;;  %v8334_v11 = vld [vmem:[%s11937_s1 + $0xf24] ss:$16 sps:$4 sm:$0xff]  }
 0x16f   :  { %5656 = vmatpush1.bf16.msra.mxu1 %v8248_v14  ;;  %v8335_v14 = vld [vmem:[%s11937_s1 + $0xb28] ss:$16 sps:$4 sm:$0xff]  }
 0x170   :  { %5183 = vmatpush1.bf16.msra.mxu0 %v8245_v13  ;;  %5657 = vmatprep.subr.bf16.mxu1 %v8256_v17  ;;  %v8332_v13 = vld [vmem:[%s11937_s1 + $0xf20] ss:$16 sps:$4 sm:$0xff]   ;;  %v8343_v17 = vld [vmem:[%s11937_s1 + $0xb4c] ss:$16 sps:$4 sm:$0xff]  }
 0x171   :  { %5184 = vmatprep.subr.bf16.mxu0 %v8253_v16  ;;  %v8340_v16 = vld [vmem:[%s11937_s1 + $0xf44] ss:$16 sps:$4 sm:$0xff]  }
 0x173   :  { %5658 = vmatpush1.bf16.msra.mxu1 %v8254_v19  ;;  %v8341_v19 = vld [vmem:[%s11937_s1 + $0xb48] ss:$16 sps:$4 sm:$0xff]  }
 0x174   :  { %5185 = vmatpush1.bf16.msra.mxu0 %v8251_v18  ;;  %5659 = vmatprep.subr.bf16.mxu1 %v8262_v51  ;;  %v8338_v18 = vld [vmem:[%s11937_s1 + $0xf40] ss:$16 sps:$4 sm:$0xff]   ;;  %v8349_v51 = vld [vmem:[%s11937_s1 + $0xb6c] ss:$16 sps:$4 sm:$0xff]  }
 0x175   :  { %5186 = vmatprep.subr.bf16.mxu0 %v8259_v21  ;;  %v8346_v21 = vld [vmem:[%s11937_s1 + $0xf64] ss:$16 sps:$4 sm:$0xff]  }
 0x177   :  { %5660 = vmatpush1.bf16.msra.mxu1 %v8260_v5  ;;  %v8347_v5 = vld [vmem:[%s11937_s1 + $0xb68] ss:$16 sps:$4 sm:$0xff]  }
 0x178   :  { %5187 = vmatpush1.bf16.msra.mxu0 %v8257_v22  ;;  %5661 = vmatprep.subr.bf16.mxu1 %v8268_v24  ;;  %v8344_v22 = vld [vmem:[%s11937_s1 + $0xf60] ss:$16 sps:$4 sm:$0xff]   ;;  %v8355_v24 = vld [vmem:[%s11937_s1 + $0xb8c] ss:$16 sps:$4 sm:$0xff]  }
 0x179   :  { %5188 = vmatprep.subr.bf16.mxu0 %v8265_v23  ;;  %v8352_v23 = vld [vmem:[%s11937_s1 + $0xf84] ss:$16 sps:$4 sm:$0xff]  }
 0x17b   :  { %5662 = vmatpush1.bf16.msra.mxu1 %v8266_v34  ;;  %v8353_v34 = vld [vmem:[%s11937_s1 + $0xb88] ss:$16 sps:$4 sm:$0xff]  }
 0x17c   :  { %5189 = vmatpush1.bf16.msra.mxu0 %v8263_v25  ;;  %5663 = vmatprep.subr.bf16.mxu1 %v8274_v10  ;;  %v8350_v25 = vld [vmem:[%s11937_s1 + $0xf80] ss:$16 sps:$4 sm:$0xff]   ;;  %v8361_v10 = vld [vmem:[%s11937_s1 + $0xbac] ss:$16 sps:$4 sm:$0xff]  }
 0x17d   :  { %5190 = vmatprep.subr.bf16.mxu0 %v8271_v26  ;;  %v8358_v26 = vld [vmem:[%s11937_s1 + $0xfa4] ss:$16 sps:$4 sm:$0xff]  }
 0x17f   :  { %5664 = vmatpush1.bf16.msra.mxu1 %v8272_v28  ;;  %v8359_v28 = vld [vmem:[%s11937_s1 + $0xba8] ss:$16 sps:$4 sm:$0xff]  }
 0x180   :  { %5191 = vmatpush1.bf16.msra.mxu0 %v8269_v27  ;;  %5676 = vmatprep.subr.bf16.mxu1 %v8283_v30  ;;  %v8356_v27 = vld [vmem:[%s11937_s1 + $0xfa0] ss:$16 sps:$4 sm:$0xff]   ;;  %v8367_v30 = vld [vmem:[%s11937_s1 + $0xbcc] ss:$16 sps:$4 sm:$0xff]  }
 0x181   :  { %5203 = vmatprep.subr.bf16.mxu0 %v8280_v4  ;;  %v8364_v4 = vld [vmem:[%s11937_s1 + $0xfc4] ss:$16 sps:$4 sm:$0xff]  }
 0x182   :  { %5666 = vmatmul.mubr.bf16.vlgmr.msra.gmra.mrb[4].mxu1 %v9026_v36  ;;  %v8368_v36 = vld [vmem:[%s11937_s1 + $0xfe0] ss:$16 sps:$4 sm:$0xff]  }
 0x183   :  { %5193 = vmatmul.mubr.bf16.vlgmr.msra.gmra.mrb[0].mxu0 %v10298_v29  ;;  %5677 = vmatpush1.bf16.msra.mxu1 %v8281_v32  ;;  %v8365_v32 = vld [vmem:[%s11937_s1 + $0xbc8] ss:$16 sps:$4 sm:$0xff]  }
 0x184   :  { %5204 = vmatpush1.bf16.msra.mxu0 %v8278_v31  ;;  %5678 = vmatprep.subr.bf16.mxu1 %v8289_v33  ;;  %v8362_v31 = vld [vmem:[%s11937_s1 + $0xfc0] ss:$16 sps:$4 sm:$0xff]   ;;  %v8373_v33 = vld [vmem:[%s11937_s1 + $0xbec] ss:$16 sps:$4 sm:$0xff]  }
 0x185   :  { %5205 = vmatprep.subr.bf16.mxu0 %v8286_v15  ;;  %5235 = vmatprep.mubr.bf16.mxu0 %v10321_v35  ;;  %v8370_v15 = vld [vmem:[%s11937_s1 + $0xfe4] ss:$16 sps:$4 sm:$0xff]  }
 0x186   :  { %5708 = vmatprep.mubr.bf16.mxu1 %v9027_v40  ;;  %v8377_v40 = vld [vmem:[%s11937_s1 + $0x1000] ss:$16 sps:$4 sm:$0xff]  }
 0x187   :  { %5679 = vmatpush1.bf16.msra.mxu1 %v8287_v37  ;;  %v10508_v37 = vld [vmem:[%s11938_s0 + $0x38] ss:$100 sps:$4 sm:$0xff]  }
 0x188   :  { %5206 = vmatpush1.bf16.msra.mxu0 %v8284_v20  ;;  %5680 = vmatprep.subr.bf16.mxu1 %v8295_v39  ;;  %v8371_v20 = vld [vmem:[%s11937_s1 + $0xbe8] ss:$16 sps:$4 sm:$0xff]   ;;  %v8382_v39 = vld [vmem:[%s11937_s1 + $0xc0c] ss:$16 sps:$4 sm:$0xff]  }
 0x189   :  { %5207 = vmatprep.subr.bf16.mxu0 %v8292_v38  ;;  %v8379_v38 = vld [vmem:[%s11937_s1 + $0x1004] ss:$16 sps:$4 sm:$0xff]  }
 0x18b   :  { %5681 = vmatpush1.bf16.msra.mxu1 %v8293_v42  ;;  %v8385_v42 = vld [vmem:[%s11937_s1 + $0x1024] ss:$16 sps:$4 sm:$0xff]  }
 0x18c   :  { %5208 = vmatpush1.bf16.msra.mxu0 %v8290_v41  ;;  %5682 = vmatprep.subr.bf16.mxu1 %v8301_v47  ;;  %v8380_v41 = vld [vmem:[%s11937_s1 + $0xc08] ss:$16 sps:$4 sm:$0xff]  }
 0x18d   :  { %5209 = vmatprep.subr.bf16.mxu0 %v8298_v45  ;;  %v8388_v45 = vld [vmem:[%s11937_s1 + $0xc2c] ss:$16 sps:$4 sm:$0xff]   ;;  %v10531_v47 = vld [vmem:[%s11938_s0 + $0x44] ss:$100 sps:$4 sm:$0xff]  }
 0x18f   :  { %5683 = vmatpush1.bf16.msra.mxu1 %v8299_v50  ;;  %v8383_v50 = vld [vmem:[%s11937_s1 + $0x1020] ss:$16 sps:$4 sm:$0xff]  }
 0x190   :  { %5210 = vmatpush1.bf16.msra.mxu0 %v8296_v49  ;;  %5684 = vmatprep.subr.bf16.mxu1 %v8307_v53  ;;  %v9028_v49 = vld [vmem:[%s11938_s0 + $0x28] ss:$100 sps:$4 sm:$0xff]   ;;  %v8391_v53 = vld [vmem:[%s11937_s1 + $0x1044] ss:$16 sps:$4 sm:$0xff]  }
 0x191   :  { %5211 = vmatprep.subr.bf16.mxu0 %v8304_v52  ;;  %v8386_v52 = vld [vmem:[%s11937_s1 + $0xc28] ss:$16 sps:$4 sm:$0xff]  }
 0x193   :  { %5685 = vmatpush1.bf16.msra.mxu1 %v8305_v55  ;;  %v9029_v55 = vld [vmem:[%s11938_s0 + $0x34] ss:$100 sps:$4 sm:$0xff]  }
 0x194   :  { %5212 = vmatpush1.bf16.msra.mxu0 %v8302_v54  ;;  %5686 = vmatprep.subr.bf16.mxu1 %v8313_v57  ;;  %v8394_v54 = vld [vmem:[%s11937_s1 + $0xc4c] ss:$16 sps:$4 sm:$0xff]   ;;  %v8392_v57 = vld [vmem:[%s11937_s1 + $0xc48] ss:$16 sps:$4 sm:$0xff]  }
 0x195   :  { %5213 = vmatprep.subr.bf16.mxu0 %v8310_v56  ;;  %v8389_v56 = vld [vmem:[%s11937_s1 + $0x1040] ss:$16 sps:$4 sm:$0xff]  }
 0x197   :  { %5687 = vmatpush1.bf16.msra.mxu1 %v8311_v59  ;;  %v8400_v59 = vld [vmem:[%s11937_s1 + $0xc6c] ss:$16 sps:$4 sm:$0xff]  }
 0x198   :  { %5214 = vmatpush1.bf16.msra.mxu0 %v8308_v58  ;;  %5688 = vmatprep.subr.bf16.mxu1 %v8319_v61  ;;  %v8397_v58 = vld [vmem:[%s11937_s1 + $0x1064] ss:$16 sps:$4 sm:$0xff]   ;;  %v8398_v61 = vld [vmem:[%s11937_s1 + $0xc68] ss:$16 sps:$4 sm:$0xff]  }
 0x199   :  { %5215 = vmatprep.subr.bf16.mxu0 %v8316_v60  ;;  %v8395_v60 = vld [vmem:[%s11937_s1 + $0x1060] ss:$16 sps:$4 sm:$0xff]  }
 0x19b   :  { %5689 = vmatpush1.bf16.msra.mxu1 %v8317_v63  ;;  %v8406_v63 = vld [vmem:[%s11937_s1 + $0xc8c] ss:$16 sps:$4 sm:$0xff]  }
 0x19c   :  { %5216 = vmatpush1.bf16.msra.mxu0 %v8314_v62  ;;  %5690 = vmatprep.subr.bf16.mxu1 %v8325_v1  ;;  %v8403_v62 = vld [vmem:[%s11937_s1 + $0x1084] ss:$16 sps:$4 sm:$0xff]   ;;  %v8404_v1 = vld [vmem:[%s11937_s1 + $0xc88] ss:$16 sps:$4 sm:$0xff]  }
 0x19d   :  { %5217 = vmatprep.subr.bf16.mxu0 %v8322_v0  ;;  %v8401_v0 = vld [vmem:[%s11937_s1 + $0x1080] ss:$16 sps:$4 sm:$0xff]  }
 0x19f   :  { %5691 = vmatpush1.bf16.msra.mxu1 %v8323_v3  ;;  %v8412_v3 = vld [vmem:[%s11937_s1 + $0xcac] ss:$16 sps:$4 sm:$0xff]  }
 0x1a0   :  { %5218 = vmatpush1.bf16.msra.mxu0 %v8320_v2  ;;  %5692 = vmatprep.subr.bf16.mxu1 %v8331_v7  ;;  %v8409_v2 = vld [vmem:[%s11937_s1 + $0x10a4] ss:$16 sps:$4 sm:$0xff]   ;;  %v8410_v7 = vld [vmem:[%s11937_s1 + $0xca8] ss:$16 sps:$4 sm:$0xff]  }
 0x1a1   :  { %5219 = vmatprep.subr.bf16.mxu0 %v8328_v6  ;;  %v8407_v6 = vld [vmem:[%s11937_s1 + $0x10a0] ss:$16 sps:$4 sm:$0xff]  }
 0x1a3   :  { %5693 = vmatpush1.bf16.msra.mxu1 %v8329_v9  ;;  %v8418_v9 = vld [vmem:[%s11937_s1 + $0xccc] ss:$16 sps:$4 sm:$0xff]  }
 0x1a4   :  { %5220 = vmatpush1.bf16.msra.mxu0 %v8326_v8  ;;  %5694 = vmatprep.subr.bf16.mxu1 %v8337_v12  ;;  %v8415_v8 = vld [vmem:[%s11937_s1 + $0x10c4] ss:$16 sps:$4 sm:$0xff]   ;;  %v8416_v12 = vld [vmem:[%s11937_s1 + $0xcc8] ss:$16 sps:$4 sm:$0xff]  }
 0x1a5   :  { %5221 = vmatprep.subr.bf16.mxu0 %v8334_v11  ;;  %v8413_v11 = vld [vmem:[%s11937_s1 + $0x10c0] ss:$16 sps:$4 sm:$0xff]  }
 0x1a7   :  { %5695 = vmatpush1.bf16.msra.mxu1 %v8335_v14  ;;  %v8424_v14 = vld [vmem:[%s11937_s1 + $0xcec] ss:$16 sps:$4 sm:$0xff]  }
 0x1a8   :  { %5222 = vmatpush1.bf16.msra.mxu0 %v8332_v13  ;;  %5696 = vmatprep.subr.bf16.mxu1 %v8343_v17  ;;  %v8421_v13 = vld [vmem:[%s11937_s1 + $0x10e4] ss:$16 sps:$4 sm:$0xff]   ;;  %v8422_v17 = vld [vmem:[%s11937_s1 + $0xce8] ss:$16 sps:$4 sm:$0xff]  }
 0x1a9   :  { %5223 = vmatprep.subr.bf16.mxu0 %v8340_v16  ;;  %v8419_v16 = vld [vmem:[%s11937_s1 + $0x10e0] ss:$16 sps:$4 sm:$0xff]  }
 0x1ab   :  { %5697 = vmatpush1.bf16.msra.mxu1 %v8341_v19  ;;  %v8430_v19 = vld [vmem:[%s11937_s1 + $0xd0c] ss:$16 sps:$4 sm:$0xff]  }
 0x1ac   :  { %5224 = vmatpush1.bf16.msra.mxu0 %v8338_v18  ;;  %5698 = vmatprep.subr.bf16.mxu1 %v8349_v51  ;;  %v8427_v18 = vld [vmem:[%s11937_s1 + $0x1104] ss:$16 sps:$4 sm:$0xff]   ;;  %v8428_v51 = vld [vmem:[%s11937_s1 + $0xd08] ss:$16 sps:$4 sm:$0xff]  }
 0x1ad   :  { %5225 = vmatprep.subr.bf16.mxu0 %v8346_v21  ;;  %v8425_v21 = vld [vmem:[%s11937_s1 + $0x1100] ss:$16 sps:$4 sm:$0xff]  }
 0x1af   :  { %5699 = vmatpush1.bf16.msra.mxu1 %v8347_v5  ;;  %v8436_v5 = vld [vmem:[%s11937_s1 + $0xd2c] ss:$16 sps:$4 sm:$0xff]  }
 0x1b0   :  { %5226 = vmatpush1.bf16.msra.mxu0 %v8344_v22  ;;  %5700 = vmatprep.subr.bf16.mxu1 %v8355_v24  ;;  %v8433_v22 = vld [vmem:[%s11937_s1 + $0x1124] ss:$16 sps:$4 sm:$0xff]   ;;  %v8434_v24 = vld [vmem:[%s11937_s1 + $0xd28] ss:$16 sps:$4 sm:$0xff]  }
 0x1b1   :  { %5227 = vmatprep.subr.bf16.mxu0 %v8352_v23  ;;  %v8431_v23 = vld [vmem:[%s11937_s1 + $0x1120] ss:$16 sps:$4 sm:$0xff]  }
 0x1b3   :  { %5701 = vmatpush1.bf16.msra.mxu1 %v8353_v34  ;;  %v8442_v34 = vld [vmem:[%s11937_s1 + $0xd4c] ss:$16 sps:$4 sm:$0xff]  }
 0x1b4   :  { %5228 = vmatpush1.bf16.msra.mxu0 %v8350_v25  ;;  %5702 = vmatprep.subr.bf16.mxu1 %v8361_v10  ;;  %v8439_v25 = vld [vmem:[%s11937_s1 + $0x1144] ss:$16 sps:$4 sm:$0xff]   ;;  %v8440_v10 = vld [vmem:[%s11937_s1 + $0xd48] ss:$16 sps:$4 sm:$0xff]  }
 0x1b5   :  { %5229 = vmatprep.subr.bf16.mxu0 %v8358_v26  ;;  %v8437_v26 = vld [vmem:[%s11937_s1 + $0x1140] ss:$16 sps:$4 sm:$0xff]  }
 0x1b7   :  { %5703 = vmatpush1.bf16.msra.mxu1 %v8359_v28  ;;  %v8448_v28 = vld [vmem:[%s11937_s1 + $0xd6c] ss:$16 sps:$4 sm:$0xff]  }
 0x1b8   :  { %5230 = vmatpush1.bf16.msra.mxu0 %v8356_v27  ;;  %5704 = vmatprep.subr.bf16.mxu1 %v8367_v30  ;;  %v8445_v27 = vld [vmem:[%s11937_s1 + $0x1164] ss:$16 sps:$4 sm:$0xff]   ;;  %v8446_v30 = vld [vmem:[%s11937_s1 + $0xd68] ss:$16 sps:$4 sm:$0xff]  }
 0x1b9   :  { %5231 = vmatprep.subr.bf16.mxu0 %v8364_v4  ;;  %v8443_v4 = vld [vmem:[%s11937_s1 + $0x1160] ss:$16 sps:$4 sm:$0xff]  }
 0x1bb   :  { %5705 = vmatpush1.bf16.msra.mxu1 %v8365_v32  ;;  %v8454_v32 = vld [vmem:[%s11937_s1 + $0xd8c] ss:$16 sps:$4 sm:$0xff]  }
 0x1bc   :  { %5232 = vmatpush1.bf16.msra.mxu0 %v8362_v31  ;;  %5706 = vmatprep.subr.bf16.mxu1 %v8373_v33  ;;  %v8451_v31 = vld [vmem:[%s11937_s1 + $0x1184] ss:$16 sps:$4 sm:$0xff]   ;;  %v8452_v33 = vld [vmem:[%s11937_s1 + $0xd88] ss:$16 sps:$4 sm:$0xff]  }
 0x1bd   :  { %5233 = vmatprep.subr.bf16.mxu0 %v8370_v15  ;;  %v8449_v15 = vld [vmem:[%s11937_s1 + $0x1180] ss:$16 sps:$4 sm:$0xff]  }
 0x1bf   :  { %5707 = vmatpush1.bf16.msra.mxu1 %v8371_v20  ;;  %v8460_v20 = vld [vmem:[%s11937_s1 + $0xdac] ss:$16 sps:$4 sm:$0xff]  }
 0x1c0   :  { %5234 = vmatpush1.bf16.msra.mxu0 %v8368_v36  ;;  %5719 = vmatprep.subr.bf16.mxu1 %v8382_v39  ;;  %v8457_v36 = vld [vmem:[%s11937_s1 + $0x11a4] ss:$16 sps:$4 sm:$0xff]   ;;  %v8458_v39 = vld [vmem:[%s11937_s1 + $0xda8] ss:$16 sps:$4 sm:$0xff]  }
 0x1c1   :  { %5246 = vmatprep.subr.bf16.mxu0 %v8379_v38  ;;  %v8455_v38 = vld [vmem:[%s11937_s1 + $0x11a0] ss:$16 sps:$4 sm:$0xff]  }
 0x1c2   :  { %5709 = vmatmul.mubr.bf16.vlgmr.msra.gmra.mrb[4].mxu1 %v9028_v49  ;;  %v8469_v49 = vld [vmem:[%s11937_s1 + $0x11e4] ss:$16 sps:$4 sm:$0xff]  }
 0x1c3   :  { %5236 = vmatmul.mubr.bf16.vlgmr.msra.gmra.mrb[0].mxu0 %v10508_v37  ;;  %5720 = vmatpush1.bf16.msra.mxu1 %v8380_v41  ;;  %v8466_v41 = vld [vmem:[%s11937_s1 + $0xdcc] ss:$16 sps:$4 sm:$0xff]  }
 0x1c4   :  { %5247 = vmatpush1.bf16.msra.mxu0 %v8377_v40  ;;  %5721 = vmatprep.subr.bf16.mxu1 %v8388_v45  ;;  %v8463_v40 = vld [vmem:[%s11937_s1 + $0x11c4] ss:$16 sps:$4 sm:$0xff]   ;;  %v8464_v45 = vld [vmem:[%s11937_s1 + $0xdc8] ss:$16 sps:$4 sm:$0xff]  }
 0x1c5   :  { %5248 = vmatprep.subr.bf16.mxu0 %v8385_v42  ;;  %5278 = vmatprep.mubr.bf16.mxu0 %v10531_v47  ;;  %v8461_v42 = vld [vmem:[%s11937_s1 + $0x11c0] ss:$16 sps:$4 sm:$0xff]  }
 0x1c6   :  { %5751 = vmatprep.mubr.bf16.mxu1 %v9029_v55  ;;  %v8481_v55 = vld [vmem:[%s11937_s1 + $0xe0c] ss:$16 sps:$4 sm:$0xff]  }
 0x1c7   :  { %5722 = vmatpush1.bf16.msra.mxu1 %v8386_v52  ;;  %v8467_v52 = vld [vmem:[%s11937_s1 + $0x11e0] ss:$16 sps:$4 sm:$0xff]  }
 0x1c8   :  { %5249 = vmatpush1.bf16.msra.mxu0 %v8383_v50  ;;  %5723 = vmatprep.subr.bf16.mxu1 %v8394_v54  ;;  %v8472_v50 = vld [vmem:[%s11937_s1 + $0xdec] ss:$16 sps:$4 sm:$0xff]   ;;  %v8478_v54 = vld [vmem:[%s11937_s1 + $0x1204] ss:$16 sps:$4 sm:$0xff]  }
 0x1c9   :  { %5250 = vmatprep.subr.bf16.mxu0 %v8391_v53  ;;  %v8470_v53 = vld [vmem:[%s11937_s1 + $0xde8] ss:$16 sps:$4 sm:$0xff]  }
 0x1cb   :  { %5724 = vmatpush1.bf16.msra.mxu1 %v8392_v57  ;;  %v8476_v57 = vld [vmem:[%s11937_s1 + $0x1200] ss:$16 sps:$4 sm:$0xff]  }
 0x1cc   :  { %5251 = vmatpush1.bf16.msra.mxu0 %v8389_v56  ;;  %5725 = vmatprep.subr.bf16.mxu1 %v8400_v59  ;;  %v10724_v56 = vld [vmem:[%s11938_s0 + $0x40] ss:$100 sps:$4 sm:$0xff]  }
 0x1cd   :  { %5252 = vmatprep.subr.bf16.mxu0 %v8397_v58  ;;  %v8479_v58 = vld [vmem:[%s11937_s1 + $0xe08] ss:$16 sps:$4 sm:$0xff]   ;;  %v8484_v59 = vld [vmem:[%s11937_s1 + $0x1224] ss:$16 sps:$4 sm:$0xff]  }
 0x1cf   :  { %5726 = vmatpush1.bf16.msra.mxu1 %v8398_v61  ;;  %v10741_v61 = vld [vmem:[%s11938_s0 + $0x4c] ss:$100 sps:$4 sm:$0xff]  }
 0x1d0   :  { %5253 = vmatpush1.bf16.msra.mxu0 %v8395_v60  ;;  %5727 = vmatprep.subr.bf16.mxu1 %v8406_v63  ;;  %v8487_v60 = vld [vmem:[%s11937_s1 + $0xe2c] ss:$16 sps:$4 sm:$0xff]   ;;  %v8485_v63 = vld [vmem:[%s11937_s1 + $0xe28] ss:$16 sps:$4 sm:$0xff]  }
 0x1d1   :  { %5254 = vmatprep.subr.bf16.mxu0 %v8403_v62  ;;  %v8482_v62 = vld [vmem:[%s11937_s1 + $0x1220] ss:$16 sps:$4 sm:$0xff]  }
 0x1d3   :  { %5728 = vmatpush1.bf16.msra.mxu1 %v8404_v1  ;;  %v8488_v1 = vld [vmem:[%s11937_s1 + $0x1240] ss:$16 sps:$4 sm:$0xff]  }
 0x1d4   :  { %5255 = vmatpush1.bf16.msra.mxu0 %v8401_v0  ;;  %5729 = vmatprep.subr.bf16.mxu1 %v8412_v3  ;;  %v8490_v0 = vld [vmem:[%s11937_s1 + $0x1244] ss:$16 sps:$4 sm:$0xff]  }
 0x1d5   :  { %5256 = vmatprep.subr.bf16.mxu0 %v8409_v2  ;;  %v8491_v2 = vld [vmem:[%s11937_s1 + $0xe48] ss:$16 sps:$4 sm:$0xff]   ;;  %v8496_v3 = vld [vmem:[%s11937_s1 + $0x1264] ss:$16 sps:$4 sm:$0xff]  }
 0x1d7   :  { %5730 = vmatpush1.bf16.msra.mxu1 %v8410_v7  ;;  %v8497_v7 = vld [vmem:[%s11937_s1 + $0xe68] ss:$16 sps:$4 sm:$0xff]  }
 0x1d8   :  { %5257 = vmatpush1.bf16.msra.mxu0 %v8407_v6  ;;  %5731 = vmatprep.subr.bf16.mxu1 %v8418_v9  ;;  %v8494_v6 = vld [vmem:[%s11937_s1 + $0x1260] ss:$16 sps:$4 sm:$0xff]   ;;  %v8505_v9 = vld [vmem:[%s11937_s1 + $0xe8c] ss:$16 sps:$4 sm:$0xff]  }
 0x1d9   :  { %5258 = vmatprep.subr.bf16.mxu0 %v8415_v8  ;;  %v8502_v8 = vld [vmem:[%s11937_s1 + $0x1284] ss:$16 sps:$4 sm:$0xff]  }
 0x1db   :  { %5732 = vmatpush1.bf16.msra.mxu1 %v8416_v12  ;;  %v8503_v12 = vld [vmem:[%s11937_s1 + $0xe88] ss:$16 sps:$4 sm:$0xff]  }
 0x1dc   :  { %5259 = vmatpush1.bf16.msra.mxu0 %v8413_v11  ;;  %5733 = vmatprep.subr.bf16.mxu1 %v8424_v14  ;;  %v8500_v11 = vld [vmem:[%s11937_s1 + $0x1280] ss:$16 sps:$4 sm:$0xff]   ;;  %v8511_v14 = vld [vmem:[%s11937_s1 + $0xeac] ss:$16 sps:$4 sm:$0xff]  }
 0x1dd   :  { %5260 = vmatprep.subr.bf16.mxu0 %v8421_v13  ;;  %v8508_v13 = vld [vmem:[%s11937_s1 + $0x12a4] ss:$16 sps:$4 sm:$0xff]  }
 0x1df   :  { %5734 = vmatpush1.bf16.msra.mxu1 %v8422_v17  ;;  %v8509_v17 = vld [vmem:[%s11937_s1 + $0xea8] ss:$16 sps:$4 sm:$0xff]  }
 0x1e0   :  { %5261 = vmatpush1.bf16.msra.mxu0 %v8419_v16  ;;  %5735 = vmatprep.subr.bf16.mxu1 %v8430_v19  ;;  %v8506_v16 = vld [vmem:[%s11937_s1 + $0x12a0] ss:$16 sps:$4 sm:$0xff]   ;;  %v8517_v19 = vld [vmem:[%s11937_s1 + $0xecc] ss:$16 sps:$4 sm:$0xff]  }
 0x1e1   :  { %5262 = vmatprep.subr.bf16.mxu0 %v8427_v18  ;;  %v8514_v18 = vld [vmem:[%s11937_s1 + $0x12c4] ss:$16 sps:$4 sm:$0xff]  }
 0x1e3   :  { %5736 = vmatpush1.bf16.msra.mxu1 %v8428_v51  ;;  %v8515_v51 = vld [vmem:[%s11937_s1 + $0xec8] ss:$16 sps:$4 sm:$0xff]  }
 0x1e4   :  { %5263 = vmatpush1.bf16.msra.mxu0 %v8425_v21  ;;  %5737 = vmatprep.subr.bf16.mxu1 %v8436_v5  ;;  %v8512_v21 = vld [vmem:[%s11937_s1 + $0x12c0] ss:$16 sps:$4 sm:$0xff]   ;;  %v8523_v5 = vld [vmem:[%s11937_s1 + $0xeec] ss:$16 sps:$4 sm:$0xff]  }
 0x1e5   :  { %5264 = vmatprep.subr.bf16.mxu0 %v8433_v22  ;;  %v8520_v22 = vld [vmem:[%s11937_s1 + $0x12e4] ss:$16 sps:$4 sm:$0xff]  }
 0x1e7   :  { %5738 = vmatpush1.bf16.msra.mxu1 %v8434_v24  ;;  %v8521_v24 = vld [vmem:[%s11937_s1 + $0xee8] ss:$16 sps:$4 sm:$0xff]  }
 0x1e8   :  { %5265 = vmatpush1.bf16.msra.mxu0 %v8431_v23  ;;  %5739 = vmatprep.subr.bf16.mxu1 %v8442_v34  ;;  %v8518_v23 = vld [vmem:[%s11937_s1 + $0x12e0] ss:$16 sps:$4 sm:$0xff]   ;;  %v8529_v34 = vld [vmem:[%s11937_s1 + $0xf0c] ss:$16 sps:$4 sm:$0xff]  }
 0x1e9   :  { %5266 = vmatprep.subr.bf16.mxu0 %v8439_v25  ;;  %v8526_v25 = vld [vmem:[%s11937_s1 + $0x1304] ss:$16 sps:$4 sm:$0xff]  }
 0x1eb   :  { %5740 = vmatpush1.bf16.msra.mxu1 %v8440_v10  ;;  %v8527_v10 = vld [vmem:[%s11937_s1 + $0xf08] ss:$16 sps:$4 sm:$0xff]  }
 0x1ec   :  { %5267 = vmatpush1.bf16.msra.mxu0 %v8437_v26  ;;  %5741 = vmatprep.subr.bf16.mxu1 %v8448_v28  ;;  %v8524_v26 = vld [vmem:[%s11937_s1 + $0x1300] ss:$16 sps:$4 sm:$0xff]   ;;  %v8535_v28 = vld [vmem:[%s11937_s1 + $0xf2c] ss:$16 sps:$4 sm:$0xff]  }
 0x1ed   :  { %5268 = vmatprep.subr.bf16.mxu0 %v8445_v27  ;;  %v8532_v27 = vld [vmem:[%s11937_s1 + $0x1324] ss:$16 sps:$4 sm:$0xff]  }
 0x1ef   :  { %5742 = vmatpush1.bf16.msra.mxu1 %v8446_v30  ;;  %v8533_v30 = vld [vmem:[%s11937_s1 + $0xf28] ss:$16 sps:$4 sm:$0xff]  }
 0x1f0   :  { %5269 = vmatpush1.bf16.msra.mxu0 %v8443_v4  ;;  %5743 = vmatprep.subr.bf16.mxu1 %v8454_v32  ;;  %v8530_v4 = vld [vmem:[%s11937_s1 + $0x1320] ss:$16 sps:$4 sm:$0xff]   ;;  %v8541_v32 = vld [vmem:[%s11937_s1 + $0xf4c] ss:$16 sps:$4 sm:$0xff]  }
 0x1f1   :  { %5270 = vmatprep.subr.bf16.mxu0 %v8451_v31  ;;  %v8538_v31 = vld [vmem:[%s11937_s1 + $0x1344] ss:$16 sps:$4 sm:$0xff]  }
 0x1f3   :  { %5744 = vmatpush1.bf16.msra.mxu1 %v8452_v33  ;;  %v8539_v33 = vld [vmem:[%s11937_s1 + $0xf48] ss:$16 sps:$4 sm:$0xff]  }
 0x1f4   :  { %5271 = vmatpush1.bf16.msra.mxu0 %v8449_v15  ;;  %5745 = vmatprep.subr.bf16.mxu1 %v8460_v20  ;;  %v8536_v15 = vld [vmem:[%s11937_s1 + $0x1340] ss:$16 sps:$4 sm:$0xff]   ;;  %v8547_v20 = vld [vmem:[%s11937_s1 + $0xf6c] ss:$16 sps:$4 sm:$0xff]  }
 0x1f5   :  { %5272 = vmatprep.subr.bf16.mxu0 %v8457_v36  ;;  %v8544_v36 = vld [vmem:[%s11937_s1 + $0x1364] ss:$16 sps:$4 sm:$0xff]  }
 0x1f7   :  { %5746 = vmatpush1.bf16.msra.mxu1 %v8458_v39  ;;  %v8545_v39 = vld [vmem:[%s11937_s1 + $0xf68] ss:$16 sps:$4 sm:$0xff]  }
 0x1f8   :  { %5273 = vmatpush1.bf16.msra.mxu0 %v8455_v38  ;;  %5747 = vmatprep.subr.bf16.mxu1 %v8466_v41  ;;  %v8542_v38 = vld [vmem:[%s11937_s1 + $0x1360] ss:$16 sps:$4 sm:$0xff]   ;;  %v8553_v41 = vld [vmem:[%s11937_s1 + $0xf8c] ss:$16 sps:$4 sm:$0xff]  }
 0x1f9   :  { %5274 = vmatprep.subr.bf16.mxu0 %v8463_v40  ;;  %v8550_v40 = vld [vmem:[%s11937_s1 + $0x1384] ss:$16 sps:$4 sm:$0xff]  }
 0x1fb   :  { %5748 = vmatpush1.bf16.msra.mxu1 %v8464_v45  ;;  %v8551_v45 = vld [vmem:[%s11937_s1 + $0xf88] ss:$16 sps:$4 sm:$0xff]  }
 0x1fc   :  { %5275 = vmatpush1.bf16.msra.mxu0 %v8461_v42  ;;  %5749 = vmatprep.subr.bf16.mxu1 %v8472_v50  ;;  %v8548_v42 = vld [vmem:[%s11937_s1 + $0x1380] ss:$16 sps:$4 sm:$0xff]   ;;  %v8559_v50 = vld [vmem:[%s11937_s1 + $0xfac] ss:$16 sps:$4 sm:$0xff]  }
 0x1fd   :  { %5276 = vmatprep.subr.bf16.mxu0 %v8469_v49  ;;  %v8556_v49 = vld [vmem:[%s11937_s1 + $0x13a4] ss:$16 sps:$4 sm:$0xff]  }
 0x1ff   :  { %5750 = vmatpush1.bf16.msra.mxu1 %v8470_v53  ;;  %v8557_v53 = vld [vmem:[%s11937_s1 + $0xfa8] ss:$16 sps:$4 sm:$0xff]  }
 0x200   :  { %5277 = vmatpush1.bf16.msra.mxu0 %v8467_v52  ;;  %5762 = vmatprep.subr.bf16.mxu1 %v8481_v55  ;;  %v8554_v52 = vld [vmem:[%s11937_s1 + $0x13a0] ss:$16 sps:$4 sm:$0xff]   ;;  %v8565_v55 = vld [vmem:[%s11937_s1 + $0xfcc] ss:$16 sps:$4 sm:$0xff]  }
 0x201   :  { %5289 = vmatprep.subr.bf16.mxu0 %v8478_v54  ;;  %v8562_v54 = vld [vmem:[%s11937_s1 + $0x13c4] ss:$16 sps:$4 sm:$0xff]  }
 0x202   :  { %5752 = vmatmul.mubr.bf16.vlgmr.msra.gmra.mrb[4].mxu1 %v10298_v29  ;;  %v8493_v29 = vld [vmem:[%s11937_s1 + $0xe4c] ss:$16 sps:$4 sm:$0xff]  }
 0x203   :  { %5279 = vmatmul.mubr.bf16.vlgmr.msra.gmra.mrb[0].mxu0 %v10724_v56  ;;  %5763 = vmatpush1.bf16.msra.mxu1 %v8479_v58  ;;  %v8563_v58 = vld [vmem:[%s11937_s1 + $0xfc8] ss:$16 sps:$4 sm:$0xff]  }
 0x204   :  { %5290 = vmatpush1.bf16.msra.mxu0 %v8476_v57  ;;  %5764 = vmatprep.subr.bf16.mxu1 %v8487_v60  ;;  %v8560_v57 = vld [vmem:[%s11937_s1 + $0x13c0] ss:$16 sps:$4 sm:$0xff]   ;;  %v8571_v60 = vld [vmem:[%s11937_s1 + $0xfec] ss:$16 sps:$4 sm:$0xff]  }
 0x205   :  { %5291 = vmatprep.subr.bf16.mxu0 %v8484_v59  ;;  %5321 = vmatprep.mubr.bf16.mxu0 %v10741_v61  ;;  %v8568_v59 = vld [vmem:[%s11937_s1 + $0x13e4] ss:$16 sps:$4 sm:$0xff]  }
 0x206   :  { %5794 = vmatprep.mubr.bf16.mxu1 %v10321_v35  ;;  %v8499_v35 = vld [vmem:[%s11937_s1 + $0xe6c] ss:$16 sps:$4 sm:$0xff]  }
 0x207   :  { %5765 = vmatpush1.bf16.msra.mxu1 %v8485_v63  ;;  %v8569_v63 = vld [vmem:[%s11937_s1 + $0xfe8] ss:$16 sps:$4 sm:$0xff]  }
 0x208   :  { %5292 = vmatpush1.bf16.msra.mxu0 %v8482_v62  ;;  %5766 = vmatprep.subr.bf16.mxu1 %v8493_v29  ;;  %v8566_v62 = vld [vmem:[%s11937_s1 + $0x13e0] ss:$16 sps:$4 sm:$0xff]   ;;  %v8580_v29 = vld [vmem:[%s11937_s1 + $0x100c] ss:$16 sps:$4 sm:$0xff]  }
 0x209   :  { %5293 = vmatprep.subr.bf16.mxu0 %v8490_v0  ;;  %v8577_v0 = vld [vmem:[%s11937_s1 + $0x1404] ss:$16 sps:$4 sm:$0xff]  }
 0x20b   :  { %5767 = vmatpush1.bf16.msra.mxu1 %v8491_v2  ;;  %v8575_v2 = vld [vmem:[%s11937_s1 + $0x1400] ss:$16 sps:$4 sm:$0xff]  }
 0x20c   :  { %5294 = vmatpush1.bf16.msra.mxu0 %v8488_v1  ;;  %5768 = vmatprep.subr.bf16.mxu1 %v8499_v35  ;;  %v10930_v1 = vld [vmem:[%s11938_s0 + $0x48] ss:$100 sps:$4 sm:$0xff]   ;;  %v8583_v35 = vld [vmem:[%s11937_s1 + $0x1424] ss:$16 sps:$4 sm:$0xff]  }
 0x20d   :  { %5295 = vmatprep.subr.bf16.mxu0 %v8496_v3  ;;  %v8578_v3 = vld [vmem:[%s11937_s1 + $0x1008] ss:$16 sps:$4 sm:$0xff]  }
 0x20f   :  { %5769 = vmatpush1.bf16.msra.mxu1 %v8497_v7  ;;  %v10947_v7 = vld [vmem:[%s11938_s0 + $0x54] ss:$100 sps:$4 sm:$0xff]  }
 0x210   :  { %5296 = vmatpush1.bf16.msra.mxu0 %v8494_v6  ;;  %5770 = vmatprep.subr.bf16.mxu1 %v8505_v9  ;;  %v8586_v6 = vld [vmem:[%s11937_s1 + $0x102c] ss:$16 sps:$4 sm:$0xff]   ;;  %v8584_v9 = vld [vmem:[%s11937_s1 + $0x1028] ss:$16 sps:$4 sm:$0xff]  }
 0x211   :  { %5297 = vmatprep.subr.bf16.mxu0 %v8502_v8  ;;  %v8581_v8 = vld [vmem:[%s11937_s1 + $0x1420] ss:$16 sps:$4 sm:$0xff]  }
 0x213   :  { %5771 = vmatpush1.bf16.msra.mxu1 %v8503_v12  ;;  %v8587_v12 = vld [vmem:[%s11937_s1 + $0x1440] ss:$16 sps:$4 sm:$0xff]  }
 0x214   :  { %5298 = vmatpush1.bf16.msra.mxu0 %v8500_v11  ;;  %5772 = vmatprep.subr.bf16.mxu1 %v8511_v14  ;;  %v8589_v11 = vld [vmem:[%s11937_s1 + $0x1444] ss:$16 sps:$4 sm:$0xff]  }
 0x215   :  { %5299 = vmatprep.subr.bf16.mxu0 %v8508_v13  ;;  %v8590_v13 = vld [vmem:[%s11937_s1 + $0x1048] ss:$16 sps:$4 sm:$0xff]   ;;  %v8595_v14 = vld [vmem:[%s11937_s1 + $0x1464] ss:$16 sps:$4 sm:$0xff]  }
 0x217   :  { %5773 = vmatpush1.bf16.msra.mxu1 %v8509_v17  ;;  %v8596_v17 = vld [vmem:[%s11937_s1 + $0x1068] ss:$16 sps:$4 sm:$0xff]  }
 0x218   :  { %5300 = vmatpush1.bf16.msra.mxu0 %v8506_v16  ;;  %5774 = vmatprep.subr.bf16.mxu1 %v8517_v19  ;;  %v8593_v16 = vld [vmem:[%s11937_s1 + $0x1460] ss:$16 sps:$4 sm:$0xff]   ;;  %v8604_v19 = vld [vmem:[%s11937_s1 + $0x108c] ss:$16 sps:$4 sm:$0xff]  }
 0x219   :  { %5301 = vmatprep.subr.bf16.mxu0 %v8514_v18  ;;  %v8601_v18 = vld [vmem:[%s11937_s1 + $0x1484] ss:$16 sps:$4 sm:$0xff]  }
 0x21b   :  { %5775 = vmatpush1.bf16.msra.mxu1 %v8515_v51  ;;  %v8602_v51 = vld [vmem:[%s11937_s1 + $0x1088] ss:$16 sps:$4 sm:$0xff]  }
 0x21c   :  { %5302 = vmatpush1.bf16.msra.mxu0 %v8512_v21  ;;  %5776 = vmatprep.subr.bf16.mxu1 %v8523_v5  ;;  %v8599_v21 = vld [vmem:[%s11937_s1 + $0x1480] ss:$16 sps:$4 sm:$0xff]   ;;  %v8610_v5 = vld [vmem:[%s11937_s1 + $0x10ac] ss:$16 sps:$4 sm:$0xff]  }
 0x21d   :  { %5303 = vmatprep.subr.bf16.mxu0 %v8520_v22  ;;  %v8607_v22 = vld [vmem:[%s11937_s1 + $0x14a4] ss:$16 sps:$4 sm:$0xff]  }
 0x21f   :  { %5777 = vmatpush1.bf16.msra.mxu1 %v8521_v24  ;;  %v8608_v24 = vld [vmem:[%s11937_s1 + $0x10a8] ss:$16 sps:$4 sm:$0xff]  }
 0x220   :  { %5304 = vmatpush1.bf16.msra.mxu0 %v8518_v23  ;;  %5778 = vmatprep.subr.bf16.mxu1 %v8529_v34  ;;  %v8605_v23 = vld [vmem:[%s11937_s1 + $0x14a0] ss:$16 sps:$4 sm:$0xff]   ;;  %v8616_v34 = vld [vmem:[%s11937_s1 + $0x10cc] ss:$16 sps:$4 sm:$0xff]  }
 0x221   :  { %5305 = vmatprep.subr.bf16.mxu0 %v8526_v25  ;;  %v8613_v25 = vld [vmem:[%s11937_s1 + $0x14c4] ss:$16 sps:$4 sm:$0xff]  }
 0x223   :  { %5779 = vmatpush1.bf16.msra.mxu1 %v8527_v10  ;;  %v8614_v10 = vld [vmem:[%s11937_s1 + $0x10c8] ss:$16 sps:$4 sm:$0xff]  }
 0x224   :  { %5306 = vmatpush1.bf16.msra.mxu0 %v8524_v26  ;;  %5780 = vmatprep.subr.bf16.mxu1 %v8535_v28  ;;  %v8611_v26 = vld [vmem:[%s11937_s1 + $0x14c0] ss:$16 sps:$4 sm:$0xff]   ;;  %v8622_v28 = vld [vmem:[%s11937_s1 + $0x10ec] ss:$16 sps:$4 sm:$0xff]  }
 0x225   :  { %5307 = vmatprep.subr.bf16.mxu0 %v8532_v27  ;;  %v8619_v27 = vld [vmem:[%s11937_s1 + $0x14e4] ss:$16 sps:$4 sm:$0xff]  }
 0x227   :  { %5781 = vmatpush1.bf16.msra.mxu1 %v8533_v30  ;;  %v8620_v30 = vld [vmem:[%s11937_s1 + $0x10e8] ss:$16 sps:$4 sm:$0xff]  }
 0x228   :  { %5308 = vmatpush1.bf16.msra.mxu0 %v8530_v4  ;;  %5782 = vmatprep.subr.bf16.mxu1 %v8541_v32  ;;  %v8617_v4 = vld [vmem:[%s11937_s1 + $0x14e0] ss:$16 sps:$4 sm:$0xff]   ;;  %v8628_v32 = vld [vmem:[%s11937_s1 + $0x110c] ss:$16 sps:$4 sm:$0xff]  }
 0x229   :  { %5309 = vmatprep.subr.bf16.mxu0 %v8538_v31  ;;  %v8625_v31 = vld [vmem:[%s11937_s1 + $0x1504] ss:$16 sps:$4 sm:$0xff]  }
 0x22b   :  { %5783 = vmatpush1.bf16.msra.mxu1 %v8539_v33  ;;  %v8626_v33 = vld [vmem:[%s11937_s1 + $0x1108] ss:$16 sps:$4 sm:$0xff]  }
 0x22c   :  { %5310 = vmatpush1.bf16.msra.mxu0 %v8536_v15  ;;  %5784 = vmatprep.subr.bf16.mxu1 %v8547_v20  ;;  %v8623_v15 = vld [vmem:[%s11937_s1 + $0x1500] ss:$16 sps:$4 sm:$0xff]   ;;  %v8634_v20 = vld [vmem:[%s11937_s1 + $0x112c] ss:$16 sps:$4 sm:$0xff]  }
 0x22d   :  { %5311 = vmatprep.subr.bf16.mxu0 %v8544_v36  ;;  %v8631_v36 = vld [vmem:[%s11937_s1 + $0x1524] ss:$16 sps:$4 sm:$0xff]  }
 0x22f   :  { %5785 = vmatpush1.bf16.msra.mxu1 %v8545_v39  ;;  %v8632_v39 = vld [vmem:[%s11937_s1 + $0x1128] ss:$16 sps:$4 sm:$0xff]  }
 0x230   :  { %5312 = vmatpush1.bf16.msra.mxu0 %v8542_v38  ;;  %5786 = vmatprep.subr.bf16.mxu1 %v8553_v41  ;;  %v8629_v38 = vld [vmem:[%s11937_s1 + $0x1520] ss:$16 sps:$4 sm:$0xff]   ;;  %v8640_v41 = vld [vmem:[%s11937_s1 + $0x114c] ss:$16 sps:$4 sm:$0xff]  }
 0x231   :  { %5313 = vmatprep.subr.bf16.mxu0 %v8550_v40  ;;  %v8637_v40 = vld [vmem:[%s11937_s1 + $0x1544] ss:$16 sps:$4 sm:$0xff]  }
 0x233   :  { %5787 = vmatpush1.bf16.msra.mxu1 %v8551_v45  ;;  %v8638_v45 = vld [vmem:[%s11937_s1 + $0x1148] ss:$16 sps:$4 sm:$0xff]  }
 0x234   :  { %5314 = vmatpush1.bf16.msra.mxu0 %v8548_v42  ;;  %5788 = vmatprep.subr.bf16.mxu1 %v8559_v50  ;;  %v8635_v42 = vld [vmem:[%s11937_s1 + $0x1540] ss:$16 sps:$4 sm:$0xff]   ;;  %v8646_v50 = vld [vmem:[%s11937_s1 + $0x116c] ss:$16 sps:$4 sm:$0xff]  }
 0x235   :  { %5315 = vmatprep.subr.bf16.mxu0 %v8556_v49  ;;  %v8643_v49 = vld [vmem:[%s11937_s1 + $0x1564] ss:$16 sps:$4 sm:$0xff]  }
 0x237   :  { %5789 = vmatpush1.bf16.msra.mxu1 %v8557_v53  ;;  %v8644_v53 = vld [vmem:[%s11937_s1 + $0x1168] ss:$16 sps:$4 sm:$0xff]  }
 0x238   :  { %5316 = vmatpush1.bf16.msra.mxu0 %v8554_v52  ;;  %5790 = vmatprep.subr.bf16.mxu1 %v8565_v55  ;;  %v8641_v52 = vld [vmem:[%s11937_s1 + $0x1560] ss:$16 sps:$4 sm:$0xff]   ;;  %v8652_v55 = vld [vmem:[%s11937_s1 + $0x118c] ss:$16 sps:$4 sm:$0xff]  }
 0x239   :  { %5317 = vmatprep.subr.bf16.mxu0 %v8562_v54  ;;  %v8649_v54 = vld [vmem:[%s11937_s1 + $0x1584] ss:$16 sps:$4 sm:$0xff]  }
 0x23b   :  { %5791 = vmatpush1.bf16.msra.mxu1 %v8563_v58  ;;  %v8650_v58 = vld [vmem:[%s11937_s1 + $0x1188] ss:$16 sps:$4 sm:$0xff]  }
 0x23c   :  { %5318 = vmatpush1.bf16.msra.mxu0 %v8560_v57  ;;  %5792 = vmatprep.subr.bf16.mxu1 %v8571_v60  ;;  %v8647_v57 = vld [vmem:[%s11937_s1 + $0x1580] ss:$16 sps:$4 sm:$0xff]   ;;  %v8658_v60 = vld [vmem:[%s11937_s1 + $0x11ac] ss:$16 sps:$4 sm:$0xff]  }
 0x23d   :  { %5319 = vmatprep.subr.bf16.mxu0 %v8568_v59  ;;  %v8655_v59 = vld [vmem:[%s11937_s1 + $0x15a4] ss:$16 sps:$4 sm:$0xff]  }
 0x23f   :  { %5793 = vmatpush1.bf16.msra.mxu1 %v8569_v63  ;;  %v8656_v63 = vld [vmem:[%s11937_s1 + $0x11a8] ss:$16 sps:$4 sm:$0xff]  }
 0x240   :  { %5320 = vmatpush1.bf16.msra.mxu0 %v8566_v62  ;;  %5805 = vmatprep.subr.bf16.mxu1 %v8580_v29  ;;  %v8653_v62 = vld [vmem:[%s11937_s1 + $0x15a0] ss:$16 sps:$4 sm:$0xff]   ;;  %v8664_v29 = vld [vmem:[%s11937_s1 + $0x11cc] ss:$16 sps:$4 sm:$0xff]  }
 0x241   :  { %5332 = vmatprep.subr.bf16.mxu0 %v8577_v0  ;;  %v8661_v0 = vld [vmem:[%s11937_s1 + $0x15c4] ss:$16 sps:$4 sm:$0xff]  }
 0x242   :  { %5795 = vmatmul.mubr.bf16.vlgmr.msra.gmra.mrb[4].mxu1 %v10508_v37  ;;  %v8592_v37 = vld [vmem:[%s11937_s1 + $0x104c] ss:$16 sps:$4 sm:$0xff]  }
 0x243   :  { %5322 = vmatmul.mubr.bf16.vlgmr.msra.gmra.mrb[0].mxu0 %v10930_v1  ;;  %5806 = vmatpush1.bf16.msra.mxu1 %v8578_v3  ;;  %v8662_v3 = vld [vmem:[%s11937_s1 + $0x11c8] ss:$16 sps:$4 sm:$0xff]  }
 0x244   :  { %5333 = vmatpush1.bf16.msra.mxu0 %v8575_v2  ;;  %5807 = vmatprep.subr.bf16.mxu1 %v8586_v6  ;;  %v8659_v2 = vld [vmem:[%s11937_s1 + $0x15c0] ss:$16 sps:$4 sm:$0xff]   ;;  %v8670_v6 = vld [vmem:[%s11937_s1 + $0x11ec] ss:$16 sps:$4 sm:$0xff]  }
 0x245   :  { %5334 = vmatprep.subr.bf16.mxu0 %v8583_v35  ;;  %5364 = vmatprep.mubr.bf16.mxu0 %v10947_v7  ;;  %v8667_v35 = vld [vmem:[%s11937_s1 + $0x15e4] ss:$16 sps:$4 sm:$0xff]  }
 0x246   :  { %5837 = vmatprep.mubr.bf16.mxu1 %v10531_v47  ;;  %v8598_v47 = vld [vmem:[%s11937_s1 + $0x106c] ss:$16 sps:$4 sm:$0xff]  }
 0x247   :  { %5808 = vmatpush1.bf16.msra.mxu1 %v8584_v9  ;;  %v8668_v9 = vld [vmem:[%s11937_s1 + $0x11e8] ss:$16 sps:$4 sm:$0xff]  }
 0x248   :  { %5335 = vmatpush1.bf16.msra.mxu0 %v8581_v8  ;;  %5809 = vmatprep.subr.bf16.mxu1 %v8592_v37  ;;  %v8665_v8 = vld [vmem:[%s11937_s1 + $0x15e0] ss:$16 sps:$4 sm:$0xff]   ;;  %v8679_v37 = vld [vmem:[%s11937_s1 + $0x120c] ss:$16 sps:$4 sm:$0xff]  }
 0x249   :  { %5336 = vmatprep.subr.bf16.mxu0 %v8589_v11  ;;  %v8676_v11 = vld [vmem:[%s11937_s1 + $0x1604] ss:$16 sps:$4 sm:$0xff]  }
 0x24b   :  { %5810 = vmatpush1.bf16.msra.mxu1 %v8590_v13  ;;  %v8674_v13 = vld [vmem:[%s11937_s1 + $0x1600] ss:$16 sps:$4 sm:$0xff]  }
 0x24c   :  { %5337 = vmatpush1.bf16.msra.mxu0 %v8587_v12  ;;  %5811 = vmatprep.subr.bf16.mxu1 %v8598_v47  ;;  %v11136_v12 = vld [vmem:[%s11938_s0 + $0x50] ss:$100 sps:$4 sm:$0xff]  }
 0x24d   :  { %5338 = vmatprep.subr.bf16.mxu0 %v8595_v14  ;;  %v8677_v14 = vld [vmem:[%s11937_s1 + $0x1208] ss:$16 sps:$4 sm:$0xff]   ;;  %v8682_v47 = vld [vmem:[%s11937_s1 + $0x1624] ss:$16 sps:$4 sm:$0xff]  }
 0x24f   :  { %5812 = vmatpush1.bf16.msra.mxu1 %v8596_v17  ;;  %v11153_v17 = vld [vmem:[%s11938_s0 + $0x5c] ss:$100 sps:$4 sm:$0xff]  }
 0x250   :  { %5339 = vmatpush1.bf16.msra.mxu0 %v8593_v16  ;;  %5813 = vmatprep.subr.bf16.mxu1 %v8604_v19  ;;  %v8685_v16 = vld [vmem:[%s11937_s1 + $0x122c] ss:$16 sps:$4 sm:$0xff]   ;;  %v8683_v19 = vld [vmem:[%s11937_s1 + $0x1228] ss:$16 sps:$4 sm:$0xff]  }
 0x251   :  { %5340 = vmatprep.subr.bf16.mxu0 %v8601_v18  ;;  %v8680_v18 = vld [vmem:[%s11937_s1 + $0x1620] ss:$16 sps:$4 sm:$0xff]  }
 0x253   :  { %5814 = vmatpush1.bf16.msra.mxu1 %v8602_v51  ;;  %v8686_v51 = vld [vmem:[%s11937_s1 + $0x1640] ss:$16 sps:$4 sm:$0xff]  }
 0x254   :  { %5341 = vmatpush1.bf16.msra.mxu0 %v8599_v21  ;;  %5815 = vmatprep.subr.bf16.mxu1 %v8610_v5  ;;  %v8688_v21 = vld [vmem:[%s11937_s1 + $0x1644] ss:$16 sps:$4 sm:$0xff]  }
 0x255   :  { %5342 = vmatprep.subr.bf16.mxu0 %v8607_v22  ;;  %v8689_v22 = vld [vmem:[%s11937_s1 + $0x1248] ss:$16 sps:$4 sm:$0xff]   ;;  %v8694_v5 = vld [vmem:[%s11937_s1 + $0x1664] ss:$16 sps:$4 sm:$0xff]  }
 0x257   :  { %5816 = vmatpush1.bf16.msra.mxu1 %v8608_v24  ;;  %v8695_v24 = vld [vmem:[%s11937_s1 + $0x1268] ss:$16 sps:$4 sm:$0xff]  }
 0x258   :  { %5343 = vmatpush1.bf16.msra.mxu0 %v8605_v23  ;;  %5817 = vmatprep.subr.bf16.mxu1 %v8616_v34  ;;  %v8692_v23 = vld [vmem:[%s11937_s1 + $0x1660] ss:$16 sps:$4 sm:$0xff]   ;;  %v8703_v34 = vld [vmem:[%s11937_s1 + $0x128c] ss:$16 sps:$4 sm:$0xff]  }
 0x259   :  { %5344 = vmatprep.subr.bf16.mxu0 %v8613_v25  ;;  %v8700_v25 = vld [vmem:[%s11937_s1 + $0x1684] ss:$16 sps:$4 sm:$0xff]  }
 0x25b   :  { %5818 = vmatpush1.bf16.msra.mxu1 %v8614_v10  ;;  %v8701_v10 = vld [vmem:[%s11937_s1 + $0x1288] ss:$16 sps:$4 sm:$0xff]  }
 0x25c   :  { %5345 = vmatpush1.bf16.msra.mxu0 %v8611_v26  ;;  %5819 = vmatprep.subr.bf16.mxu1 %v8622_v28  ;;  %v8698_v26 = vld [vmem:[%s11937_s1 + $0x1680] ss:$16 sps:$4 sm:$0xff]   ;;  %v8709_v28 = vld [vmem:[%s11937_s1 + $0x12ac] ss:$16 sps:$4 sm:$0xff]  }
 0x25d   :  { %5346 = vmatprep.subr.bf16.mxu0 %v8619_v27  ;;  %v8706_v27 = vld [vmem:[%s11937_s1 + $0x16a4] ss:$16 sps:$4 sm:$0xff]  }
 0x25f   :  { %5820 = vmatpush1.bf16.msra.mxu1 %v8620_v30  ;;  %v8707_v30 = vld [vmem:[%s11937_s1 + $0x12a8] ss:$16 sps:$4 sm:$0xff]  }
 0x260   :  { %5347 = vmatpush1.bf16.msra.mxu0 %v8617_v4  ;;  %5821 = vmatprep.subr.bf16.mxu1 %v8628_v32  ;;  %v8704_v4 = vld [vmem:[%s11937_s1 + $0x16a0] ss:$16 sps:$4 sm:$0xff]   ;;  %v8715_v32 = vld [vmem:[%s11937_s1 + $0x12cc] ss:$16 sps:$4 sm:$0xff]  }
 0x261   :  { %5348 = vmatprep.subr.bf16.mxu0 %v8625_v31  ;;  %v8712_v31 = vld [vmem:[%s11937_s1 + $0x16c4] ss:$16 sps:$4 sm:$0xff]  }
 0x263   :  { %5822 = vmatpush1.bf16.msra.mxu1 %v8626_v33  ;;  %v8713_v33 = vld [vmem:[%s11937_s1 + $0x12c8] ss:$16 sps:$4 sm:$0xff]  }
 0x264   :  { %5349 = vmatpush1.bf16.msra.mxu0 %v8623_v15  ;;  %5823 = vmatprep.subr.bf16.mxu1 %v8634_v20  ;;  %v8710_v15 = vld [vmem:[%s11937_s1 + $0x16c0] ss:$16 sps:$4 sm:$0xff]   ;;  %v8721_v20 = vld [vmem:[%s11937_s1 + $0x12ec] ss:$16 sps:$4 sm:$0xff]  }
 0x265   :  { %5350 = vmatprep.subr.bf16.mxu0 %v8631_v36  ;;  %v8718_v36 = vld [vmem:[%s11937_s1 + $0x16e4] ss:$16 sps:$4 sm:$0xff]  }
 0x267   :  { %5824 = vmatpush1.bf16.msra.mxu1 %v8632_v39  ;;  %v8719_v39 = vld [vmem:[%s11937_s1 + $0x12e8] ss:$16 sps:$4 sm:$0xff]  }
 0x268   :  { %5351 = vmatpush1.bf16.msra.mxu0 %v8629_v38  ;;  %5825 = vmatprep.subr.bf16.mxu1 %v8640_v41  ;;  %v8716_v38 = vld [vmem:[%s11937_s1 + $0x16e0] ss:$16 sps:$4 sm:$0xff]   ;;  %v8727_v41 = vld [vmem:[%s11937_s1 + $0x130c] ss:$16 sps:$4 sm:$0xff]  }
 0x269   :  { %5352 = vmatprep.subr.bf16.mxu0 %v8637_v40  ;;  %v8724_v40 = vld [vmem:[%s11937_s1 + $0x1704] ss:$16 sps:$4 sm:$0xff]  }
 0x26b   :  { %5826 = vmatpush1.bf16.msra.mxu1 %v8638_v45  ;;  %v8725_v45 = vld [vmem:[%s11937_s1 + $0x1308] ss:$16 sps:$4 sm:$0xff]  }
 0x26c   :  { %5353 = vmatpush1.bf16.msra.mxu0 %v8635_v42  ;;  %5827 = vmatprep.subr.bf16.mxu1 %v8646_v50  ;;  %v8722_v42 = vld [vmem:[%s11937_s1 + $0x1700] ss:$16 sps:$4 sm:$0xff]   ;;  %v8733_v50 = vld [vmem:[%s11937_s1 + $0x132c] ss:$16 sps:$4 sm:$0xff]  }
 0x26d   :  { %5354 = vmatprep.subr.bf16.mxu0 %v8643_v49  ;;  %v8730_v49 = vld [vmem:[%s11937_s1 + $0x1724] ss:$16 sps:$4 sm:$0xff]  }
 0x26f   :  { %5828 = vmatpush1.bf16.msra.mxu1 %v8644_v53  ;;  %v8731_v53 = vld [vmem:[%s11937_s1 + $0x1328] ss:$16 sps:$4 sm:$0xff]  }
 0x270   :  { %5355 = vmatpush1.bf16.msra.mxu0 %v8641_v52  ;;  %5829 = vmatprep.subr.bf16.mxu1 %v8652_v55  ;;  %v8728_v52 = vld [vmem:[%s11937_s1 + $0x1720] ss:$16 sps:$4 sm:$0xff]   ;;  %v8739_v55 = vld [vmem:[%s11937_s1 + $0x134c] ss:$16 sps:$4 sm:$0xff]  }
 0x271   :  { %5356 = vmatprep.subr.bf16.mxu0 %v8649_v54  ;;  %v8736_v54 = vld [vmem:[%s11937_s1 + $0x1744] ss:$16 sps:$4 sm:$0xff]  }
 0x273   :  { %5830 = vmatpush1.bf16.msra.mxu1 %v8650_v58  ;;  %v8737_v58 = vld [vmem:[%s11937_s1 + $0x1348] ss:$16 sps:$4 sm:$0xff]  }
 0x274   :  { %5357 = vmatpush1.bf16.msra.mxu0 %v8647_v57  ;;  %5831 = vmatprep.subr.bf16.mxu1 %v8658_v60  ;;  %v8734_v57 = vld [vmem:[%s11937_s1 + $0x1740] ss:$16 sps:$4 sm:$0xff]   ;;  %v8745_v60 = vld [vmem:[%s11937_s1 + $0x136c] ss:$16 sps:$4 sm:$0xff]  }
 0x275   :  { %5358 = vmatprep.subr.bf16.mxu0 %v8655_v59  ;;  %v8742_v59 = vld [vmem:[%s11937_s1 + $0x1764] ss:$16 sps:$4 sm:$0xff]  }
 0x277   :  { %5832 = vmatpush1.bf16.msra.mxu1 %v8656_v63  ;;  %v8743_v63 = vld [vmem:[%s11937_s1 + $0x1368] ss:$16 sps:$4 sm:$0xff]  }
 0x278   :  { %5359 = vmatpush1.bf16.msra.mxu0 %v8653_v62  ;;  %5833 = vmatprep.subr.bf16.mxu1 %v8664_v29  ;;  %v8740_v62 = vld [vmem:[%s11937_s1 + $0x1760] ss:$16 sps:$4 sm:$0xff]   ;;  %v8751_v29 = vld [vmem:[%s11937_s1 + $0x138c] ss:$16 sps:$4 sm:$0xff]  }
 0x279   :  { %5360 = vmatprep.subr.bf16.mxu0 %v8661_v0  ;;  %v8748_v0 = vld [vmem:[%s11937_s1 + $0x1784] ss:$16 sps:$4 sm:$0xff]  }
 0x27b   :  { %5834 = vmatpush1.bf16.msra.mxu1 %v8662_v3  ;;  %v8749_v3 = vld [vmem:[%s11937_s1 + $0x1388] ss:$16 sps:$4 sm:$0xff]  }
 0x27c   :  { %5361 = vmatpush1.bf16.msra.mxu0 %v8659_v2  ;;  %5835 = vmatprep.subr.bf16.mxu1 %v8670_v6  ;;  %v8746_v2 = vld [vmem:[%s11937_s1 + $0x1780] ss:$16 sps:$4 sm:$0xff]   ;;  %v8757_v6 = vld [vmem:[%s11937_s1 + $0x13ac] ss:$16 sps:$4 sm:$0xff]  }
 0x27d   :  { %5362 = vmatprep.subr.bf16.mxu0 %v8667_v35  ;;  %v8754_v35 = vld [vmem:[%s11937_s1 + $0x17a4] ss:$16 sps:$4 sm:$0xff]  }
 0x27f   :  { %5836 = vmatpush1.bf16.msra.mxu1 %v8668_v9  ;;  %v8755_v9 = vld [vmem:[%s11937_s1 + $0x13a8] ss:$16 sps:$4 sm:$0xff]  }
 0x280   :  { %5363 = vmatpush1.bf16.msra.mxu0 %v8665_v8  ;;  %5848 = vmatprep.subr.bf16.mxu1 %v8679_v37  ;;  %v8752_v8 = vld [vmem:[%s11937_s1 + $0x17a0] ss:$16 sps:$4 sm:$0xff]   ;;  %v8763_v37 = vld [vmem:[%s11937_s1 + $0x13cc] ss:$16 sps:$4 sm:$0xff]  }
 0x281   :  { %5375 = vmatprep.subr.bf16.mxu0 %v8676_v11  ;;  %v8760_v11 = vld [vmem:[%s11937_s1 + $0x17c4] ss:$16 sps:$4 sm:$0xff]  }
 0x282   :  { %5838 = vmatmul.mubr.bf16.vlgmr.msra.gmra.mrb[4].mxu1 %v10724_v56  ;;  %v8691_v56 = vld [vmem:[%s11937_s1 + $0x124c] ss:$16 sps:$4 sm:$0xff]  }
 0x283   :  { %5365 = vmatmul.mubr.bf16.vlgmr.msra.gmra.mrb[0].mxu0 %v11136_v12  ;;  %5849 = vmatpush1.bf16.msra.mxu1 %v8677_v14  ;;  %v8761_v14 = vld [vmem:[%s11937_s1 + $0x13c8] ss:$16 sps:$4 sm:$0xff]  }
 0x284   :  { %5376 = vmatpush1.bf16.msra.mxu0 %v8674_v13  ;;  %5850 = vmatprep.subr.bf16.mxu1 %v8685_v16  ;;  %v8758_v13 = vld [vmem:[%s11937_s1 + $0x17c0] ss:$16 sps:$4 sm:$0xff]   ;;  %v8769_v16 = vld [vmem:[%s11937_s1 + $0x13ec] ss:$16 sps:$4 sm:$0xff]  }
 0x285   :  { %5377 = vmatprep.subr.bf16.mxu0 %v8682_v47  ;;  %5407 = vmatprep.mubr.bf16.mxu0 %v11153_v17  ;;  %v8766_v47 = vld [vmem:[%s11937_s1 + $0x17e4] ss:$16 sps:$4 sm:$0xff]  }
 0x286   :  { %5880 = vmatprep.mubr.bf16.mxu1 %v10741_v61  ;;  %v8697_v61 = vld [vmem:[%s11937_s1 + $0x126c] ss:$16 sps:$4 sm:$0xff]  }
 0x287   :  { %5851 = vmatpush1.bf16.msra.mxu1 %v8683_v19  ;;  %v8767_v19 = vld [vmem:[%s11937_s1 + $0x13e8] ss:$16 sps:$4 sm:$0xff]  }
 0x288   :  { %5378 = vmatpush1.bf16.msra.mxu0 %v8680_v18  ;;  %5852 = vmatprep.subr.bf16.mxu1 %v8691_v56  ;;  %v8764_v18 = vld [vmem:[%s11937_s1 + $0x17e0] ss:$16 sps:$4 sm:$0xff]   ;;  %v8778_v56 = vld [vmem:[%s11937_s1 + $0x140c] ss:$16 sps:$4 sm:$0xff]  }
 0x289   :  { %5379 = vmatprep.subr.bf16.mxu0 %v8688_v21  ;;  %v8775_v21 = vld [vmem:[%s11937_s1 + $0x1804] ss:$16 sps:$4 sm:$0xff]  }
 0x28b   :  { %5853 = vmatpush1.bf16.msra.mxu1 %v8689_v22  ;;  %v8773_v22 = vld [vmem:[%s11937_s1 + $0x1800] ss:$16 sps:$4 sm:$0xff]  }
 0x28c   :  { %5380 = vmatpush1.bf16.msra.mxu0 %v8686_v51  ;;  %5854 = vmatprep.subr.bf16.mxu1 %v8697_v61  ;;  %v11342_v51 = vld [vmem:[%s11938_s0 + $0x58] ss:$100 sps:$4 sm:$0xff]   ;;  %v8781_v61 = vld [vmem:[%s11937_s1 + $0x1824] ss:$16 sps:$4 sm:$0xff]  }
 0x28d   :  { %5381 = vmatprep.subr.bf16.mxu0 %v8694_v5  ;;  %v8776_v5 = vld [vmem:[%s11937_s1 + $0x1408] ss:$16 sps:$4 sm:$0xff]  }
 0x28f   :  { %5855 = vmatpush1.bf16.msra.mxu1 %v8695_v24  ;;  %v8779_v24 = vld [vmem:[%s11937_s1 + $0x1820] ss:$16 sps:$4 sm:$0xff]  }
 0x290   :  { %5382 = vmatpush1.bf16.msra.mxu0 %v8692_v23  ;;  %5856 = vmatprep.subr.bf16.mxu1 %v8703_v34  ;;  %v8784_v23 = vld [vmem:[%s11937_s1 + $0x142c] ss:$16 sps:$4 sm:$0xff]   ;;  %v8787_v34 = vld [vmem:[%s11937_s1 + $0x1844] ss:$16 sps:$4 sm:$0xff]  }
 0x291   :  { %5383 = vmatprep.subr.bf16.mxu0 %v8700_v25  ;;  %v8782_v25 = vld [vmem:[%s11937_s1 + $0x1428] ss:$16 sps:$4 sm:$0xff]  }
 0x293   :  { %5857 = vmatpush1.bf16.msra.mxu1 %v8701_v10  ;;  %v8785_v10 = vld [vmem:[%s11937_s1 + $0x1840] ss:$16 sps:$4 sm:$0xff]  }
 0x294   :  { %5384 = vmatpush1.bf16.msra.mxu0 %v8698_v26  ;;  %5858 = vmatprep.subr.bf16.mxu1 %v8709_v28  ;;  %v9030_v26 = vmov 0   ;;  %v8793_v28 = vld [vmem:[%s11937_s1 + $0x1864] ss:$16 sps:$4 sm:$0xff]  }
 0x295   :  { %5385 = vmatprep.subr.bf16.mxu0 %v8706_v27  ;;  %v8788_v27 = vld [vmem:[%s11937_s1 + $0x1448] ss:$16 sps:$4 sm:$0xff]  }
 0x297   :  { %5859 = vmatpush1.bf16.msra.mxu1 %v8707_v30  ;;  %v8794_v30 = vld [vmem:[%s11937_s1 + $0x1468] ss:$16 sps:$4 sm:$0xff]  }
 0x298   :  { %5386 = vmatpush1.bf16.msra.mxu0 %v8704_v4  ;;  %5860 = vmatprep.subr.bf16.mxu1 %v8715_v32  ;;  %v8791_v4 = vld [vmem:[%s11937_s1 + $0x1860] ss:$16 sps:$4 sm:$0xff]  }
 0x299   :  { %5387 = vmatprep.subr.bf16.mxu0 %v8712_v31  ;;  %v8800_v31 = vld [vmem:[%s11937_s1 + $0x148c] ss:$16 sps:$4 sm:$0xff]   ;;  %v11396_v32 = vld [vmem:[%s11938_s0 + $0x60] ss:$100 sps:$4 sm:$0xff]  }
 0x29b   :  { %5861 = vmatpush1.bf16.msra.mxu1 %v8713_v33  ;;  %v8803_v33 = vld [vmem:[%s11937_s1 + $0x14ac] ss:$16 sps:$4 sm:$0xff]  }
 0x29c   :  { %5388 = vmatpush1.bf16.msra.mxu0 %v8710_v15  ;;  %5862 = vmatprep.subr.bf16.mxu1 %v8721_v20  ;;  %v8798_v15 = vld [vmem:[%s11937_s1 + $0x1488] ss:$16 sps:$4 sm:$0xff]   ;;  %v8806_v20 = vld [vmem:[%s11937_s1 + $0x14cc] ss:$16 sps:$4 sm:$0xff]  }
 0x29d   :  { %5389 = vmatprep.subr.bf16.mxu0 %v8718_v36  ;;  %v8801_v36 = vld [vmem:[%s11937_s1 + $0x14a8] ss:$16 sps:$4 sm:$0xff]  }
 0x29f   :  { %5863 = vmatpush1.bf16.msra.mxu1 %v8719_v39  ;;  %v8896_v39 = vld [vmem:[%s11939_s3 + $0x4] ss:$8 sps:$4 sm:$0xff]  }
 0x2a0   :  { %5390 = vmatpush1.bf16.msra.mxu0 %v8716_v38  ;;  %5864 = vmatprep.subr.bf16.mxu1 %v8727_v41  ;;  %v8894_v38 = vld [vmem:[%s11939_s3] ss:$8 sps:$4 sm:$0xff]  }
 0x2a1   :  { %5391 = vmatprep.subr.bf16.mxu0 %v8724_v40  ;;  %v8899_v40 = vld [vmem:[%s11939_s3 + $0x14] ss:$8 sps:$4 sm:$0xff]   ;;  %v8804_v41 = vld [vmem:[%s11937_s1 + $0x14c8] ss:$16 sps:$4 sm:$0xff]  }
 0x2a3   :  { %5865 = vmatpush1.bf16.msra.mxu1 %v8725_v45  ;;  %v8897_v45 = vld [vmem:[%s11939_s3 + $0x10] ss:$8 sps:$4 sm:$0xff]  }
 0x2a4   :  { %5392 = vmatpush1.bf16.msra.mxu0 %v8722_v42  ;;  %5866 = vmatprep.subr.bf16.mxu1 %v8733_v50  ;;  %v8809_v42 = vld [vmem:[%s11937_s1 + $0x14ec] ss:$16 sps:$4 sm:$0xff]   ;;  %v8807_v50 = vld [vmem:[%s11937_s1 + $0x14e8] ss:$16 sps:$4 sm:$0xff]  }
 0x2a5   :  { %5393 = vmatprep.subr.bf16.mxu0 %v8730_v49  ;;  %v8902_v49 = vld [vmem:[%s11939_s3 + $0x24] ss:$8 sps:$4 sm:$0xff]  }
 0x2a7   :  { %5867 = vmatpush1.bf16.msra.mxu1 %v8731_v53  ;;  %v8900_v53 = vld [vmem:[%s11939_s3 + $0x20] ss:$8 sps:$4 sm:$0xff]  }
 0x2a8   :  { %5394 = vmatpush1.bf16.msra.mxu0 %v8728_v52  ;;  %5868 = vmatprep.subr.bf16.mxu1 %v8739_v55  ;;  %v8812_v52 = vld [vmem:[%s11937_s1 + $0x150c] ss:$16 sps:$4 sm:$0xff]   ;;  %v8810_v55 = vld [vmem:[%s11937_s1 + $0x1508] ss:$16 sps:$4 sm:$0xff]  }
 0x2a9   :  { %5395 = vmatprep.subr.bf16.mxu0 %v8736_v54  ;;  %v8905_v54 = vld [vmem:[%s11939_s3 + $0x34] ss:$8 sps:$4 sm:$0xff]  }
 0x2ab   :  { %5869 = vmatpush1.bf16.msra.mxu1 %v8737_v58  ;;  %v8903_v58 = vld [vmem:[%s11939_s3 + $0x30] ss:$8 sps:$4 sm:$0xff]  }
 0x2ac   :  { %5396 = vmatpush1.bf16.msra.mxu0 %v8734_v57  ;;  %5870 = vmatprep.subr.bf16.mxu1 %v8745_v60  ;;  %v8815_v57 = vld [vmem:[%s11937_s1 + $0x152c] ss:$16 sps:$4 sm:$0xff]   ;;  %v8813_v60 = vld [vmem:[%s11937_s1 + $0x1528] ss:$16 sps:$4 sm:$0xff]  }
 0x2ad   :  { %5397 = vmatprep.subr.bf16.mxu0 %v8742_v59  ;;  %v8908_v59 = vld [vmem:[%s11939_s3 + $0x44] ss:$8 sps:$4 sm:$0xff]  }
 0x2af   :  { %5871 = vmatpush1.bf16.msra.mxu1 %v8743_v63  ;;  %v8906_v63 = vld [vmem:[%s11939_s3 + $0x40] ss:$8 sps:$4 sm:$0xff]  }
 0x2b0   :  { %5398 = vmatpush1.bf16.msra.mxu0 %v8740_v62  ;;  %5872 = vmatprep.subr.bf16.mxu1 %v8751_v29  ;;  %v8818_v62 = vld [vmem:[%s11937_s1 + $0x154c] ss:$16 sps:$4 sm:$0xff]   ;;  %v8816_v29 = vld [vmem:[%s11937_s1 + $0x1548] ss:$16 sps:$4 sm:$0xff]  }
 0x2b1   :  { %5399 = vmatprep.subr.bf16.mxu0 %v8748_v0  ;;  %v8911_v0 = vld [vmem:[%s11939_s3 + $0x54] ss:$8 sps:$4 sm:$0xff]  }
 0x2b3   :  { %5873 = vmatpush1.bf16.msra.mxu1 %v8749_v3  ;;  %v8821_v3 = vld [vmem:[%s11937_s1 + $0x156c] ss:$16 sps:$4 sm:$0xff]  }
 0x2b4   :  { %5400 = vmatpush1.bf16.msra.mxu0 %v8746_v2  ;;  %5874 = vmatprep.subr.bf16.mxu1 %v8757_v6  ;;  %v8909_v2 = vld [vmem:[%s11939_s3 + $0x50] ss:$8 sps:$4 sm:$0xff]  }
 0x2b5   :  { %5401 = vmatprep.subr.bf16.mxu0 %v8754_v35  ;;  %v8914_v35 = vld [vmem:[%s11939_s3 + $0x64] ss:$8 sps:$4 sm:$0xff]   ;;  %v8819_v6 = vld [vmem:[%s11937_s1 + $0x1568] ss:$16 sps:$4 sm:$0xff]  }
 0x2b7   :  { %5875 = vmatpush1.bf16.msra.mxu1 %v8755_v9  ;;  %v8824_v9 = vld [vmem:[%s11937_s1 + $0x158c] ss:$16 sps:$4 sm:$0xff]  }
 0x2b8   :  { %5402 = vmatpush1.bf16.msra.mxu0 %v8752_v8  ;;  %5876 = vmatprep.subr.bf16.mxu1 %v8763_v37  ;;  %v8912_v8 = vld [vmem:[%s11939_s3 + $0x60] ss:$8 sps:$4 sm:$0xff]  }
 0x2b9   :  { %5403 = vmatprep.subr.bf16.mxu0 %v8760_v11  ;;  %v8917_v11 = vld [vmem:[%s11939_s3 + $0x74] ss:$8 sps:$4 sm:$0xff]   ;;  %v8822_v37 = vld [vmem:[%s11937_s1 + $0x1588] ss:$16 sps:$4 sm:$0xff]  }
 0x2bb   :  { %5877 = vmatpush1.bf16.msra.mxu1 %v8761_v14  ;;  %v8827_v14 = vld [vmem:[%s11937_s1 + $0x15ac] ss:$16 sps:$4 sm:$0xff]  }
 0x2bc   :  { %5404 = vmatpush1.bf16.msra.mxu0 %v8758_v13  ;;  %5878 = vmatprep.subr.bf16.mxu1 %v8769_v16  ;;  %v8915_v13 = vld [vmem:[%s11939_s3 + $0x70] ss:$8 sps:$4 sm:$0xff]  }
 0x2bd   :  { %5405 = vmatprep.subr.bf16.mxu0 %v8766_v47  ;;  %v8920_v47 = vld [vmem:[%s11939_s3 + $0x84] ss:$8 sps:$4 sm:$0xff]   ;;  %v8825_v16 = vld [vmem:[%s11937_s1 + $0x15a8] ss:$16 sps:$4 sm:$0xff]  }
 0x2bf   :  { %5879 = vmatpush1.bf16.msra.mxu1 %v8767_v19  ;;  %v8830_v19 = vld [vmem:[%s11937_s1 + $0x15cc] ss:$16 sps:$4 sm:$0xff]  }
 0x2c0   :  { %5406 = vmatpush1.bf16.msra.mxu0 %v8764_v18  ;;  %5891 = vmatprep.subr.bf16.mxu1 %v8778_v56  ;;  %v8918_v18 = vld [vmem:[%s11939_s3 + $0x80] ss:$8 sps:$4 sm:$0xff]  }
 0x2c1   :  { %5418 = vmatprep.subr.bf16.mxu0 %v8775_v21  ;;  %v8923_v21 = vld [vmem:[%s11939_s3 + $0x94] ss:$8 sps:$4 sm:$0xff]   ;;  %v8828_v56 = vld [vmem:[%s11937_s1 + $0x15c8] ss:$16 sps:$4 sm:$0xff]  }
 0x2c2   :  { %5881 = vmatmul.mubr.bf16.vlgmr.msra.gmra.mrb[4].mxu1 %v10930_v1  ;;  %v8790_v1 = vld [vmem:[%s11937_s1 + $0x144c] ss:$16 sps:$4 sm:$0xff]  }
 0x2c3   :  { %5408 = vmatmul.mubr.bf16.vlgmr.msra.gmra.mrb[0].mxu0 %v11342_v51  ;;  %5892 = vmatpush1.bf16.msra.mxu1 %v8776_v5  ;;  %v8833_v5 = vld [vmem:[%s11937_s1 + $0x15ec] ss:$16 sps:$4 sm:$0xff]  }
 0x2c4   :  { %5419 = vmatpush1.bf16.msra.mxu0 %v8773_v22  ;;  %5893 = vmatprep.subr.bf16.mxu1 %v8784_v23  ;;  %v8921_v22 = vld [vmem:[%s11939_s3 + $0x90] ss:$8 sps:$4 sm:$0xff]  }
 0x2c5   :  { %5420 = vmatprep.subr.bf16.mxu0 %v8781_v61  ;;  %5450 = vmatprep.mubr.bf16.mxu0 %v9030_v26  ;;  %v8926_v61 = vld [vmem:[%s11939_s3 + $0xa4] ss:$8 sps:$4 sm:$0xff]   ;;  %v8831_v23 = vld [vmem:[%s11937_s1 + $0x15e8] ss:$16 sps:$4 sm:$0xff]  }
 0x2c6   :  { %5923 = vmatprep.mubr.bf16.mxu1 %v10947_v7  ;;  %v8796_v7 = vld [vmem:[%s11937_s1 + $0x146c] ss:$16 sps:$4 sm:$0xff]  }
 0x2c7   :  { %5894 = vmatpush1.bf16.msra.mxu1 %v8782_v25  ;;  %v8836_v25 = vld [vmem:[%s11937_s1 + $0x160c] ss:$16 sps:$4 sm:$0xff]  }
 0x2c8   :  { %5421 = vmatpush1.bf16.msra.mxu0 %v8779_v24  ;;  %5895 = vmatprep.subr.bf16.mxu1 %v8790_v1  ;;  %v8924_v24 = vld [vmem:[%s11939_s3 + $0xa0] ss:$8 sps:$4 sm:$0xff]  }
 0x2c9   :  { %5422 = vmatprep.subr.bf16.mxu0 %v8787_v34  ;;  %v8929_v34 = vld [vmem:[%s11939_s3 + $0xb4] ss:$8 sps:$4 sm:$0xff]   ;;  %v8834_v1 = vld [vmem:[%s11937_s1 + $0x1608] ss:$16 sps:$4 sm:$0xff]  }
 0x2cb   :  { %5896 = vmatpush1.bf16.msra.mxu1 %v8788_v27  ;;  %v8927_v27 = vld [vmem:[%s11939_s3 + $0xb0] ss:$8 sps:$4 sm:$0xff]  }
 0x2cc   :  { %5423 = vmatpush1.bf16.msra.mxu0 %v8785_v10  ;;  %5897 = vmatprep.subr.bf16.mxu1 %v8796_v7  ;;  %v8839_v10 = vld [vmem:[%s11937_s1 + $0x162c] ss:$16 sps:$4 sm:$0xff]   ;;  %v8837_v7 = vld [vmem:[%s11937_s1 + $0x1628] ss:$16 sps:$4 sm:$0xff]  }
 0x2cd   :  { %5424 = vmatprep.subr.bf16.mxu0 %v8793_v28  ;;  %v8932_v28 = vld [vmem:[%s11939_s3 + $0xc4] ss:$8 sps:$4 sm:$0xff]  }
 0x2cf   :  { %5898 = vmatpush1.bf16.msra.mxu1 %v8794_v30  ;;  %v8930_v30 = vld [vmem:[%s11939_s3 + $0xc0] ss:$8 sps:$4 sm:$0xff]  }
 0x2d0   :  { %5425 = vmatpush1.bf16.msra.mxu0 %v8791_v4  ;;  %5899 = vmatprep.subr.bf16.mxu1 %v8800_v31  ;;  %v8842_v4 = vld [vmem:[%s11937_s1 + $0x164c] ss:$16 sps:$4 sm:$0xff]  }
 0x2d1   :  { %6428 = vmatprep.subr.bf16.mxu0 %v8896_v39  ;;  %v8845_v31 = vld [vmem:[%s11937_s1 + $0x166c] ss:$16 sps:$4 sm:$0xff]   ;;  %v8849_v39 = vld [vmem:[%s11937_s1 + $0x16a8] ss:$16 sps:$4 sm:$0xff]  }
 0x2d3   :  { %7499 = vmatmul.mubr.msk.bf16.vlgmr.msra.gmra.mrb[0].mxu0 %vm4898_vm0, %v11396_v32  ;;  %5900 = vmatpush1.bf16.msra.mxu1 %v8798_v15  ;;  %v8933_v15 = vld [vmem:[%s11939_s3 + $0xd0] ss:$8 sps:$4 sm:$0xff]  }
 0x2d4   :  { %5901 = vmatprep.subr.bf16.mxu1 %v8803_v33  ;;  %6429 = vmatpush1.bf16.msra.mxu0 %v8894_v38  ;;  %v8843_v33 = vld [vmem:[%s11937_s1 + $0x1668] ss:$16 sps:$4 sm:$0xff]   ;;  %v8851_v38 = vld [vmem:[%s11937_s1 + $0x16ac] ss:$16 sps:$4 sm:$0xff]  }
 0x2d5   :  { %6430 = vmatprep.subr.bf16.mxu0 %v8899_v40  ;;  %v8854_v40 = vld [vmem:[%s11937_s1 + $0x16cc] ss:$16 sps:$4 sm:$0xff]  }
 0x2d7   :  { %5902 = vmatpush1.bf16.msra.mxu1 %v8801_v36  ;;  %v8848_v36 = vld [vmem:[%s11937_s1 + $0x168c] ss:$16 sps:$4 sm:$0xff]  }
 0x2d8   :  { %5903 = vmatprep.subr.bf16.mxu1 %v8806_v20  ;;  %6431 = vmatpush1.bf16.msra.mxu0 %v8897_v45  ;;  %v8846_v20 = vld [vmem:[%s11937_s1 + $0x1688] ss:$16 sps:$4 sm:$0xff]  }
 0x2d9   :  { %6432 = vmatprep.subr.bf16.mxu0 %v8902_v49  ;;  %v8855_v45 = vld [vmem:[%s11937_s1 + $0x16e8] ss:$16 sps:$4 sm:$0xff]   ;;  %v8860_v49 = vld [vmem:[%s11937_s1 + $0x170c] ss:$16 sps:$4 sm:$0xff]  }
 0x2db   :  { %5904 = vmatpush1.bf16.msra.mxu1 %v8804_v41  ;;  %v8852_v41 = vld [vmem:[%s11937_s1 + $0x16c8] ss:$16 sps:$4 sm:$0xff]  }
 0x2dc   :  { %5905 = vmatprep.subr.bf16.mxu1 %v8809_v42  ;;  %6433 = vmatpush1.bf16.msra.mxu0 %v8900_v53  ;;  %v8857_v42 = vld [vmem:[%s11937_s1 + $0x16ec] ss:$16 sps:$4 sm:$0xff]   ;;  %v8861_v53 = vld [vmem:[%s11937_s1 + $0x1728] ss:$16 sps:$4 sm:$0xff]  }
 0x2dd   :  { %6434 = vmatprep.subr.bf16.mxu0 %v8905_v54  ;;  %v8866_v54 = vld [vmem:[%s11937_s1 + $0x174c] ss:$16 sps:$4 sm:$0xff]  }
 0x2df   :  { %5906 = vmatpush1.bf16.msra.mxu1 %v8807_v50  ;;  %v8858_v50 = vld [vmem:[%s11937_s1 + $0x1708] ss:$16 sps:$4 sm:$0xff]  }
 0x2e0   :  { %5907 = vmatprep.subr.bf16.mxu1 %v8812_v52  ;;  %6435 = vmatpush1.bf16.msra.mxu0 %v8903_v58  ;;  %v8863_v52 = vld [vmem:[%s11937_s1 + $0x172c] ss:$16 sps:$4 sm:$0xff]   ;;  %v8936_v58 = vld [vmem:[%s11939_s3 + $0xe0] ss:$8 sps:$4 sm:$0xff]  }
 0x2e1   :  { %6436 = vmatprep.subr.bf16.mxu0 %v8908_v59  ;;  %v8869_v59 = vld [vmem:[%s11937_s1 + $0x176c] ss:$16 sps:$4 sm:$0xff]  }
 0x2e3   :  { %5908 = vmatpush1.bf16.msra.mxu1 %v8810_v55  ;;  %v8938_v55 = vld [vmem:[%s11939_s3 + $0xe4] ss:$8 sps:$4 sm:$0xff]  }
 0x2e4   :  { %5909 = vmatprep.subr.bf16.mxu1 %v8815_v57  ;;  %6437 = vmatpush1.bf16.msra.mxu0 %v8906_v63  ;;  %v8864_v57 = vld [vmem:[%s11937_s1 + $0x1748] ss:$16 sps:$4 sm:$0xff]  }
 0x2e5   :  { %6438 = vmatprep.subr.bf16.mxu0 %v8911_v0  ;;  %v8939_v63 = vld [vmem:[%s11939_s3 + $0xf0] ss:$8 sps:$4 sm:$0xff]   ;;  %v8872_v0 = vld [vmem:[%s11937_s1 + $0x178c] ss:$16 sps:$4 sm:$0xff]  }
 0x2e7   :  { %5910 = vmatpush1.bf16.msra.mxu1 %v8813_v60  ;;  %v8941_v60 = vld [vmem:[%s11939_s3 + $0xf4] ss:$8 sps:$4 sm:$0xff]  }
 0x2e8   :  { %5911 = vmatprep.subr.bf16.mxu1 %v8818_v62  ;;  %6439 = vmatpush1.bf16.msra.mxu0 %v8909_v2  ;;  %v8867_v62 = vld [vmem:[%s11937_s1 + $0x1768] ss:$16 sps:$4 sm:$0xff]   ;;  %v8875_v2 = vld [vmem:[%s11937_s1 + $0x17ac] ss:$16 sps:$4 sm:$0xff]  }
 0x2e9   :  { %6440 = vmatprep.subr.bf16.mxu0 %v8914_v35  ;;  %v8873_v35 = vld [vmem:[%s11937_s1 + $0x17a8] ss:$16 sps:$4 sm:$0xff]  }
 0x2eb   :  { %5912 = vmatpush1.bf16.msra.mxu1 %v8816_v29  ;;  %v8870_v29 = vld [vmem:[%s11937_s1 + $0x1788] ss:$16 sps:$4 sm:$0xff]  }
 0x2ec   :  { %5913 = vmatprep.subr.bf16.mxu1 %v8821_v3  ;;  %6441 = vmatpush1.bf16.msra.mxu0 %v8912_v8  ;;  %v8944_v3 = vld [vmem:[%s11939_s3 + $0x104] ss:$8 sps:$4 sm:$0xff]   ;;  %v8876_v8 = vld [vmem:[%s11937_s1 + $0x17c8] ss:$16 sps:$4 sm:$0xff]  }
 0x2ed   :  { %6442 = vmatprep.subr.bf16.mxu0 %v8917_v11  ;;  %v8879_v11 = vld [vmem:[%s11937_s1 + $0x17e8] ss:$16 sps:$4 sm:$0xff]  }
 0x2ef   :  { %5914 = vmatpush1.bf16.msra.mxu1 %v8819_v6  ;;  %v8878_v6 = vld [vmem:[%s11937_s1 + $0x17cc] ss:$16 sps:$4 sm:$0xff]  }
 0x2f0   :  { %5915 = vmatprep.subr.bf16.mxu1 %v8824_v9  ;;  %6443 = vmatpush1.bf16.msra.mxu0 %v8915_v13  ;;  %v8881_v9 = vld [vmem:[%s11937_s1 + $0x17ec] ss:$16 sps:$4 sm:$0xff]   ;;  %v8882_v13 = vld [vmem:[%s11937_s1 + $0x1808] ss:$16 sps:$4 sm:$0xff]  }
 0x2f1   :  { %6444 = vmatprep.subr.bf16.mxu0 %v8920_v47  ;;  %v8885_v47 = vld [vmem:[%s11937_s1 + $0x1828] ss:$16 sps:$4 sm:$0xff]  }
 0x2f3   :  { %5916 = vmatpush1.bf16.msra.mxu1 %v8822_v37  ;;  %v8884_v37 = vld [vmem:[%s11937_s1 + $0x180c] ss:$16 sps:$4 sm:$0xff]  }
 0x2f4   :  { %5917 = vmatprep.subr.bf16.mxu1 %v8827_v14  ;;  %6445 = vmatpush1.bf16.msra.mxu0 %v8918_v18  ;;  %v8887_v14 = vld [vmem:[%s11937_s1 + $0x182c] ss:$16 sps:$4 sm:$0xff]   ;;  %v8888_v18 = vld [vmem:[%s11937_s1 + $0x1848] ss:$16 sps:$4 sm:$0xff]  }
 0x2f5   :  { %6446 = vmatprep.subr.bf16.mxu0 %v8923_v21 }
 0x2f7   :  { %5918 = vmatpush1.bf16.msra.mxu1 %v8825_v16  ;;  %v8890_v16 = vld [vmem:[%s11937_s1 + $0x184c] ss:$16 sps:$4 sm:$0xff]  }
 0x2f8   :  { %5919 = vmatprep.subr.bf16.mxu1 %v8830_v19  ;;  %6447 = vmatpush1.bf16.msra.mxu0 %v8921_v22  ;;  %v833_v19 = vlaneseq  ;;  %v11700_v22 = vld [vmem:[%s11940_s2] sm:$0xf] }
 0x2f9   :  { %6448 = vmatprep.subr.bf16.mxu0 %v8926_v61 }
 0x2fa   :  { %v11694_v21 = vshrl.u32 %v833_v19, 7 }
 0x2fb   :  { %5920 = vmatpush1.bf16.msra.mxu1 %v8828_v56 }
 0x2fc   :  { %5921 = vmatprep.subr.bf16.mxu1 %v8833_v5  ;;  %6449 = vmatpush1.bf16.msra.mxu0 %v8924_v24  ;;  %v835_v56 = vsub.s32 0, %v11694_v21  ;;  %v839_v5 = vsub.s32 1, %v11694_v21 }
 0x2fd   :  { %6450 = vmatprep.subr.bf16.mxu0 %v8929_v34 }
 0x2fe   :  { %v836_v61 = vrot.slane %v11700_v22, %v835_v56 }
 0x2ff   :  { %5922 = vmatpush1.bf16.msra.mxu1 %v8831_v23 }
 0x300   :  { %5934 = vmatprep.subr.bf16.mxu1 %v8836_v25  ;;  %6451 = vmatpush1.bf16.msra.mxu0 %v8927_v27  ;;  %v4937_v23 = vadd.f32 %v9973_v43, %v836_v61  ;;  %v4941_v34 = vadd.f32 %v9980_v46, %v836_v61  ;;  %v8947_v46 = vld [vmem:[%s11939_s3 + $0x114] ss:$8 sps:$4 sm:$0xff]  }
 0x301   :  { %6452 = vmatprep.subr.bf16.mxu0 %v8932_v28 }
 0x302   :  { %5924 = vmatmul.mubr.bf16.vlgmr.msra.gmra.mrb[4].mxu1 %v11136_v12  ;;  %v8935_v12 = vld [vmem:[%s11939_s3 + $0xd4] ss:$8 sps:$4 sm:$0xff]  }
 0x303   :  { %5935 = vmatpush1.bf16.msra.mxu1 %v8834_v1  ;;  %5966 = vmatprep.mubr.bf16.mxu1 %v11153_v17  ;;  %v8840_v17 = vld [vmem:[%s11937_s1 + $0x1648] ss:$16 sps:$4 sm:$0xff]  }
 0x304   :  { %5936 = vmatprep.subr.bf16.mxu1 %v8839_v10  ;;  %6453 = vmatpush1.bf16.msra.mxu0 %v8930_v30 }
 0x305   :  { %6454 = vmatprep.subr.bf16.mxu0 %v8935_v12 }
 0x307   :  { %5937 = vmatpush1.bf16.msra.mxu1 %v8837_v7 }
 0x308   :  { %5938 = vmatprep.subr.bf16.mxu1 %v8842_v4  ;;  %6455 = vmatpush1.bf16.msra.mxu0 %v8933_v15 }
 0x309   :  { %6456 = vmatprep.subr.bf16.mxu0 %v8938_v55  ;;  %v8968_v55 = vld [vmem:[%s11939_s3 + $0x184] ss:$8 sps:$4 sm:$0xff]  }
 0x30b   :  { %5939 = vmatpush1.bf16.msra.mxu1 %v8840_v17 }
 0x30c   :  { %5940 = vmatprep.subr.bf16.mxu1 %v8845_v31  ;;  %6457 = vmatpush1.bf16.msra.mxu0 %v8936_v58  ;;  %v8971_v58 = vld [vmem:[%s11939_s3 + $0x194] ss:$8 sps:$4 sm:$0xff]  }
 0x30d   :  { %6458 = vmatprep.subr.bf16.mxu0 %v8941_v60  ;;  %v8974_v60 = vld [vmem:[%s11939_s3 + $0x1a4] ss:$8 sps:$4 sm:$0xff]  }
 0x30f   :  { %5941 = vmatpush1.bf16.msra.mxu1 %v8843_v33 }
 0x310   :  { %5942 = vmatprep.subr.bf16.mxu1 %v8848_v36  ;;  %6459 = vmatpush1.bf16.msra.mxu0 %v8939_v63  ;;  %v8977_v63 = vld [vmem:[%s11939_s3 + $0x1b4] ss:$8 sps:$4 sm:$0xff]  }
 0x311   :  { %6471 = vmatprep.subr.bf16.mxu0 %v8944_v3  ;;  %v8983_v3 = vld [vmem:[%s11939_s3 + $0x1d4] ss:$8 sps:$4 sm:$0xff]  }
 0x313   :  { %5943 = vmatpush1.bf16.msra.mxu1 %v8846_v20  ;;  %v8950_v20 = vld [vmem:[%s11939_s3 + $0x124] ss:$8 sps:$4 sm:$0xff]  }
 0x314   :  { %5944 = vmatprep.subr.bf16.mxu1 %v8851_v38  ;;  %v8948_v38 = vld [vmem:[%s11939_s3 + $0x120] ss:$8 sps:$4 sm:$0xff]  }
 0x317   :  { %5945 = vmatpush1.bf16.msra.mxu1 %v8849_v39  ;;  %v8953_v39 = vld [vmem:[%s11939_s3 + $0x134] ss:$8 sps:$4 sm:$0xff]  }
 0x318   :  { %5946 = vmatprep.subr.bf16.mxu1 %v8854_v40  ;;  %v8951_v40 = vld [vmem:[%s11939_s3 + $0x130] ss:$8 sps:$4 sm:$0xff]  }
 0x31b   :  { %5947 = vmatpush1.bf16.msra.mxu1 %v8852_v41  ;;  %v8956_v41 = vld [vmem:[%s11939_s3 + $0x144] ss:$8 sps:$4 sm:$0xff]  }
 0x31c   :  { %5948 = vmatprep.subr.bf16.mxu1 %v8857_v42  ;;  %v8954_v42 = vld [vmem:[%s11939_s3 + $0x140] ss:$8 sps:$4 sm:$0xff]  }
 0x31f   :  { %5949 = vmatpush1.bf16.msra.mxu1 %v8855_v45  ;;  %v8959_v45 = vld [vmem:[%s11939_s3 + $0x154] ss:$8 sps:$4 sm:$0xff]  }
 0x320   :  { %5950 = vmatprep.subr.bf16.mxu1 %v8860_v49  ;;  %v8957_v49 = vld [vmem:[%s11939_s3 + $0x150] ss:$8 sps:$4 sm:$0xff]  }
 0x323   :  { %5951 = vmatpush1.bf16.msra.mxu1 %v8858_v50  ;;  %v8962_v50 = vld [vmem:[%s11939_s3 + $0x164] ss:$8 sps:$4 sm:$0xff]  }
 0x324   :  { %5952 = vmatprep.subr.bf16.mxu1 %v8863_v52  ;;  %v8960_v52 = vld [vmem:[%s11939_s3 + $0x160] ss:$8 sps:$4 sm:$0xff]  }
 0x327   :  { %5953 = vmatpush1.bf16.msra.mxu1 %v8861_v53  ;;  %v8965_v53 = vld [vmem:[%s11939_s3 + $0x174] ss:$8 sps:$4 sm:$0xff]  }
 0x328   :  { %5954 = vmatprep.subr.bf16.mxu1 %v8866_v54  ;;  %v8963_v54 = vld [vmem:[%s11939_s3 + $0x170] ss:$8 sps:$4 sm:$0xff]  }
 0x32b   :  { %5955 = vmatpush1.bf16.msra.mxu1 %v8864_v57  ;;  %v8966_v57 = vld [vmem:[%s11939_s3 + $0x180] ss:$8 sps:$4 sm:$0xff]  }
 0x32c   :  { %5956 = vmatprep.subr.bf16.mxu1 %v8869_v59  ;;  %v8969_v59 = vld [vmem:[%s11939_s3 + $0x190] ss:$8 sps:$4 sm:$0xff]  }
 0x32f   :  { %5957 = vmatpush1.bf16.msra.mxu1 %v8867_v62  ;;  %v8972_v62 = vld [vmem:[%s11939_s3 + $0x1a0] ss:$8 sps:$4 sm:$0xff]  }
 0x330   :  { %5958 = vmatprep.subr.bf16.mxu1 %v8872_v0  ;;  %v8975_v0 = vld [vmem:[%s11939_s3 + $0x1b0] ss:$8 sps:$4 sm:$0xff]  }
 0x333   :  { %5959 = vmatpush1.bf16.msra.mxu1 %v8870_v29  ;;  %v8980_v29 = vld [vmem:[%s11939_s3 + $0x1c4] ss:$8 sps:$4 sm:$0xff]  }
 0x334   :  { %5960 = vmatprep.subr.bf16.mxu1 %v8875_v2  ;;  %v8978_v2 = vld [vmem:[%s11939_s3 + $0x1c0] ss:$8 sps:$4 sm:$0xff]  }
 0x337   :  { %5961 = vmatpush1.bf16.msra.mxu1 %v8873_v35  ;;  %v8981_v35 = vld [vmem:[%s11939_s3 + $0x1d0] ss:$8 sps:$4 sm:$0xff]  }
 0x338   :  { %5962 = vmatprep.subr.bf16.mxu1 %v8878_v6  ;;  %v8986_v6 = vld [vmem:[%s11939_s3 + $0x1e4] ss:$8 sps:$4 sm:$0xff]  }
 0x33b   :  { %5963 = vmatpush1.bf16.msra.mxu1 %v8876_v8  ;;  %v8984_v8 = vld [vmem:[%s11939_s3 + $0x1e0] ss:$8 sps:$4 sm:$0xff]  }
 0x33c   :  { %5964 = vmatprep.subr.bf16.mxu1 %v8881_v9  ;;  %v8989_v9 = vld [vmem:[%s11939_s3 + $0x1f4] ss:$8 sps:$4 sm:$0xff]  }
 0x33f   :  { %5965 = vmatpush1.bf16.msra.mxu1 %v8879_v11  ;;  %v8987_v11 = vld [vmem:[%s11939_s3 + $0x1f0] ss:$8 sps:$4 sm:$0xff]  }
 0x340   :  { %5977 = vmatprep.subr.bf16.mxu1 %v8884_v37  ;;  %v843_v37 = vsub.s32 2, %v11694_v21 }
 0x342   :  { %5967 = vmatmul.mubr.bf16.vlgmr.msra.gmra.mrb[4].mxu1 %v11342_v51  ;;  %v8893_v51 = vld [vmem:[%s11937_s1 + $0x186c] ss:$16 sps:$4 sm:$0xff]  }
 0x343   :  { %5978 = vmatpush1.bf16.msra.mxu1 %v8882_v13  ;;  %6009 = vmatprep.mubr.bf16.mxu1 %v9030_v26  ;;  %v8891_v26 = vld [vmem:[%s11937_s1 + $0x1868] ss:$16 sps:$4 sm:$0xff]   ;;  %v847_v13 = vsub.s32 3, %v11694_v21 }
 0x344   :  { %5979 = vmatprep.subr.bf16.mxu1 %v8887_v14  ;;  %v844_v14 = vrot.slane %v11700_v22, %v843_v37 }
 0x347   :  { %5980 = vmatpush1.bf16.msra.mxu1 %v8885_v47  ;;  %v848_v47 = vrot.slane %v11700_v22, %v847_v13 }
 0x348   :  { %5981 = vmatprep.subr.bf16.mxu1 %v8890_v16 }
 0x34b   :  { %5982 = vmatpush1.bf16.msra.mxu1 %v8888_v18 }
 0x34c   :  { %5983 = vmatprep.subr.bf16.mxu1 %v8893_v51 }
 0x34f   :  { %5984 = vmatpush1.bf16.msra.mxu1 %v8891_v26 }
 0x352   :  { %7500 = vmatmul.mubr.msk.bf16.vlgmr.msra.gmra.mrb[4].mxu1 %vm4898_vm0, %v11396_v32  ;;  %v840_v32 = vrot.slane %v11700_v22, %v839_v5  ;;  %v6096_v22 = vld [vmem:[%s11941_s4] sm:$0x3] }
 0x354   :  { %v4939_v24 = vadd.f32 %v9975_v44, %v840_v32  ;;  %v4943_v27 = vadd.f32 %v9985_v48, %v840_v32  ;;  %v8942_v44 = vld [vmem:[%s11939_s3 + $0x100] ss:$8 sps:$4 sm:$0xff]   ;;  %v8945_v48 = vld [vmem:[%s11939_s3 + $0x110] ss:$8 sps:$4 sm:$0xff]  }
 0x3a6   :  { %v5452_v25 = vpop.f32.mrb[0].mxu0 }
 0x3a7   :  { %v7566_v1 = vadd.f32 %v5452_v25, %v4937_v23  ;;  %v5454_v10 = vpop.f32.mrb[1].mxu0 }
 0x3a8   :  { %v7568_v28 = vadd.f32 %v5454_v10, %v4939_v24  ;;  %v5456_v7 = vpop.f32.mrb[2].mxu0 }
 0x3a9   :  { %v7570_v4 = vadd.f32 %v5456_v7, %v4941_v34  ;;  %v5458_v30 = vpop.f32.mrb[3].mxu0  ;;  %v6020_v17 = vmax.f32 %v7566_v1, 0.0  ;;  %v6105_v7 = vrot.slane %v6096_v22, %v839_v5 }
 0x3aa   :  { %v7572_v12 = vadd.f32 %v5458_v30, %v4943_v27  ;;  %v6021_v15 = vmax.f32 %v7568_v28, 0.0  ;;  %v6101_v28 = vrot.slane %v6096_v22, %v835_v56 }
 0x3ab   :  { %v6024_v31 = vmax.f32 %v7570_v4, 0.0 }
 0x3ac   :  { %v6025_v33 = vmax.f32 %v7572_v12, 0.0 }
 0x3ad   :  { %v6028_v36 = vpack.c.bf16 %v6024_v31, %v6020_v17 }
 0x3ae   :  { %v6029_v43 = vpack.c.bf16 %v6025_v33, %v6021_v15 }
 0x3b0   :  { %6460 = vmatprep.mubr.bf16.mxu0 %v6029_v43 }
 0x3b1   :  { %6461 = vmatmul.mubr.bf16.vlgmr.msra.gmra.mrb[4].mxu0 %v6028_v36 }
 0x3b2   :  { %6472 = vmatpush1.bf16.msra.mxu0 %v8942_v44 }
 0x3b3   :  { %6473 = vmatprep.subr.bf16.mxu0 %v8947_v46 }
 0x3b6   :  { %6474 = vmatpush1.bf16.msra.mxu0 %v8945_v48 }
 0x3b7   :  { %6475 = vmatprep.subr.bf16.mxu0 %v8950_v20 }
 0x3ba   :  { %6476 = vmatpush1.bf16.msra.mxu0 %v8948_v38 }
 0x3bb   :  { %6477 = vmatprep.subr.bf16.mxu0 %v8953_v39 }
 0x3be   :  { %6478 = vmatpush1.bf16.msra.mxu0 %v8951_v40 }
 0x3bf   :  { %6479 = vmatprep.subr.bf16.mxu0 %v8956_v41 }
 0x3c2   :  { %6480 = vmatpush1.bf16.msra.mxu0 %v8954_v42 }
 0x3c3   :  { %6481 = vmatprep.subr.bf16.mxu0 %v8959_v45 }
 0x3c6   :  { %6482 = vmatpush1.bf16.msra.mxu0 %v8957_v49 }
 0x3c7   :  { %6483 = vmatprep.subr.bf16.mxu0 %v8962_v50 }
 0x3ca   :  { %6484 = vmatpush1.bf16.msra.mxu0 %v8960_v52 }
 0x3cb   :  { %6485 = vmatprep.subr.bf16.mxu0 %v8965_v53 }
 0x3ce   :  { %6486 = vmatpush1.bf16.msra.mxu0 %v8963_v54 }
 0x3cf   :  { %6487 = vmatprep.subr.bf16.mxu0 %v8968_v55 }
 0x3d2   :  { %6488 = vmatpush1.bf16.msra.mxu0 %v8966_v57 }
 0x3d3   :  { %6489 = vmatprep.subr.bf16.mxu0 %v8971_v58 }
 0x3d6   :  { %6490 = vmatpush1.bf16.msra.mxu0 %v8969_v59 }
 0x3d7   :  { %6491 = vmatprep.subr.bf16.mxu0 %v8974_v60 }
 0x3da   :  { %6492 = vmatpush1.bf16.msra.mxu0 %v8972_v62 }
 0x3db   :  { %6493 = vmatprep.subr.bf16.mxu0 %v8977_v63 }
 0x3de   :  { %6494 = vmatpush1.bf16.msra.mxu0 %v8975_v0 }
 0x3df   :  { %6495 = vmatprep.subr.bf16.mxu0 %v8980_v29 }
 0x3e2   :  { %6496 = vmatpush1.bf16.msra.mxu0 %v8978_v2 }
 0x3e3   :  { %6497 = vmatprep.subr.bf16.mxu0 %v8983_v3 }
 0x3e6   :  { %6498 = vmatpush1.bf16.msra.mxu0 %v8981_v35 }
 0x3e7   :  { %6499 = vmatprep.subr.bf16.mxu0 %v8986_v6 }
 0x3ea   :  { %6500 = vmatpush1.bf16.msra.mxu0 %v8984_v8 }
 0x3eb   :  { %6501 = vmatprep.subr.bf16.mxu0 %v8989_v9 }
 0x3ee   :  { %6502 = vmatpush1.bf16.msra.mxu0 %v8987_v11 }
 0x425   :  { %v6011_v16 = vpop.f32.mrb[4].mxu1 }
 0x426   :  { %v7573_v18 = vadd.f32 %v6011_v16, %v844_v14  ;;  %v6013_v51 = vpop.f32.mrb[5].mxu1 }
 0x427   :  { %v7574_v26 = vadd.f32 %v6013_v51, %v848_v47  ;;  %v6015_v19 = vpop.f32.mrb[6].mxu1 }
 0x428   :  { %v7575_v61 = vadd.f32 %v6015_v19, %v844_v14  ;;  %v6017_v32 = vpop.f32.mrb[7].mxu1  ;;  %v6022_v24 = vmax.f32 %v7573_v18, 0.0 }
 0x429   :  { %v7576_v23 = vadd.f32 %v6017_v32, %v848_v47  ;;  %v6023_v34 = vmax.f32 %v7574_v26, 0.0 }
 0x42a   :  { %v6026_v25 = vmax.f32 %v7575_v61, 0.0 }
 0x42b   :  { %v6027_v1 = vmax.f32 %v7576_v23, 0.0 }
 0x42c   :  { %v6030_v10 = vpack.c.bf16 %v6026_v25, %v6022_v24 }
 0x42d   :  { %v6031_v27 = vpack.c.bf16 %v6027_v1, %v6023_v34 }
 0x42f   :  { %6503 = vmatprep.mubr.bf16.mxu0 %v6031_v27 }
 0x430   :  { %6504 = vmatmul.mubr.bf16.vlgmr.msra.gmra.mrb[4].mxu0 %v6030_v10 }
 0x503   :  { %v6505_v4 = vpop.f32.mrb[4].mxu0 }
 0x504   :  { %v11817_v30 = vadd.f32 %v6505_v4, %v6101_v28  ;;  %v6507_v12 = vpop.f32.mrb[5].mxu0 }
 0x505   :  { %v7578_v17 = vadd.f32 %v6507_v12, %v6105_v7  ;;  %v6509_v31 = vpop.f32.mrb[6].mxu0 }
 0x506   :  { %6514 = vst [vmem:[%s11942_s5] sm:$0xff] %v11817_v30  ;;  %v11823_v15 = vadd.f32 %v6509_v31, %v6101_v28  ;;  %v6511_v56 = vpop.f32.mrb[7].mxu0  ;;  %v6548_v21 = vsel %vm6547_vm1, %v11817_v30, -inf  ;;  %v6585_v5 = vsel %vm6584_vm2, %v11817_v30, -inf  ;;  %v6519_v41 = vsel %vm6518_vm5, %v11817_v30, -inf }
 0x507   :  { %6515 = vst [vmem:[%s11942_s5 + $0x8] sm:$0xff] %v7578_v17  ;;  %v7580_v33 = vadd.f32 %v6511_v56, %v6105_v7  ;;  %6549 = vmax.xlane.f32.xlu1 %v6548_v21  ;;  %v6587_v36 = vsel %vm6586_vm3, %v7578_v17, -inf  ;;  %v6650_v39 = vsel %vm6649_vm4, %v7578_v17, -inf }
 0x508   :  { %6516 = vst [vmem:[%s11942_s5 + $0x10] sm:$0xff] %v11823_v15  ;;  %v6588_v43 = vmax.f32 %v6585_v5, %v6587_v36  ;;  %v6591_v44 = vsel %vm6584_vm2, %v11823_v15, -inf  ;;  %v6551_v48 = vsel %vm6547_vm1, %v11823_v15, -inf  ;;  %v6522_v40 = vsel %vm6518_vm5, %v11823_v15, -inf }
 0x509   :  { %6517 = vst [vmem:[%s11942_s5 + $0x18] sm:$0xff] %v7580_v33  ;;  %v6592_v46 = vsel %vm6586_vm3, %v7580_v33, -inf  ;;  %v6653_v38 = vsel %vm6649_vm4, %v7580_v33, -inf }
 0x50a   :  { %6589 = vmax.xlane.f32.xlu0 %v6588_v43  ;;  %v6593_v20 = vmax.f32 %v6591_v44, %v6592_v46 }
 0x50b   :  { %6552 = vmax.xlane.f32.xlu1 %v6551_v48 }
 0x50e   :  { %6594 = vmax.xlane.f32.xlu0 %v6593_v20 }
 0x50f   :  { %6654 = vmax.xlane.f32.xlu1 %v6653_v38 }
 0x512   :  { %6651 = vmax.xlane.f32.xlu0 %v6650_v39 }
 0x513   :  { %6523 = vmax.xlane.f32.xlu1 %v6522_v40 }
 0x516   :  { %6520 = vmax.xlane.f32.xlu0 %v6519_v41 }
 0x594   :  { %v6550_v42 = vpop.xlane.xlu1 %6549 }
 0x595   :  { %v6554_v45 = vsub.f32 %v11817_v30, %v6550_v42 }
 0x597   :  { %v6556_v49 = vmul.f32 1.442695, %v6554_v45  ;;  %v6590_v50 = vpop.xlane.xlu0 %6589 }
 0x598   :  { %v6596_v52 = vsub.f32 %v11817_v30, %v6590_v50  ;;  %v6553_v53 = vpop.xlane.xlu1 %6552  ;;  %v6597_v55 = vsub.f32 %v7578_v17, %v6590_v50 }
 0x599   :  { %8990 = vpow2.f32 %v6556_v49  ;;  %v6555_v54 = vsub.f32 %v11823_v15, %v6553_v53 }
 0x59a   :  { %v6600_v57 = vmul.f32 1.442695, %v6596_v52  ;;  %v6602_v60 = vmul.f32 1.442695, %v6597_v55 }
 0x59b   :  { %v6558_v58 = vmul.f32 1.442695, %v6555_v54  ;;  %v6595_v59 = vpop.xlane.xlu0 %6594 }
 0x59c   :  { %8992 = vpow2.f32 %v6600_v57  ;;  %v6598_v62 = vsub.f32 %v11823_v15, %v6595_v59  ;;  %v6599_v29 = vsub.f32 %v7580_v33, %v6595_v59  ;;  %v6655_v6 = vpop.xlane.xlu1 %6654 }
 0x59d   :  { %8994 = vpow2.f32 %v6558_v58  ;;  %v6657_v11 = vsub.f32 %v7580_v33, %v6655_v6 }
 0x59e   :  { %8996 = vpow2.f32 %v6602_v60  ;;  %v6604_v2 = vmul.f32 1.442695, %v6598_v62  ;;  %v6606_v9 = vmul.f32 1.442695, %v6599_v29 }
 0x59f   :  { %v6652_v63 = vpop.xlane.xlu0 %6651  ;;  %v6660_v13 = vmul.f32 1.442695, %v6657_v11 }
 0x5a0   :  { %v6656_v0 = vsub.f32 %v7578_v17, %v6652_v63  ;;  %v6524_v32 = vpop.xlane.xlu1 %6523 }
 0x5a1   :  { %v6526_v23 = vsub.f32 %v11823_v15, %v6524_v32 }
 0x5a2   :  { %v6658_v3 = vmul.f32 1.442695, %v6656_v0 }
 0x5a3   :  { %v11855_v35 = vpop.eup %8990  ;;  %v6521_v51 = vpop.xlane.xlu0 %6520  ;;  %v6529_v25 = vmul.f32 1.442695, %v6526_v23 }
 0x5a4   :  { %8998 = vpow2.f32 %v6658_v3  ;;  %6562 = vrot.lane.b32.xlu0 %v11855_v35, %s9031_s16  ;;  %v6525_v19 = vsub.f32 %v11817_v30, %v6521_v51 }
 0x5a5   :  { %9000 = vpow2.f32 %v6604_v2 }
 0x5a6   :  { %v11858_v8 = vpop.eup %8992  ;;  %9002 = vpow2.f32 %v6606_v9  ;;  %v6527_v61 = vmul.f32 1.442695, %v6525_v19 }
 0x5a7   :  { %v11860_v37 = vpop.eup %8994  ;;  %9004 = vpow2.f32 %v6660_v13 }
 0x5a8   :  { %6612 = vrot.lane.b32.xlu0 %v11858_v8, %s9032_s17  ;;  %6564 = vrot.lane.b32.xlu1 %v11860_v37, %s9031_s16  ;;  %v11864_v14 = vpop.eup %8996  ;;  %9006 = vpow2.f32 %v6527_v61 }
 0x5a9   :  { %9008 = vpow2.f32 %v6529_v25 }
 0x5ac   :  { %6614 = vrot.lane.b32.xlu1 %v11864_v14, %s9032_s17 }
 0x5ae   :  { %v11867_v47 = vpop.eup %8998 }
 0x5af   :  { %6664 = vrot.lane.b32.xlu0 %v11867_v47, %s9033_s18  ;;  %v11870_v16 = vpop.eup %9000 }
 0x5b0   :  { %6616 = vrot.lane.b32.xlu1 %v11870_v16, %s9032_s17  ;;  %v11873_v18 = vpop.eup %9002 }
 0x5b1   :  { %v11876_v26 = vpop.eup %9004 }
 0x5b2   :  { %v9007_v24 = vpop.eup %9006 }
 0x5b3   :  { %v6531_v34 = vsel %vm6518_vm5, %v9007_v24, 0.0  ;;  %v9009_v1 = vpop.eup %9008 }
 0x5b4   :  { %6618 = vrot.lane.b32.xlu1 %v11873_v18, %s9032_s17  ;;  %v6534_v10 = vsel %vm6518_vm5, %v9009_v1, 0.0 }
 0x5b8   :  { %6666 = vrot.lane.b32.xlu1 %v11876_v26, %s9033_s18 }
 0x5ce   :  { %6532 = vadd.xlane.f32.xlu0 %v6531_v34 }
 0x5dc   :  { %6535 = vadd.xlane.f32.xlu1 %v6534_v10 }
 0x616   :  { %v6563_v27 = vpop.permute.xlu0 %6562 }
 0x617   :  { %v6568_v22 = vsel %vm6518_vm5, %v6563_v27, 0.0 }
 0x618   :  { %6569 = vadd.xlane.f32.xlu0 %v6568_v22 }
 0x61a   :  { %v6565_v28 = vpop.permute.xlu1 %6564  ;;  %v6613_v4 = vpop.permute.xlu0 %6612 }
 0x61b   :  { %v6571_v7 = vsel %vm6518_vm5, %v6565_v28, 0.0 }
 0x61c   :  { %6572 = vadd.xlane.f32.xlu0 %v6571_v7 }
 0x61e   :  { %v6615_v30 = vpop.permute.xlu1 %6614 }
 0x61f   :  { %v6621_v12 = vsel %vm6620_vm6, %v6613_v4, %v6615_v30 }
 0x620   :  { %v6625_v17 = vsel %vm6518_vm5, %v6621_v12, 0.0 }
 0x621   :  { %6626 = vadd.xlane.f32.xlu0 %v6625_v17  ;;  %v6665_v31 = vpop.permute.xlu0 %6664 }
 0x622   :  { %v6617_v15 = vpop.permute.xlu1 %6616  ;;  %v6670_v56 = vsel %vm6518_vm5, %v6665_v31, 0.0 }
 0x625   :  { %6671 = vadd.xlane.f32.xlu0 %v6670_v56 }
 0x626   :  { %v6619_v21 = vpop.permute.xlu1 %6618 }
 0x627   :  { %v6622_v5 = vsel %vm6620_vm6, %v6617_v15, %v6619_v21 }
 0x628   :  { %v6628_v33 = vsel %vm6518_vm5, %v6622_v5, 0.0 }
 0x629   :  { %6629 = vadd.xlane.f32.xlu1 %v6628_v33 }
 0x62a   :  { %v6667_v36 = vpop.permute.xlu1 %6666 }
 0x62b   :  { %v6673_v43 = vsel %vm6518_vm5, %v6667_v36, 0.0 }
 0x62d   :  { %6674 = vadd.xlane.f32.xlu1 %v6673_v43 }
 0x65b   :  { %v6533_v44 = vpop.xlane.xlu0 %6532 }
 0x65c   :  { %9010 = vrcp.f32 %v6533_v44 }
 0x666   :  { %v9011_v46 = vpop.eup %9010 }
 0x667   :  { %v6539_v48 = vmul.f32 %v9011_v46, %v9007_v24 }
 0x669   :  { %v6541_v20 = vmax.f32 %v6539_v48, 1e-08  ;;  %v6536_v38 = vpop.xlane.xlu1 %6535 }
 0x66a   :  { %9012 = vrcp.f32 %v6536_v38 }
 0x66b   :  { %v6543_v39 = vmin.f32 %v6541_v20, 1.0 }
 0x66d   :  { %6545 = vst.msk [vmem:[%s11942_s5] sm:$0xff] %vm6518_vm5, %v6543_v39 }
 0x674   :  { %v9013_v40 = vpop.eup %9012 }
 0x675   :  { %v6540_v41 = vmul.f32 %v9013_v40, %v9009_v1 }
 0x677   :  { %v6542_v42 = vmax.f32 %v6540_v41, 1e-08 }
 0x679   :  { %v6544_v45 = vmin.f32 %v6542_v42, 1.0 }
 0x67b   :  { %6546 = vst.msk [vmem:[%s11942_s5 + $0x10] sm:$0xff] %vm6518_vm5, %v6544_v45 }
 0x6a5   :  { %v6570_v49 = vpop.xlane.xlu0 %6569 }
 0x6a6   :  { %9014 = vrcp.f32 %v6570_v49 }
 0x6a9   :  { %v6573_v50 = vpop.xlane.xlu0 %6572 }
 0x6aa   :  { %9016 = vrcp.f32 %v6573_v50 }
 0x6ae   :  { %v6627_v52 = vpop.xlane.xlu0 %6626 }
 0x6af   :  { %9018 = vrcp.f32 %v6627_v52 }
 0x6b0   :  { %v9015_v53 = vpop.eup %9014 }
 0x6b1   :  { %v6576_v54 = vmul.f32 %v9015_v53, %v11855_v35 }
 0x6b2   :  { %v6672_v57 = vpop.xlane.xlu0 %6671 }
 0x6b3   :  { %v6578_v55 = vmax.f32 %v6576_v54, 1e-08  ;;  %9020 = vrcp.f32 %v6672_v57 }
 0x6b4   :  { %v9017_v58 = vpop.eup %9016 }
 0x6b5   :  { %v6580_v59 = vmin.f32 %v6578_v55, 1.0  ;;  %v6577_v60 = vmul.f32 %v9017_v58, %v11860_v37 }
 0x6b6   :  { %v6630_v62 = vpop.xlane.xlu1 %6629 }
 0x6b7   :  { %6582 = vst.msk [vmem:[%s11942_s5] sm:$0xff] %vm6547_vm1, %v6580_v59  ;;  %v6579_v63 = vmax.f32 %v6577_v60, 1e-08  ;;  %9022 = vrcp.f32 %v6630_v62 }
 0x6b9   :  { %v9019_v0 = vpop.eup %9018  ;;  %v6581_v29 = vmin.f32 %v6579_v63, 1.0 }
 0x6ba   :  { %v6633_v2 = vmul.f32 %v9019_v0, %v11858_v8  ;;  %v6634_v3 = vmul.f32 %v9019_v0, %v11864_v14  ;;  %v6675_v35 = vpop.xlane.xlu1 %6674 }
 0x6bb   :  { %6583 = vst.msk [vmem:[%s11942_s5 + $0x10] sm:$0xff] %vm6547_vm1, %v6581_v29  ;;  %9024 = vrcp.f32 %v6675_v35 }
 0x6bc   :  { %v6637_v6 = vmax.f32 %v6633_v2, 1e-08  ;;  %v6638_v9 = vmax.f32 %v6634_v3, 1e-08 }
 0x6bd   :  { %v9021_v11 = vpop.eup %9020 }
 0x6be   :  { %v6641_v37 = vmin.f32 %v6637_v6, 1.0  ;;  %v6642_v13 = vmin.f32 %v6638_v9, 1.0  ;;  %v6678_v51 = vmul.f32 %v9021_v11, %v11867_v47 }
 0x6c0   :  { %6645 = vst.msk [vmem:[%s11942_s5] sm:$0xff] %vm6584_vm2, %v6641_v37  ;;  %v6680_v8 = vmax.f32 %v6678_v51, 1e-08 }
 0x6c1   :  { %6646 = vst.msk [vmem:[%s11942_s5 + $0x8] sm:$0xff] %vm6586_vm3, %v6642_v13  ;;  %v9023_v14 = vpop.eup %9022 }
 0x6c2   :  { %v6682_v19 = vmin.f32 %v6680_v8, 1.0  ;;  %v6635_v61 = vmul.f32 %v9023_v14, %v11870_v16  ;;  %v6636_v32 = vmul.f32 %v9023_v14, %v11873_v18 }
 0x6c4   :  { %6684 = vst.msk [vmem:[%s11942_s5 + $0x8] sm:$0xff] %vm6649_vm4, %v6682_v19  ;;  %v6639_v47 = vmax.f32 %v6635_v61, 1e-08  ;;  %v6640_v23 = vmax.f32 %v6636_v32, 1e-08 }
 0x6c5   :  { %v9025_v24 = vpop.eup %9024 }
 0x6c6   :  { %v6643_v25 = vmin.f32 %v6639_v47, 1.0  ;;  %v6644_v34 = vmin.f32 %v6640_v23, 1.0  ;;  %v6679_v1 = vmul.f32 %v9025_v24, %v11876_v26 }
 0x6c8   :  { %6647 = vst.msk [vmem:[%s11942_s5 + $0x10] sm:$0xff] %vm6584_vm2, %v6643_v25  ;;  %v6681_v16 = vmax.f32 %v6679_v1, 1e-08 }
 0x6c9   :  { %6648 = vst.msk [vmem:[%s11942_s5 + $0x18] sm:$0xff] %vm6586_vm3, %v6644_v34 }
 0x6ca   :  { %v6683_v18 = vmin.f32 %v6681_v16, 1.0 }
 0x6cc   :  { %6685 = vst.msk [vmem:[%s11942_s5 + $0x18] sm:$0xff] %vm6649_vm4, %v6683_v18 }

</bundles_post_ra>
